<compile_context>
chip_gen: v7x
topology: tpu7x:2x2x1
jax: 0.10.0
libtpu: 0.0.40
codegen_flags: <defaults>
</compile_context>

<pallas_src>
import functools

import jax
import jax.numpy as jnp
from jax import lax
from jax.experimental import pallas as pl
from jax.experimental.pallas import tpu as pltpu


def convlstm_cell_kernel(p_ref, c_ref, w_ref, b_ref, h_out_ref, c_out_ref,
                         *, C_hid):
    """ConvLSTM cell update for a block of M = BB*H*W spatial positions.

    p_ref    : (M, K_pad)      im2col patches of concat([x, h_cur]), bf16
    c_ref    : (M, C_hid)      c_cur, f32
    w_ref    : (K_pad, 4*C_hid) im2col conv weights, g-gate cols pre-scaled x2, bf16
    b_ref    : (1, 4*C_hid)    conv bias (g-gate entries pre-scaled x2), f32
    h_out/c_out : (M, C_hid)   f32 outputs
    """
    # Whole convolution as a single im2col matmul on the MXU; accumulation
    # stays in the MXU result path (f32 via preferred_element_type).
    acc = jnp.dot(p_ref[...], w_ref[...], preferred_element_type=jnp.float32)
    acc = acc + b_ref[...]                                   # (1, 4C) broadcast

    # One full-128-lane sigmoid pass on the EUP.  The g-gate columns were
    # pre-scaled by 2 in the wrapper, so tanh(x) = 2*sigmoid(2x) - 1 comes out
    # of the same pass via a cheap VPU select (gate order i, f, o, g as in
    # torch.split).
    s = jax.nn.sigmoid(acc)
    lane = lax.broadcasted_iota(jnp.int32, s.shape, 1)
    gates = jnp.where(lane >= 3 * C_hid, 2.0 * s - 1.0, s)

    i = gates[:, 0 * C_hid:1 * C_hid]
    f = gates[:, 1 * C_hid:2 * C_hid]
    o = gates[:, 2 * C_hid:3 * C_hid]
    g = gates[:, 3 * C_hid:4 * C_hid]

    c_cur = c_ref[...]
    c_next = f * c_cur + i * g
    h_next = o * jnp.tanh(c_next)

    h_out_ref[...] = h_next
    c_out_ref[...] = c_next


def conv_lstm_cell(x_nchw, h_nchw, c_nchw, weight_oihw, bias_vec, kernel_size,
                   *, batch_block=None):
    """ConvLSTMCell.forward.  Inputs/outputs are NCHW (PyTorch convention)."""
    B, Cin, H, W = x_nchw.shape
    Chid = h_nchw.shape[1]
    KH, KW = kernel_size
    ph, pw = KH // 2, KW // 2
    Ct = Cin + Chid
    K = KH * KW * Ct                               # useful contraction depth
    K_pad = ((K + 127) // 128) * 128               # lane-pad to 128 multiple

    # Default: whole batch in one grid step (single-TC v5e/v6e).  On dual-TC
    # v7x pass batch_block=B//2 so the "parallel" grid axis occupies both
    # TensorCores (break-even around B=2, wins for larger B).
    BB = B if batch_block is None else batch_block
    assert B % BB == 0, "batch_block must divide the batch size"
    nb = B // BB
    Mb = BB * H * W

    # ---- Activation plumbing (XLA, layout only): NCHW -> NHWC, channel
    # concat, "same" spatial pad, im2col patch extraction, lane-pad, bf16.
    x = jnp.transpose(x_nchw, (0, 2, 3, 1))
    h = jnp.transpose(h_nchw, (0, 2, 3, 1))
    comb = jnp.concatenate([x, h], axis=-1)                        # (B,H,W,Ct)
    comb_p = jnp.pad(comb, ((0, 0), (ph, ph), (pw, pw), (0, 0)))
    patches = jnp.concatenate(
        [comb_p[:, dh:dh + H, dw:dw + W, :]
         for dh in range(KH) for dw in range(KW)], axis=-1)        # (B,H,W,K)
    patches = jnp.pad(patches, ((0, 0), (0, 0), (0, 0), (0, K_pad - K)))
    patches = patches.astype(jnp.bfloat16).reshape(B * H * W, K_pad)

    c_flat = jnp.transpose(c_nchw, (0, 2, 3, 1)).astype(jnp.float32)
    c_flat = c_flat.reshape(B * H * W, Chid)

    # ---- Parameter plumbing: OIHW -> im2col (K, 4*Chid), zero-pad the
    # contraction rows, pre-scale the g-gate columns/bias by 2 (exact in fp)
    # so the kernel needs only one sigmoid pass, cast matmul operands to bf16.
    w_mat = jnp.transpose(weight_oihw, (2, 3, 1, 0)).reshape(K, 4 * Chid)
    w_mat = jnp.pad(w_mat, ((0, K_pad - K), (0, 0)))
    gate_scale = jnp.concatenate([jnp.ones((3 * Chid,), jnp.float32),
                                  jnp.full((Chid,), 2.0, jnp.float32)])
    w_mat = (w_mat * gate_scale[None, :]).astype(jnp.bfloat16)
    b_row = bias_vec.reshape(1, 4 * Chid).astype(jnp.float32) * gate_scale[None, :]

    kern = functools.partial(convlstm_cell_kernel, C_hid=Chid)

    h2, c2 = pl.pallas_call(
        kern,
        out_shape=(jax.ShapeDtypeStruct((B * H * W, Chid), jnp.float32),
                   jax.ShapeDtypeStruct((B * H * W, Chid), jnp.float32)),
        grid_spec=pltpu.PrefetchScalarGridSpec(
            num_scalar_prefetch=0,
            grid=(nb,),
            in_specs=[
                pl.BlockSpec((Mb, K_pad), lambda i: (i, 0)),
                pl.BlockSpec((Mb, Chid), lambda i: (i, 0)),
                pl.BlockSpec((K_pad, 4 * Chid), lambda i: (0, 0)),
                pl.BlockSpec((1, 4 * Chid), lambda i: (0, 0)),
            ],
            out_specs=[
                pl.BlockSpec((Mb, Chid), lambda i: (i, 0)),
                pl.BlockSpec((Mb, Chid), lambda i: (i, 0)),
            ],
        ),
        compiler_params=pltpu.CompilerParams(
            dimension_semantics=("parallel",)),
    )(patches, c_flat, w_mat, b_row)

    # Back to NCHW (row-major reshape of leading dims + transpose; XLA glue).
    h_next = jnp.transpose(h2.reshape(B, H, W, Chid), (0, 3, 1, 2))
    c_next = jnp.transpose(c2.reshape(B, H, W, Chid), (0, 3, 1, 2))
    return h_next, c_next


def reference_conv_lstm_cell(x, h, c, w, b):
    """Pure-JAX f32 reference mirroring the PyTorch module (NCHW)."""
    comb = jnp.concatenate([x, h], axis=1)
    kh, kw = w.shape[2], w.shape[3]
    out = lax.conv_general_dilated(
        comb, w, window_strides=(1, 1),
        padding=((kh // 2, kh // 2), (kw // 2, kw // 2)),
        dimension_numbers=("NCHW", "OIHW", "NCHW"))
    out = out + b[None, :, None, None]
    cc_i, cc_f, cc_o, cc_g = jnp.split(out, 4, axis=1)
    i = jax.nn.sigmoid(cc_i)
    f = jax.nn.sigmoid(cc_f)
    o = jax.nn.sigmoid(cc_o)
    g = jnp.tanh(cc_g)
    c_next = f * c + i * g
    h_next = o * jnp.tanh(c_next)
    return h_next, c_next


if __name__ == "__main__":
    # Module config: input_size=(16,16), input_dim=4, hidden_dim=32,
    # kernel_size=(3,3), bias=True.
    B, Cin, Chid, H, W = 2, 4, 32, 16, 16
    KH, KW = 3, 3

    key = jax.random.PRNGKey(0)
    kx, kh, kc, kw_, kb = jax.random.split(key, 5)

    x = jax.random.normal(kx, (B, Cin, H, W), dtype=jnp.float32)
    h_cur = jax.random.normal(kh, (B, Chid, H, W), dtype=jnp.float32)
    c_cur = jax.random.normal(kc, (B, Chid, H, W), dtype=jnp.float32)

    # Deterministic parameter init (Conv2d default-style uniform bound).
    fan_in = (Cin + Chid) * KH * KW
    bound = 1.0 / (fan_in ** 0.5)
    weight = jax.random.uniform(kw_, (4 * Chid, Cin + Chid, KH, KW),
                                minval=-bound, maxval=bound, dtype=jnp.float32)
    bias = jax.random.uniform(kb, (4 * Chid,), minval=-bound, maxval=bound,
                              dtype=jnp.float32)

    h_next, c_next = conv_lstm_cell(x, h_cur, c_cur, weight, bias, (KH, KW))
    jax.block_until_ready((h_next, c_next))

    h_ref, c_ref = reference_conv_lstm_cell(x, h_cur, c_cur, weight, bias)
    assert h_next.shape == (B, Chid, H, W) and c_next.shape == (B, Chid, H, W)
    # bf16 MXU operands with f32 accumulation -> relaxed tolerance vs f32 ref.
    assert jnp.allclose(h_next, h_ref, atol=3e-2, rtol=3e-2)
    assert jnp.allclose(c_next, c_ref, atol=3e-2, rtol=3e-2)

    print("KERNEL_OK")
</pallas_src>

<mosaic_0001>
module attributes {stable_mosaic.version = 11 : i64} {
  func.func @convlstm_cell_kernel(%arg0: i32, %arg1: memref<512x384xbf16, #tpu.memory_space<vmem>>, %arg2: memref<512x32xf32, #tpu.memory_space<vmem>>, %arg3: memref<384x128xbf16, #tpu.memory_space<vmem>>, %arg4: memref<1x128xf32, #tpu.memory_space<vmem>>, %arg5: memref<512x32xf32, #tpu.memory_space<vmem>>, %arg6: memref<512x32xf32, #tpu.memory_space<vmem>>) attributes {dimension_semantics = [#tpu.dimension_semantics<parallel>], iteration_bounds = array<i64: 1>, scalar_prefetch = 0 : i64, scratch_operands = 0 : i64, tpu.core_type = #tpu.core_type<tc>, window_params = [{transform_indices = @transform_0, window_bounds = array<i64: 512, 384>}, {transform_indices = @transform_1, window_bounds = array<i64: 512, 32>}, {pipeline_mode = #tpu.pipeline_mode<synchronous>, transform_indices = @transform_2, window_bounds = array<i64: 384, 128>}, {pipeline_mode = #tpu.pipeline_mode<synchronous>, transform_indices = @transform_3, window_bounds = array<i64: 1, 128>}, {transform_indices = @transform_4, window_bounds = array<i64: 512, 32>}, {transform_indices = @transform_5, window_bounds = array<i64: 512, 32>}]} {
    %c0 = arith.constant 0 : index
    %c0_0 = arith.constant 0 : index
    %0 = vector.load %arg1[%c0, %c0_0] : memref<512x384xbf16, #tpu.memory_space<vmem>>, vector<512x384xbf16>
    %c0_1 = arith.constant 0 : index
    %c0_2 = arith.constant 0 : index
    %1 = vector.load %arg3[%c0_1, %c0_2] : memref<384x128xbf16, #tpu.memory_space<vmem>>, vector<384x128xbf16>
    %cst = arith.constant dense<0.000000e+00> : vector<512x128xf32>
    %2 = tpu.matmul %0, %1, %cst {dimension_numbers = #tpu.dot_dimension_numbers<[1], [0], [0], [1], [0, 0, 1, 1], [], []>} : vector<512x384xbf16>, vector<384x128xbf16>, vector<512x128xf32> -> vector<512x128xf32>
    %c0_3 = arith.constant 0 : index
    %c0_4 = arith.constant 0 : index
    %3 = vector.load %arg4[%c0_3, %c0_4] : memref<1x128xf32, #tpu.memory_space<vmem>>, vector<1x128xf32>
    %4 = vector.broadcast %3 : vector<1x128xf32> to vector<512x128xf32>
    %5 = arith.addf %2, %4 : vector<512x128xf32>
    %6 = arith.negf %5 : vector<512x128xf32>
    %7 = math.exp %6 : vector<512x128xf32>
    %cst_5 = arith.constant 1.000000e+00 : f32
    %8 = vector.broadcast %cst_5 : f32 to vector<512x128xf32>
    %9 = arith.addf %8, %7 : vector<512x128xf32>
    %10 = arith.divf %8, %9 : vector<512x128xf32>
    %11 = tpu.iota {dimensions = array<i32: 1>} : vector<512x128xi32>
    %c96_i32 = arith.constant 96 : i32
    %12 = vector.broadcast %c96_i32 : i32 to vector<512x128xi32>
    %13 = arith.cmpi sge, %11, %12 : vector<512x128xi32>
    %cst_6 = arith.constant 2.000000e+00 : f32
    %14 = vector.broadcast %cst_6 : f32 to vector<512x128xf32>
    %15 = arith.mulf %14, %10 : vector<512x128xf32>
    %cst_7 = arith.constant 1.000000e+00 : f32
    %16 = vector.broadcast %cst_7 : f32 to vector<512x128xf32>
    %17 = arith.subf %15, %16 : vector<512x128xf32>
    %18 = arith.select %13, %17, %10 : vector<512x128xi1>, vector<512x128xf32>
    %19 = vector.extract_strided_slice %18 {offsets = [0, 0], sizes = [512, 32], strides = [1, 1]} : vector<512x128xf32> to vector<512x32xf32>
    %20 = vector.extract_strided_slice %18 {offsets = [0, 32], sizes = [512, 32], strides = [1, 1]} : vector<512x128xf32> to vector<512x32xf32>
    %21 = vector.extract_strided_slice %18 {offsets = [0, 64], sizes = [512, 32], strides = [1, 1]} : vector<512x128xf32> to vector<512x32xf32>
    %22 = vector.extract_strided_slice %18 {offsets = [0, 96], sizes = [512, 32], strides = [1, 1]} : vector<512x128xf32> to vector<512x32xf32>
    %c0_8 = arith.constant 0 : index
    %c0_9 = arith.constant 0 : index
    %23 = vector.load %arg2[%c0_8, %c0_9] : memref<512x32xf32, #tpu.memory_space<vmem>>, vector<512x32xf32>
    %24 = arith.mulf %20, %23 : vector<512x32xf32>
    %25 = arith.mulf %19, %22 : vector<512x32xf32>
    %26 = arith.addf %24, %25 : vector<512x32xf32>
    %27 = math.tanh %26 : vector<512x32xf32>
    %28 = arith.mulf %21, %27 : vector<512x32xf32>
    %c0_10 = arith.constant 0 : index
    %c0_11 = arith.constant 0 : index
    %29 = vector.load %arg5[%c0_10, %c0_11] : memref<512x32xf32, #tpu.memory_space<vmem>>, vector<512x32xf32>
    tpu.vector_store %arg5[%c0_10, %c0_11], %28 {strides = array<i32>} : memref<512x32xf32, #tpu.memory_space<vmem>>, vector<512x32xf32>,
    %c0_12 = arith.constant 0 : index
    %c0_13 = arith.constant 0 : index
    %30 = vector.load %arg6[%c0_12, %c0_13] : memref<512x32xf32, #tpu.memory_space<vmem>>, vector<512x32xf32>
    tpu.vector_store %arg6[%c0_12, %c0_13], %26 {strides = array<i32>} : memref<512x32xf32, #tpu.memory_space<vmem>>, vector<512x32xf32>,
    return
  }
  func.func @transform_0(%arg0: i32) -> (i32, i32) {
    %c0_i32 = arith.constant 0 : i32
    %c0_i32_0 = arith.constant 0 : i32
    return %arg0, %c0_i32 : i32, i32
  }
  func.func @transform_1(%arg0: i32) -> (i32, i32) {
    %c0_i32 = arith.constant 0 : i32
    %c0_i32_0 = arith.constant 0 : i32
    return %arg0, %c0_i32 : i32, i32
  }
  func.func @transform_2(%arg0: i32) -> (i32, i32) {
    %c0_i32 = arith.constant 0 : i32
    %c0_i32_0 = arith.constant 0 : i32
    %c0_i32_1 = arith.constant 0 : i32
    return %c0_i32, %c0_i32_0 : i32, i32
  }
  func.func @transform_3(%arg0: i32) -> (i32, i32) {
    %c0_i32 = arith.constant 0 : i32
    %c0_i32_0 = arith.constant 0 : i32
    %c0_i32_1 = arith.constant 0 : i32
    return %c0_i32, %c0_i32_0 : i32, i32
  }
  func.func @transform_4(%arg0: i32) -> (i32, i32) {
    %c0_i32 = arith.constant 0 : i32
    %c0_i32_0 = arith.constant 0 : i32
    return %arg0, %c0_i32 : i32, i32
  }
  func.func @transform_5(%arg0: i32) -> (i32, i32) {
    %c0_i32 = arith.constant 0 : i32
    %c0_i32_0 = arith.constant 0 : i32
    return %arg0, %c0_i32 : i32, i32
  }
}

</mosaic_0001>

<bundles_post_ra>
// kernel: tpu_custom_call.1
= control target key start
LH: loop header
LB: loop body
LE: loop exit
PB: predicated region body
PF: predicated region fallthrough
CT: control target
= control target key end

     0   :  { %11 = vsyncpa [#allocation3], 0  ;;  %s5057_s18 = smov [#allocation2]   ;;  %s7638_s0 = inlined_call_operand.hbm [shape: bf16[512,384], index: 0, kind: input, shape index: {}]   ;;  %s7639_s1 = inlined_call_operand.vmem [shape: f32[512,32], index: 1, kind: input, shape index: {}]   ;;  %s7640_s2 = inlined_call_operand.vmem [shape: bf16[384,128], index: 2, kind: input, shape index: {}]   ;;  %s7641_s3 = inlined_call_operand.vmem [shape: f32[1,128], index: 3, kind: input, shape index: {}]   ;;  %s7642_s4 = inlined_call_operand.vmem [shape: f32[512,32], index: 4, kind: output, shape index: {0}]   ;;  %s7643_s5 = inlined_call_operand.vmem [shape: f32[512,32], index: 5, kind: output, shape index: {1}]  }
   0x1   :  { %s17_s19 = sshll.u32 %s5057_s18, 4  ;;  %s5033_s22 = scalar_lea.hbm %s7638_s0, 12288  ;;  %s18_s19 = int_to_ptr.vmem [resolvable:$true] %s17_s19 }
   0x2   :  { %p5034_p0 = scmp.ne.s32.totalorder %s7638_s0, %s5033_s22  ;;  %p5037_p1 = scmp.lt.u32.totalorder %s5033_s22, %s7638_s0 }
   0x4   :  { %p5039_p2 = pnand %p5037_p1, %p5034_p0 }
   0x6   :  { %5042 = shalt.err (!%p5039_p2)
}
   0x7   :  { %s5043_s27 = scalar_lea.vmem %s18_s19, 12288  ;;  %p5048_p4 = scmp.lt.s32.totalorder %s18_s19, %s18_s19 }
   0x8   :  { %p5044_p3 = scmp.ne.s32.totalorder %s18_s19, %s5043_s27  ;;  %p5049_p5 = scmp.lt.s32.totalorder %s5043_s27, %s5043_s27 }
   0xa   :  { %p5050_p6 = por %p5049_p5, %p5048_p4 }
   0xc   :  { %p5051_p7 = pnand %p5050_p6, %p5044_p3 }
   0xe   :  { %5054 = shalt.err (!%p5051_p7)
}
   0xf   :  { %s5058_s28 = smov 192   ;;  %s5059_s29 = smov 12  }
  0x10   :  { %23 = dma.hbm_to_vmem [thread:$0]  %s7638_s0, 12288, %s18_s19, [#allocation3], %s5058_s28, %s5058_s28, %s5059_s29  }
  0x11   :  { %5055 = dma.done.wait [#allocation3], 12288  }
  0x12   :  { %5056 = vsyncadd [#allocation3], 4294955008  ;;  %v5060_v0 = vmov 0   ;;  %v4496_v1 = vld [vmem:[%s7640_s2] sm:$0xff]   ;;  %v4497_v2 = vld [vmem:[%s7640_s2 + $0x8] sm:$0xff]   ;;  %s5061_s6 = smov 32  }
  0x13   :  { %873 = vmatprep.subr.bf16.mxu0 %v5060_v0  ;;  %4457 = vmatprep.subr.bf16.mxu1 %v5060_v0  ;;  %v4498_v3 = vld [vmem:[%s7640_s2 + $0x10] sm:$0xff]   ;;  %v4499_v4 = vld [vmem:[%s7640_s2 + $0x18] sm:$0xff]   ;;  %v4500_v5 = vld [vmem:[%s7640_s2 + $0x20] sm:$0xff]   ;;  %vm3694_vm1 = vcmask 261120   ;;  %s5063_s17 = smov 64  }
  0x14   :  { %874 = vmatpush1.bf16.msra.mxu0 %v4496_v1  ;;  %4473 = vmatpush1.bf16.msra.mxu1 %v4496_v1  ;;  %v4514_v6 = vld [vmem:[#allocation2 + $0x4] ss:$12 sps:$4 sm:$0xff]   ;;  %v4501_v7 = vld [vmem:[%s7640_s2 + $0x28] sm:$0xff]   ;;  %v4503_v10 = vld [vmem:[%s7640_s2 + $0x38] sm:$0xff]  }
  0x15   :  { %875 = vmatprep.subr.bf16.mxu0 %v5060_v0  ;;  %4458 = vmatprep.subr.bf16.mxu1 %v5060_v0  ;;  %v4517_v8 = vld [vmem:[#allocation2 + $0x244] ss:$12 sps:$4 sm:$0xff]   ;;  %v4505_v12 = vld [vmem:[%s7640_s2 + $0x48] sm:$0xff]   ;;  %v4507_v14 = vld [vmem:[%s7640_s2 + $0x58] sm:$0xff]  }
  0x16   :  { %905 = vmatprep.mubr.bf16.mxu0 %v4514_v6  ;;  %1097 = vmatprep.mubr.bf16.mxu1 %v4517_v8  ;;  %v4502_v9 = vld [vmem:[%s7640_s2 + $0x30] sm:$0xff]   ;;  %v4504_v11 = vld [vmem:[%s7640_s2 + $0x40] sm:$0xff]   ;;  %v4509_v16 = vld [vmem:[%s7640_s2 + $0x68] sm:$0xff]  }
  0x17   :  { %v4506_v13 = vld [vmem:[%s7640_s2 + $0x50] sm:$0xff]   ;;  %v4508_v15 = vld [vmem:[%s7640_s2 + $0x60] sm:$0xff]   ;;  %v4511_v18 = vld [vmem:[%s7640_s2 + $0x78] sm:$0xff]  }
  0x18   :  { %876 = vmatpush1.bf16.msra.mxu0 %v4497_v2  ;;  %4474 = vmatpush1.bf16.msra.mxu1 %v4497_v2  ;;  %v4510_v17 = vld [vmem:[%s7640_s2 + $0x70] sm:$0xff]   ;;  %v4518_v19 = vld [vmem:[%s7640_s2 + $0x80] sm:$0xff]   ;;  %v4519_v22 = vld [vmem:[#allocation2 + $0x1c] ss:$12 sps:$4 sm:$0xff]  }
  0x19   :  { %877 = vmatprep.subr.bf16.mxu0 %v5060_v0  ;;  %4459 = vmatprep.subr.bf16.mxu1 %v5060_v0  ;;  %v4512_v20 = vld [vmem:[#allocation2] ss:$12 sps:$4 sm:$0xff]   ;;  %v4521_v23 = vld [vmem:[#allocation2 + $0x25c] ss:$12 sps:$4 sm:$0xff]   ;;  %v4532_v25 = vld [vmem:[%s7640_s2 + $0x90] sm:$0xff]  }
  0x1a   :  { %v4515_v21 = vld [vmem:[#allocation2 + $0x240] ss:$12 sps:$4 sm:$0xff]   ;;  %v4523_v26 = vld [vmem:[#allocation2 + $0x18] ss:$12 sps:$4 sm:$0xff]   ;;  %v4530_v31 = vld [vmem:[#allocation2 + $0x30] ss:$12 sps:$4 sm:$0xff]  }
  0x1b   :  { %v4525_v24 = vld [vmem:[%s7640_s2 + $0x88] sm:$0xff]   ;;  %v4524_v27 = vld [vmem:[#allocation2 + $0x258] ss:$12 sps:$4 sm:$0xff]   ;;  %v4526_v28 = vld [vmem:[#allocation2 + $0x34] ss:$12 sps:$4 sm:$0xff]  }
  0x1c   :  { %878 = vmatpush1.bf16.msra.mxu0 %v4498_v3  ;;  %4475 = vmatpush1.bf16.msra.mxu1 %v4498_v3  ;;  %v4528_v29 = vld [vmem:[#allocation2 + $0x274] ss:$12 sps:$4 sm:$0xff]   ;;  %v4539_v30 = vld [vmem:[%s7640_s2 + $0x98] sm:$0xff]   ;;  %v4553_v36 = vld [vmem:[%s7640_s2 + $0xa8] sm:$0xff]  }
  0x1d   :  { %879 = vmatprep.subr.bf16.mxu0 %v5060_v0  ;;  %4460 = vmatprep.subr.bf16.mxu1 %v5060_v0  ;;  %v4546_v32 = vld [vmem:[%s7640_s2 + $0xa0] sm:$0xff]   ;;  %v4531_v33 = vld [vmem:[#allocation2 + $0x270] ss:$12 sps:$4 sm:$0xff]   ;;  %v4533_v34 = vld [vmem:[#allocation2 + $0x4c] ss:$12 sps:$4 sm:$0xff]  }
  0x1e   :  { %v4535_v35 = vld [vmem:[#allocation2 + $0x28c] ss:$12 sps:$4 sm:$0xff]   ;;  %v4537_v37 = vld [vmem:[#allocation2 + $0x48] ss:$12 sps:$4 sm:$0xff]   ;;  %v4540_v39 = vld [vmem:[#allocation2 + $0x64] ss:$12 sps:$4 sm:$0xff]  }
  0x1f   :  { %v4538_v38 = vld [vmem:[#allocation2 + $0x288] ss:$12 sps:$4 sm:$0xff]   ;;  %v4542_v40 = vld [vmem:[#allocation2 + $0x2a4] ss:$12 sps:$4 sm:$0xff]   ;;  %v4567_v42 = vld [vmem:[%s7640_s2 + $0xb8] sm:$0xff]  }
  0x20   :  { %880 = vmatpush1.bf16.msra.mxu0 %v4499_v4  ;;  %4476 = vmatpush1.bf16.msra.mxu1 %v4499_v4  ;;  %v4560_v41 = vld [vmem:[%s7640_s2 + $0xb0] sm:$0xff]   ;;  %v4544_v43 = vld [vmem:[#allocation2 + $0x60] ss:$12 sps:$4 sm:$0xff]   ;;  %v4547_v45 = vld [vmem:[#allocation2 + $0x7c] ss:$12 sps:$4 sm:$0xff]  }
  0x21   :  { %881 = vmatprep.subr.bf16.mxu0 %v5060_v0  ;;  %4461 = vmatprep.subr.bf16.mxu1 %v5060_v0  ;;  %v4545_v44 = vld [vmem:[#allocation2 + $0x2a0] ss:$12 sps:$4 sm:$0xff]   ;;  %v4549_v46 = vld [vmem:[#allocation2 + $0x2bc] ss:$12 sps:$4 sm:$0xff]   ;;  %v4551_v47 = vld [vmem:[#allocation2 + $0x78] ss:$12 sps:$4 sm:$0xff]  }
  0x22   :  { %v4552_v48 = vld [vmem:[#allocation2 + $0x2b8] ss:$12 sps:$4 sm:$0xff]   ;;  %v4554_v49 = vld [vmem:[#allocation2 + $0x94] ss:$12 sps:$4 sm:$0xff]   ;;  %v4558_v51 = vld [vmem:[#allocation2 + $0x90] ss:$12 sps:$4 sm:$0xff]  }
  0x23   :  { %v4556_v50 = vld [vmem:[#allocation2 + $0x2d4] ss:$12 sps:$4 sm:$0xff]   ;;  %v4559_v52 = vld [vmem:[#allocation2 + $0x2d0] ss:$12 sps:$4 sm:$0xff]   ;;  %v4561_v53 = vld [vmem:[#allocation2 + $0xac] ss:$12 sps:$4 sm:$0xff]  }
  0x24   :  { %882 = vmatpush1.bf16.msra.mxu0 %v4500_v5  ;;  %4477 = vmatpush1.bf16.msra.mxu1 %v4500_v5  ;;  %v4563_v54 = vld [vmem:[#allocation2 + $0x2ec] ss:$12 sps:$4 sm:$0xff]   ;;  %v2030_v55 = vld [vmem:[%s7639_s1] sm:$0xff]  ;;  %v2032_v56 = vld [vmem:[%s7639_s1 + $0x10] sm:$0xff] }
  0x25   :  { %883 = vmatprep.subr.bf16.mxu0 %v5060_v0  ;;  %4462 = vmatprep.subr.bf16.mxu1 %v5060_v0  ;;  %v4565_v57 = vld [vmem:[#allocation2 + $0xa8] ss:$12 sps:$4 sm:$0xff]   ;;  %v4568_v59 = vld [vmem:[#allocation2 + $0xc4] ss:$12 sps:$4 sm:$0xff]   ;;  %v2033_v62 = vld [vmem:[%s7639_s1 + $0x18] sm:$0xff] }
  0x26   :  { %2158 = vrot.lane.b32.xlu0 %v2030_v55, %s5061_s6  ;;  %2162 = vrot.lane.b32.xlu1 %v2032_v56, %s5061_s6  ;;  %v4566_v58 = vld [vmem:[#allocation2 + $0x2e8] ss:$12 sps:$4 sm:$0xff]   ;;  %v2034_v63 = vld [vmem:[%s7639_s1 + $0x20] sm:$0xff]  ;;  %v2037_v6 = vld [vmem:[%s7639_s1 + $0x38] sm:$0xff] }
  0x27   :  { %v4570_v60 = vld [vmem:[#allocation2 + $0x8] ss:$12 sps:$4 sm:$0xff]   ;;  %v4571_v1 = vld [vmem:[#allocation2 + $0xc0] ss:$12 sps:$4 sm:$0xff]   ;;  %v4575_v4 = vld [vmem:[#allocation2 + $0x38] ss:$12 sps:$4 sm:$0xff]  }
  0x28   :  { %884 = vmatpush1.bf16.msra.mxu0 %v4501_v7  ;;  %4478 = vmatpush1.bf16.msra.mxu1 %v4501_v7  ;;  %v2031_v61 = vld [vmem:[%s7639_s1 + $0x8] sm:$0xff]  ;;  %v2036_v5 = vld [vmem:[%s7639_s1 + $0x30] sm:$0xff]  ;;  %v2038_v7 = vld [vmem:[%s7639_s1 + $0x40] sm:$0xff] }
  0x29   :  { %885 = vmatprep.subr.bf16.mxu0 %v5060_v0  ;;  %4463 = vmatprep.subr.bf16.mxu1 %v5060_v0  ;;  %v4572_v2 = vld [vmem:[#allocation2 + $0x20] ss:$12 sps:$4 sm:$0xff]   ;;  %v4573_v3 = vld [vmem:[#allocation2 + $0xdc] ss:$12 sps:$4 sm:$0xff]  }
  0x2a   :  { %2160 = vrot.lane.b32.xlu0 %v2031_v61, %s5061_s6  ;;  %2164 = vrot.lane.b32.xlu1 %v2033_v62, %s5061_s6  ;;  %v2039_v8 = vld [vmem:[%s7639_s1 + $0x48] sm:$0xff]  ;;  %v4607_v56 = vld [vmem:[#allocation2 + $0x170] ss:$12 sps:$4 sm:$0xff]  }
  0x2b   :  { %v4606_v55 = vld [vmem:[#allocation2 + $0x168] ss:$12 sps:$4 sm:$0xff]   ;;  %v2065_v62 = vld [vmem:[%s7639_s1 + $0x118] sm:$0xff] }
  0x2c   :  { %886 = vmatpush1.bf16.msra.mxu0 %v4502_v9  ;;  %4479 = vmatpush1.bf16.msra.mxu1 %v4502_v9  ;;  %v4576_v9 = vld [vmem:[#allocation2 + $0xd8] ss:$12 sps:$4 sm:$0xff]   ;;  %v2064_v61 = vld [vmem:[%s7639_s1 + $0x110] sm:$0xff] }
  0x2d   :  { %887 = vmatprep.subr.bf16.mxu0 %v5060_v0  ;;  %4464 = vmatprep.subr.bf16.mxu1 %v5060_v0 }
  0x2e   :  { %2166 = vrot.lane.b32.xlu0 %v2034_v63, %s5061_s6  ;;  %v4611_v63 = vld [vmem:[#allocation2 + $0x180] ss:$12 sps:$4 sm:$0xff]  }
  0x30   :  { %888 = vmatpush1.bf16.msra.mxu0 %v4503_v10  ;;  %4480 = vmatpush1.bf16.msra.mxu1 %v4503_v10  ;;  %v4577_v10 = vld [vmem:[#allocation2 + $0x50] ss:$12 sps:$4 sm:$0xff]  }
  0x31   :  { %889 = vmatprep.subr.bf16.mxu0 %v5060_v0  ;;  %4465 = vmatprep.subr.bf16.mxu1 %v5060_v0 }
  0x32   :  { %2170 = vrot.lane.b32.xlu0 %v2036_v5, %s5061_s6  ;;  %v2068_v5 = vld [vmem:[%s7639_s1 + $0x130] sm:$0xff] }
  0x34   :  { %890 = vmatpush1.bf16.msra.mxu0 %v4504_v11  ;;  %4481 = vmatpush1.bf16.msra.mxu1 %v4504_v11  ;;  %v4578_v11 = vld [vmem:[#allocation2 + $0xf4] ss:$12 sps:$4 sm:$0xff]  }
  0x35   :  { %891 = vmatprep.subr.bf16.mxu0 %v5060_v0  ;;  %4466 = vmatprep.subr.bf16.mxu1 %v5060_v0 }
  0x36   :  { %2174 = vrot.lane.b32.xlu0 %v2038_v7, %s5061_s6  ;;  %v4616_v7 = vld [vmem:[#allocation2 + $0x198] ss:$12 sps:$4 sm:$0xff]  }
  0x38   :  { %892 = vmatpush1.bf16.msra.mxu0 %v4505_v12  ;;  %4482 = vmatpush1.bf16.msra.mxu1 %v4505_v12  ;;  %v4580_v12 = vld [vmem:[#allocation2 + $0x68] ss:$12 sps:$4 sm:$0xff]  }
  0x39   :  { %893 = vmatprep.subr.bf16.mxu0 %v5060_v0  ;;  %4467 = vmatprep.subr.bf16.mxu1 %v5060_v0 }
  0x3c   :  { %894 = vmatpush1.bf16.msra.mxu0 %v4506_v13  ;;  %4483 = vmatpush1.bf16.msra.mxu1 %v4506_v13  ;;  %v2040_v13 = vld [vmem:[%s7639_s1 + $0x50] sm:$0xff] }
  0x3d   :  { %895 = vmatprep.subr.bf16.mxu0 %v5060_v0  ;;  %4468 = vmatprep.subr.bf16.mxu1 %v5060_v0 }
  0x3e   :  { %2178 = vrot.lane.b32.xlu0 %v2040_v13, %s5061_s6  ;;  %v2072_v13 = vld [vmem:[%s7639_s1 + $0x150] sm:$0xff] }
  0x40   :  { %896 = vmatpush1.bf16.msra.mxu0 %v4507_v14  ;;  %4484 = vmatpush1.bf16.msra.mxu1 %v4507_v14  ;;  %v2041_v14 = vld [vmem:[%s7639_s1 + $0x58] sm:$0xff] }
  0x41   :  { %897 = vmatprep.subr.bf16.mxu0 %v5060_v0  ;;  %4469 = vmatprep.subr.bf16.mxu1 %v5060_v0 }
  0x44   :  { %898 = vmatpush1.bf16.msra.mxu0 %v4508_v15  ;;  %4485 = vmatpush1.bf16.msra.mxu1 %v4508_v15  ;;  %v2042_v15 = vld [vmem:[%s7639_s1 + $0x60] sm:$0xff] }
  0x45   :  { %899 = vmatprep.subr.bf16.mxu0 %v5060_v0  ;;  %4470 = vmatprep.subr.bf16.mxu1 %v5060_v0 }
  0x46   :  { %2182 = vrot.lane.b32.xlu0 %v2042_v15, %s5061_s6  ;;  %v4621_v15 = vld [vmem:[#allocation2 + $0x1b0] ss:$12 sps:$4 sm:$0xff]  }
  0x48   :  { %900 = vmatpush1.bf16.msra.mxu0 %v4509_v16  ;;  %4486 = vmatpush1.bf16.msra.mxu1 %v4509_v16  ;;  %v2043_v16 = vld [vmem:[%s7639_s1 + $0x68] sm:$0xff] }
  0x49   :  { %901 = vmatprep.subr.bf16.mxu0 %v5060_v0  ;;  %4471 = vmatprep.subr.bf16.mxu1 %v5060_v0 }
  0x4c   :  { %902 = vmatpush1.bf16.msra.mxu0 %v4510_v17  ;;  %4487 = vmatpush1.bf16.msra.mxu1 %v4510_v17  ;;  %v4581_v17 = vld [vmem:[#allocation2 + $0xf0] ss:$12 sps:$4 sm:$0xff]  }
  0x4d   :  { %903 = vmatprep.subr.bf16.mxu0 %v5060_v0  ;;  %4472 = vmatprep.subr.bf16.mxu1 %v5060_v0  ;;  %v2035_v0 = vld [vmem:[%s7639_s1 + $0x28] sm:$0xff] }
  0x4e   :  { %2168 = vrot.lane.b32.xlu1 %v2035_v0, %s5061_s6  ;;  %v4612_v0 = vld [vmem:[#allocation2 + $0x1a0] ss:$12 sps:$4 sm:$0xff]  }
  0x50   :  { %904 = vmatpush1.bf16.msra.mxu0 %v4511_v18  ;;  %4488 = vmatpush1.bf16.msra.mxu1 %v4511_v18  ;;  %v4582_v18 = vld [vmem:[#allocation2 + $0x80] ss:$12 sps:$4 sm:$0xff]  }
  0x51   :  { %4377 = vmatprep.subr.bf16.mxu1 %v4518_v19 }
  0x52   :  { %2172 = vrot.lane.b32.xlu1 %v2037_v6, %s5061_s6  ;;  %v2069_v6 = vld [vmem:[%s7639_s1 + $0x138] sm:$0xff] }
  0x53   :  { %906 = vmatmul.mubr.bf16.vlgmr.msra.gmra.mrb[0].mxu0 %v4512_v20  ;;  %1098 = vmatmul.mubr.bf16.vlgmr.msra.gmra.mrb[0].mxu1 %v4515_v21  ;;  %v4585_v20 = vld [vmem:[#allocation2 + $0x98] ss:$12 sps:$4 sm:$0xff]   ;;  %v2044_v21 = vld [vmem:[%s7639_s1 + $0x70] sm:$0xff] }
  0x54   :  { %4378 = vmatpush3.bf16.msra.mxu1 %v4518_v19  ;;  %913 = vmatprep.mubr.bf16.mxu0 %v4519_v22  ;;  %v4583_v19 = vld [vmem:[#allocation2 + $0x10c] ss:$12 sps:$4 sm:$0xff]  }
  0x55   :  { %1105 = vmatprep.mubr.bf16.mxu1 %v4521_v23  ;;  %4379 = vmatprep.subr.bf16.mxu1 %v4525_v24  ;;  %v2045_v22 = vld [vmem:[%s7639_s1 + $0x78] sm:$0xff]  ;;  %v4586_v23 = vld [vmem:[#allocation2 + $0x108] ss:$12 sps:$4 sm:$0xff]  }
  0x56   :  { %2176 = vrot.lane.b32.xlu1 %v2039_v8, %s5061_s6  ;;  %2186 = vrot.lane.b32.xlu0 %v2044_v21, %s5061_s6  ;;  %v4617_v8 = vld [vmem:[#allocation2 + $0x1d0] ss:$12 sps:$4 sm:$0xff]  }
  0x57   :  { %v2076_v21 = vld [vmem:[%s7639_s1 + $0x170] sm:$0xff] }
  0x58   :  { %4380 = vmatpush3.bf16.msra.mxu1 %v4525_v24  ;;  %v4587_v24 = vld [vmem:[#allocation2 + $0xb0] ss:$12 sps:$4 sm:$0xff]  }
  0x59   :  { %4381 = vmatprep.subr.bf16.mxu1 %v4532_v25 }
  0x5a   :  { %2180 = vrot.lane.b32.xlu1 %v2041_v14, %s5061_s6  ;;  %v2073_v14 = vld [vmem:[%s7639_s1 + $0x158] sm:$0xff] }
  0x5b   :  { %914 = vmatmul.mubr.bf16.gmra.mrb[4].mxu0 %v4523_v26  ;;  %1106 = vmatmul.mubr.bf16.gmra.mrb[4].mxu1 %v4524_v27  ;;  %v4588_v26 = vld [vmem:[#allocation2 + $0x124] ss:$12 sps:$4 sm:$0xff]   ;;  %v4590_v27 = vld [vmem:[#allocation2 + $0xc8] ss:$12 sps:$4 sm:$0xff]  }
  0x5c   :  { %921 = vmatprep.mubr.bf16.mxu0 %v4526_v28  ;;  %1113 = vmatprep.mubr.bf16.mxu1 %v4528_v29  ;;  %v2047_v28 = vld [vmem:[%s7639_s1 + $0x88] sm:$0xff]  ;;  %v2048_v29 = vld [vmem:[%s7639_s1 + $0x90] sm:$0xff] }
  0x5d   :  { %4382 = vmatpush3.bf16.msra.mxu1 %v4532_v25  ;;  %v2046_v25 = vld [vmem:[%s7639_s1 + $0x80] sm:$0xff] }
  0x5e   :  { %4383 = vmatprep.subr.bf16.mxu1 %v4539_v30  ;;  %2184 = vrot.lane.b32.xlu1 %v2043_v16, %s5061_s6  ;;  %v4622_v16 = vld [vmem:[#allocation2 + $0x200] ss:$12 sps:$4 sm:$0xff]  }
  0x5f   :  { %2190 = vrot.lane.b32.xlu0 %v2046_v25, %s5061_s6  ;;  %v2078_v25 = vld [vmem:[%s7639_s1 + $0x180] sm:$0xff] }
  0x61   :  { %4384 = vmatpush3.bf16.msra.mxu1 %v4539_v30  ;;  %v2049_v30 = vld [vmem:[%s7639_s1 + $0x98] sm:$0xff] }
  0x62   :  { %4385 = vmatprep.subr.bf16.mxu1 %v4546_v32  ;;  %2188 = vrot.lane.b32.xlu1 %v2045_v22, %s5061_s6  ;;  %v2077_v22 = vld [vmem:[%s7639_s1 + $0x178] sm:$0xff] }
  0x63   :  { %922 = vmatmul.mubr.bf16.gmra.mrb[8].mxu0 %v4530_v31  ;;  %1114 = vmatmul.mubr.bf16.gmra.mrb[8].mxu1 %v4531_v33  ;;  %v4591_v31 = vld [vmem:[#allocation2 + $0x120] ss:$12 sps:$4 sm:$0xff]  }
  0x64   :  { %929 = vmatprep.mubr.bf16.mxu0 %v4533_v34  ;;  %1121 = vmatprep.mubr.bf16.mxu1 %v4535_v35  ;;  %v2050_v33 = vld [vmem:[%s7639_s1 + $0xa0] sm:$0xff]  ;;  %v4593_v34 = vld [vmem:[#allocation2 + $0x13c] ss:$12 sps:$4 sm:$0xff]  }
  0x65   :  { %4386 = vmatpush3.bf16.msra.mxu1 %v4546_v32  ;;  %2194 = vrot.lane.b32.xlu0 %v2048_v29, %s5061_s6  ;;  %v4592_v32 = vld [vmem:[#allocation2 + $0xe0] ss:$12 sps:$4 sm:$0xff]   ;;  %v4595_v35 = vld [vmem:[#allocation2 + $0xf8] ss:$12 sps:$4 sm:$0xff]   ;;  %v2080_v29 = vld [vmem:[%s7639_s1 + $0x190] sm:$0xff] }
  0x66   :  { %4387 = vmatprep.subr.bf16.mxu1 %v4553_v36  ;;  %2192 = vrot.lane.b32.xlu1 %v2047_v28, %s5061_s6  ;;  %v2079_v28 = vld [vmem:[%s7639_s1 + $0x188] sm:$0xff] }
  0x69   :  { %4388 = vmatpush3.bf16.msra.mxu1 %v4553_v36  ;;  %2198 = vrot.lane.b32.xlu0 %v2050_v33, %s5061_s6  ;;  %v2051_v36 = vld [vmem:[%s7639_s1 + $0xa8] sm:$0xff]  ;;  %v2082_v33 = vld [vmem:[%s7639_s1 + $0x1a0] sm:$0xff] }
  0x6a   :  { %4389 = vmatprep.subr.bf16.mxu1 %v4560_v41  ;;  %2196 = vrot.lane.b32.xlu1 %v2049_v30, %s5061_s6  ;;  %v2081_v30 = vld [vmem:[%s7639_s1 + $0x198] sm:$0xff] }
  0x6b   :  { %930 = vmatmul.mubr.bf16.gmra.mrb[12].mxu0 %v4537_v37  ;;  %1122 = vmatmul.mubr.bf16.gmra.mrb[12].mxu1 %v4538_v38  ;;  %v2052_v37 = vld [vmem:[%s7639_s1 + $0xb0] sm:$0xff]  ;;  %v2053_v38 = vld [vmem:[%s7639_s1 + $0xb8] sm:$0xff] }
  0x6c   :  { %937 = vmatprep.mubr.bf16.mxu0 %v4540_v39  ;;  %1129 = vmatprep.mubr.bf16.mxu1 %v4542_v40  ;;  %v4596_v39 = vld [vmem:[#allocation2 + $0x138] ss:$12 sps:$4 sm:$0xff]   ;;  %v4597_v40 = vld [vmem:[#allocation2 + $0x110] ss:$12 sps:$4 sm:$0xff]  }
  0x6d   :  { %4390 = vmatpush3.bf16.msra.mxu1 %v4560_v41  ;;  %2202 = vrot.lane.b32.xlu0 %v2052_v37, %s5061_s6  ;;  %v2054_v41 = vld [vmem:[%s7639_s1 + $0xc0] sm:$0xff]  ;;  %v2084_v37 = vld [vmem:[%s7639_s1 + $0x1b0] sm:$0xff] }
  0x6e   :  { %4391 = vmatprep.subr.bf16.mxu1 %v4567_v42  ;;  %2200 = vrot.lane.b32.xlu1 %v2051_v36, %s5061_s6  ;;  %v2083_v36 = vld [vmem:[%s7639_s1 + $0x1a8] sm:$0xff] }
  0x71   :  { %4392 = vmatpush3.bf16.msra.mxu1 %v4567_v42  ;;  %v4598_v42 = vld [vmem:[#allocation2 + $0x154] ss:$12 sps:$4 sm:$0xff]   ;;  %2206 = vrot.lane.b32.xlu0 %v2054_v41, %s5061_s6 }
  0x72   :  { %2204 = vrot.lane.b32.xlu1 %v2053_v38, %s5061_s6  ;;  %v2085_v38 = vld [vmem:[%s7639_s1 + $0x1b8] sm:$0xff]  ;;  %v4638_v41 = vld [vmem:[#allocation2 + $0x214] ss:$12 sps:$4 sm:$0xff]  }
  0x73   :  { %938 = vmatmul.mubr.bf16.gmra.mrb[16].mxu0 %v4544_v43  ;;  %1130 = vmatmul.mubr.bf16.gmra.mrb[16].mxu1 %v4545_v44  ;;  %v4600_v43 = vld [vmem:[#allocation2 + $0x128] ss:$12 sps:$4 sm:$0xff]  }
  0x74   :  { %945 = vmatprep.mubr.bf16.mxu0 %v4547_v45  ;;  %1137 = vmatprep.mubr.bf16.mxu1 %v4549_v46  ;;  %v2055_v44 = vld [vmem:[%s7639_s1 + $0xc8] sm:$0xff]  ;;  %v2056_v45 = vld [vmem:[%s7639_s1 + $0xd0] sm:$0xff]  ;;  %v2057_v46 = vld [vmem:[%s7639_s1 + $0xd8] sm:$0xff] }
  0x75   :  { %2210 = vrot.lane.b32.xlu0 %v2056_v45, %s5061_s6  ;;  %v2088_v45 = vld [vmem:[%s7639_s1 + $0x1d0] sm:$0xff] }
  0x76   :  { %2208 = vrot.lane.b32.xlu1 %v2055_v44, %s5061_s6  ;;  %v2087_v44 = vld [vmem:[%s7639_s1 + $0x1c8] sm:$0xff] }
  0x7a   :  { %2212 = vrot.lane.b32.xlu1 %v2057_v46, %s5061_s6  ;;  %v2089_v46 = vld [vmem:[%s7639_s1 + $0x1d8] sm:$0xff] }
  0x7b   :  { %946 = vmatmul.mubr.bf16.gmra.mrb[20].mxu0 %v4551_v47  ;;  %1138 = vmatmul.mubr.bf16.gmra.mrb[20].mxu1 %v4552_v48  ;;  %v4601_v47 = vld [vmem:[#allocation2 + $0x150] ss:$12 sps:$4 sm:$0xff]   ;;  %v4602_v48 = vld [vmem:[#allocation2 + $0x140] ss:$12 sps:$4 sm:$0xff]  }
  0x7c   :  { %953 = vmatprep.mubr.bf16.mxu0 %v4554_v49  ;;  %1145 = vmatprep.mubr.bf16.mxu1 %v4556_v50  ;;  %v2058_v49 = vld [vmem:[%s7639_s1 + $0xe0] sm:$0xff]  ;;  %v4603_v50 = vld [vmem:[#allocation2 + $0x16c] ss:$12 sps:$4 sm:$0xff]  }
  0x7d   :  { %2214 = vrot.lane.b32.xlu0 %v2058_v49, %s5061_s6  ;;  %v4643_v49 = vld [vmem:[#allocation2 + $0x22c] ss:$12 sps:$4 sm:$0xff]  }
  0x83   :  { %954 = vmatmul.mubr.bf16.gmra.mrb[24].mxu0 %v4558_v51  ;;  %1146 = vmatmul.mubr.bf16.gmra.mrb[24].mxu1 %v4559_v52  ;;  %v4605_v51 = vld [vmem:[#allocation2 + $0x158] ss:$12 sps:$4 sm:$0xff]   ;;  %v2059_v52 = vld [vmem:[%s7639_s1 + $0xe8] sm:$0xff] }
  0x84   :  { %961 = vmatprep.mubr.bf16.mxu0 %v4561_v53  ;;  %1153 = vmatprep.mubr.bf16.mxu1 %v4563_v54  ;;  %v2060_v53 = vld [vmem:[%s7639_s1 + $0xf0] sm:$0xff]  ;;  %v2061_v54 = vld [vmem:[%s7639_s1 + $0xf8] sm:$0xff] }
  0x85   :  { %2216 = vrot.lane.b32.xlu1 %v2059_v52, %s5061_s6  ;;  %2218 = vrot.lane.b32.xlu0 %v2060_v53, %s5061_s6  ;;  %v2091_v52 = vld [vmem:[%s7639_s1 + $0x1e8] sm:$0xff]  ;;  %v2092_v53 = vld [vmem:[%s7639_s1 + $0x1f0] sm:$0xff] }
  0x89   :  { %2220 = vrot.lane.b32.xlu1 %v2061_v54, %s5061_s6  ;;  %v2093_v54 = vld [vmem:[%s7639_s1 + $0x1f8] sm:$0xff] }
  0x8b   :  { %962 = vmatmul.mubr.bf16.gmra.mrb[28].mxu0 %v4565_v57  ;;  %1154 = vmatmul.mubr.bf16.gmra.mrb[28].mxu1 %v4566_v58  ;;  %v2062_v57 = vld [vmem:[%s7639_s1 + $0x100] sm:$0xff] }
  0x8c   :  { %969 = vmatprep.mubr.bf16.mxu0 %v4568_v59  ;;  %4393 = vmatprep.mubr.bf16.mxu1 %v4570_v60  ;;  %v4608_v58 = vld [vmem:[#allocation2 + $0x184] ss:$12 sps:$4 sm:$0xff]   ;;  %v4610_v59 = vld [vmem:[#allocation2 + $0x188] ss:$12 sps:$4 sm:$0xff]  }
  0x8d   :  { %2222 = vrot.lane.b32.xlu0 %v2062_v57, %s5061_s6  ;;  %v2063_v60 = vld [vmem:[%s7639_s1 + $0x108] sm:$0xff] }
  0x8e   :  { %2224 = vrot.lane.b32.xlu1 %v2063_v60, %s5061_s6 }
  0x91   :  { %2226 = vrot.lane.b32.xlu0 %v2064_v61, %s5061_s6 }
  0x92   :  { %2228 = vrot.lane.b32.xlu1 %v2065_v62, %s5061_s6 }
  0x93   :  { %970 = vmatmul.mubr.bf16.gmra.mrb[32].mxu0 %v4571_v1  ;;  %4394 = vmatmul.mubr.bf16.vlgmr.msra.gmra.mrb[32].mxu1 %v4572_v2  ;;  %v2066_v1 = vld [vmem:[%s7639_s1 + $0x120] sm:$0xff]  ;;  %v4613_v2 = vld [vmem:[#allocation2 + $0x19c] ss:$12 sps:$4 sm:$0xff]  }
  0x94   :  { %977 = vmatprep.mubr.bf16.mxu0 %v4573_v3  ;;  %4397 = vmatprep.mubr.bf16.mxu1 %v4575_v4  ;;  %v4615_v3 = vld [vmem:[#allocation2 + $0x1b8] ss:$12 sps:$4 sm:$0xff]   ;;  %v2067_v4 = vld [vmem:[%s7639_s1 + $0x128] sm:$0xff] }
  0x95   :  { %2230 = vrot.lane.b32.xlu0 %v2066_v1, %s5061_s6 }
  0x96   :  { %2232 = vrot.lane.b32.xlu1 %v2067_v4, %s5061_s6 }
  0x98   :  { %v5466_v57 = vpop.permute.xlu0 %2158 }
  0x99   :  { %2234 = vrot.lane.b32.xlu0 %v2068_v5, %s5061_s6  ;;  %7743 = vst [vmem:[#allocation5_spill] sm:$0xff] %v5466_v57 }
  0x9a   :  { %2236 = vrot.lane.b32.xlu1 %v2069_v6, %s5061_s6 }
  0x9b   :  { %978 = vmatmul.mubr.bf16.gmra.mrb[36].mxu0 %v4576_v9  ;;  %4398 = vmatmul.mubr.bf16.gmra.mrb[36].mxu1 %v4577_v10  ;;  %v2070_v9 = vld [vmem:[%s7639_s1 + $0x140] sm:$0xff] }
  0x9c   :  { %985 = vmatprep.mubr.bf16.mxu0 %v4578_v11  ;;  %4401 = vmatprep.mubr.bf16.mxu1 %v4580_v12  ;;  %v4618_v10 = vld [vmem:[#allocation2 + $0x1b4] ss:$12 sps:$4 sm:$0xff]   ;;  %v2071_v12 = vld [vmem:[%s7639_s1 + $0x148] sm:$0xff] }
  0x9d   :  { %v4620_v11 = vld [vmem:[#allocation2 + $0x1e8] ss:$12 sps:$4 sm:$0xff]   ;;  %2238 = vrot.lane.b32.xlu0 %v2070_v9, %s5061_s6 }
  0x9e   :  { %2240 = vrot.lane.b32.xlu1 %v2071_v12, %s5061_s6 }
  0xa1   :  { %2242 = vrot.lane.b32.xlu0 %v2072_v13, %s5061_s6 }
  0xa2   :  { %2244 = vrot.lane.b32.xlu1 %v2073_v14, %s5061_s6 }
  0xa3   :  { %986 = vmatmul.mubr.bf16.gmra.mrb[40].mxu0 %v4581_v17  ;;  %4402 = vmatmul.mubr.bf16.gmra.mrb[40].mxu1 %v4582_v18  ;;  %v2074_v17 = vld [vmem:[%s7639_s1 + $0x160] sm:$0xff]  ;;  %v4623_v18 = vld [vmem:[#allocation2 + $0x1cc] ss:$12 sps:$4 sm:$0xff]  }
  0xa4   :  { %993 = vmatprep.mubr.bf16.mxu0 %v4583_v19  ;;  %4405 = vmatprep.mubr.bf16.mxu1 %v4585_v20  ;;  %v4625_v19 = vld [vmem:[#allocation2 + $0x218] ss:$12 sps:$4 sm:$0xff]   ;;  %v2075_v20 = vld [vmem:[%s7639_s1 + $0x168] sm:$0xff] }
  0xa5   :  { %2246 = vrot.lane.b32.xlu0 %v2074_v17, %s5061_s6 }
  0xa6   :  { %2248 = vrot.lane.b32.xlu1 %v2075_v20, %s5061_s6 }
  0xa9   :  { %2250 = vrot.lane.b32.xlu0 %v2076_v21, %s5061_s6 }
  0xaa   :  { %2252 = vrot.lane.b32.xlu1 %v2077_v22, %s5061_s6 }
  0xab   :  { %994 = vmatmul.mubr.bf16.gmra.mrb[44].mxu0 %v4586_v23  ;;  %4406 = vmatmul.mubr.bf16.gmra.mrb[44].mxu1 %v4587_v24  ;;  %v4626_v23 = vld [vmem:[#allocation2 + $0x1c8] ss:$12 sps:$4 sm:$0xff]   ;;  %v4627_v24 = vld [vmem:[#allocation2 + $0x230] ss:$12 sps:$4 sm:$0xff]  }
  0xac   :  { %1001 = vmatprep.mubr.bf16.mxu0 %v4588_v26  ;;  %4409 = vmatprep.mubr.bf16.mxu1 %v4590_v27  ;;  %v4628_v26 = vld [vmem:[#allocation2 + $0x1e4] ss:$12 sps:$4 sm:$0xff]   ;;  %v4630_v27 = vld [vmem:[#allocation2 + $0x248] ss:$12 sps:$4 sm:$0xff]  }
  0xad   :  { %2254 = vrot.lane.b32.xlu0 %v2078_v25, %s5061_s6 }
  0xae   :  { %2256 = vrot.lane.b32.xlu1 %v2079_v28, %s5061_s6 }
  0xb1   :  { %2258 = vrot.lane.b32.xlu0 %v2080_v29, %s5061_s6 }
  0xb2   :  { %2260 = vrot.lane.b32.xlu1 %v2081_v30, %s5061_s6 }
  0xb3   :  { %1002 = vmatmul.mubr.bf16.gmra.mrb[48].mxu0 %v4591_v31  ;;  %4410 = vmatmul.mubr.bf16.gmra.mrb[48].mxu1 %v4592_v32  ;;  %v4631_v31 = vld [vmem:[#allocation2 + $0x1e0] ss:$12 sps:$4 sm:$0xff]  }
  0xb4   :  { %1009 = vmatprep.mubr.bf16.mxu0 %v4593_v34  ;;  %4413 = vmatprep.mubr.bf16.mxu1 %v4595_v35  ;;  %v4632_v32 = vld [vmem:[#allocation2 + $0x260] ss:$12 sps:$4 sm:$0xff]   ;;  %v4633_v34 = vld [vmem:[#allocation2 + $0x1fc] ss:$12 sps:$4 sm:$0xff]   ;;  %v4635_v35 = vld [vmem:[#allocation2 + $0x278] ss:$12 sps:$4 sm:$0xff]  }
  0xb5   :  { %2262 = vrot.lane.b32.xlu0 %v2082_v33, %s5061_s6 }
  0xb6   :  { %2264 = vrot.lane.b32.xlu1 %v2083_v36, %s5061_s6 }
  0xb9   :  { %2266 = vrot.lane.b32.xlu0 %v2084_v37, %s5061_s6 }
  0xba   :  { %2268 = vrot.lane.b32.xlu1 %v2085_v38, %s5061_s6 }
  0xbb   :  { %1010 = vmatmul.mubr.bf16.gmra.mrb[52].mxu0 %v4596_v39  ;;  %4414 = vmatmul.mubr.bf16.gmra.mrb[52].mxu1 %v4597_v40  ;;  %v4636_v39 = vld [vmem:[#allocation2 + $0x1f8] ss:$12 sps:$4 sm:$0xff]   ;;  %v4637_v40 = vld [vmem:[#allocation2 + $0x290] ss:$12 sps:$4 sm:$0xff]  }
  0xbc   :  { %1017 = vmatprep.mubr.bf16.mxu0 %v4598_v42  ;;  %4417 = vmatprep.mubr.bf16.mxu1 %v4600_v43  ;;  %v4640_v42 = vld [vmem:[#allocation2 + $0x2a8] ss:$12 sps:$4 sm:$0xff]   ;;  %v2086_v43 = vld [vmem:[%s7639_s1 + $0x1c0] sm:$0xff] }
  0xbd   :  { %2270 = vrot.lane.b32.xlu0 %v2086_v43, %s5061_s6 }
  0xbe   :  { %2272 = vrot.lane.b32.xlu1 %v2087_v44, %s5061_s6 }
  0xc1   :  { %2274 = vrot.lane.b32.xlu0 %v2088_v45, %s5061_s6 }
  0xc2   :  { %2276 = vrot.lane.b32.xlu1 %v2089_v46, %s5061_s6 }
  0xc3   :  { %1018 = vmatmul.mubr.bf16.gmra.mrb[56].mxu0 %v4601_v47  ;;  %4418 = vmatmul.mubr.bf16.gmra.mrb[56].mxu1 %v4602_v48  ;;  %v4641_v47 = vld [vmem:[#allocation2 + $0x210] ss:$12 sps:$4 sm:$0xff]   ;;  %v4642_v48 = vld [vmem:[#allocation2 + $0x2c0] ss:$12 sps:$4 sm:$0xff]  }
  0xc4   :  { %1025 = vmatprep.mubr.bf16.mxu0 %v4603_v50  ;;  %4421 = vmatprep.mubr.bf16.mxu1 %v4605_v51  ;;  %v4645_v50 = vld [vmem:[#allocation2 + $0x2d8] ss:$12 sps:$4 sm:$0xff]  }
  0xc5   :  { %v2090_v51 = vld [vmem:[%s7639_s1 + $0x1e0] sm:$0xff] }
  0xc6   :  { %2278 = vrot.lane.b32.xlu0 %v2090_v51, %s5061_s6  ;;  %2280 = vrot.lane.b32.xlu1 %v2091_v52, %s5061_s6 }
  0xca   :  { %2282 = vrot.lane.b32.xlu0 %v2092_v53, %s5061_s6  ;;  %2284 = vrot.lane.b32.xlu1 %v2093_v54, %s5061_s6 }
  0xcb   :  { %1026 = vmatmul.mubr.bf16.gmra.mrb[60].mxu0 %v4606_v55  ;;  %4422 = vmatmul.mubr.bf16.gmra.mrb[60].mxu1 %v4607_v56  ;;  %v4646_v55 = vld [vmem:[#allocation2 + $0x228] ss:$12 sps:$4 sm:$0xff]   ;;  %v4647_v56 = vld [vmem:[#allocation2 + $0x2f0] ss:$12 sps:$4 sm:$0xff]  }
  0xcc   :  { %1033 = vmatprep.mubr.bf16.mxu0 %v4608_v58  ;;  %4425 = vmatprep.mubr.bf16.mxu1 %v4610_v59  ;;  %v5468_v58 = vpop.permute.xlu1 %2162  ;;  %v5470_v59 = vpop.permute.xlu0 %2160 }
  0xcd   :  { %7744 = vst [vmem:[#allocation6_spill] sm:$0xff] %v5468_v58  ;;  %7745 = vst [vmem:[#allocation7_spill] sm:$0xff] %v5470_v59 }
  0xd0   :  { %v5472_v60 = vpop.permute.xlu1 %2164  ;;  %v5474_v61 = vpop.permute.xlu0 %2166 }
  0xd1   :  { %7746 = vst [vmem:[#allocation8_spill] sm:$0xff] %v5472_v60  ;;  %7747 = vst [vmem:[#allocation9_spill] sm:$0xff] %v5474_v61 }
  0xd3   :  { %1034 = vmatmul.mubr.bf16.gmra.mrb[64].mxu0 %v4611_v63  ;;  %4426 = vmatmul.mubr.bf16.gmra.mrb[64].mxu1 %v4612_v0 }
  0xd4   :  { %1041 = vmatprep.mubr.bf16.mxu0 %v4613_v2  ;;  %4429 = vmatprep.mubr.bf16.mxu1 %v4615_v3  ;;  %v5476_v62 = vpop.permute.xlu1 %2168  ;;  %v5478_v63 = vpop.permute.xlu0 %2170 }
  0xd5   :  { %7748 = vst [vmem:[#allocation10_spill] sm:$0xff] %v5476_v62  ;;  %7749 = vst [vmem:[#allocation11_spill] sm:$0xff] %v5478_v63 }
  0xd8   :  { %v5480_v0 = vpop.permute.xlu1 %2172  ;;  %v5482_v1 = vpop.permute.xlu0 %2174 }
  0xd9   :  { %7750 = vst [vmem:[#allocation12_spill] sm:$0xff] %v5480_v0  ;;  %7751 = vst [vmem:[#allocation13_spill] sm:$0xff] %v5482_v1 }
  0xdb   :  { %1042 = vmatmul.mubr.bf16.gmra.mrb[68].mxu0 %v4616_v7  ;;  %4430 = vmatmul.mubr.bf16.gmra.mrb[68].mxu1 %v4617_v8 }
  0xdc   :  { %1049 = vmatprep.mubr.bf16.mxu0 %v4618_v10  ;;  %4433 = vmatprep.mubr.bf16.mxu1 %v4620_v11  ;;  %v5484_v2 = vpop.permute.xlu1 %2176  ;;  %v5494_v11 = vpop.permute.xlu0 %2178 }
  0xdd   :  { %7752 = vst [vmem:[#allocation14_spill] sm:$0xff] %v5484_v2  ;;  %7753 = vst [vmem:[#allocation15_spill] sm:$0xff] %v5494_v11 }
  0xe0   :  { %v5496_v12 = vpop.permute.xlu1 %2180  ;;  %v5506_v21 = vpop.permute.xlu0 %2182 }
  0xe1   :  { %7754 = vst [vmem:[#allocation16_spill] sm:$0xff] %v5496_v12  ;;  %7755 = vst [vmem:[#allocation17_spill] sm:$0xff] %v5506_v21 }
  0xe3   :  { %1050 = vmatmul.mubr.bf16.gmra.mrb[72].mxu0 %v4621_v15  ;;  %4434 = vmatmul.mubr.bf16.gmra.mrb[72].mxu1 %v4622_v16 }
  0xe4   :  { %1057 = vmatprep.mubr.bf16.mxu0 %v4623_v18  ;;  %4437 = vmatprep.mubr.bf16.mxu1 %v4625_v19  ;;  %v5508_v22 = vpop.permute.xlu1 %2184 }
  0xe5   :  { %7756 = vst [vmem:[#allocation18_spill] sm:$0xff] %v5508_v22 }
  0xeb   :  { %1058 = vmatmul.mubr.bf16.gmra.mrb[76].mxu0 %v4626_v23  ;;  %4438 = vmatmul.mubr.bf16.gmra.mrb[76].mxu1 %v4627_v24 }
  0xec   :  { %1065 = vmatprep.mubr.bf16.mxu0 %v4628_v26  ;;  %4441 = vmatprep.mubr.bf16.mxu1 %v4630_v27 }
  0xf3   :  { %1066 = vmatmul.mubr.bf16.gmra.mrb[80].mxu0 %v4631_v31  ;;  %4442 = vmatmul.mubr.bf16.gmra.mrb[80].mxu1 %v4632_v32  ;;  %v5518_v31 = vpop.permute.xlu0 %2186  ;;  %v5520_v32 = vpop.permute.xlu1 %2188 }
  0xf4   :  { %1073 = vmatprep.mubr.bf16.mxu0 %v4633_v34  ;;  %4445 = vmatprep.mubr.bf16.mxu1 %v4635_v35  ;;  %7757 = vst [vmem:[#allocation19_spill] sm:$0xff] %v5518_v31  ;;  %7758 = vst [vmem:[#allocation20_spill] sm:$0xff] %v5520_v32 }
  0xfb   :  { %1074 = vmatmul.mubr.bf16.gmra.mrb[84].mxu0 %v4636_v39  ;;  %4446 = vmatmul.mubr.bf16.gmra.mrb[84].mxu1 %v4637_v40 }
  0xfc   :  { %1081 = vmatprep.mubr.bf16.mxu0 %v4638_v41  ;;  %4449 = vmatprep.mubr.bf16.mxu1 %v4640_v42  ;;  %v5530_v41 = vpop.permute.xlu0 %2190  ;;  %v5532_v42 = vpop.permute.xlu1 %2192 }
  0xfd   :  { %7759 = vst [vmem:[#allocation21_spill] sm:$0xff] %v5530_v41  ;;  %7760 = vst [vmem:[#allocation22_spill] sm:$0xff] %v5532_v42 }
 0x100   :  { %v5542_v51 = vpop.permute.xlu0 %2194  ;;  %v5544_v52 = vpop.permute.xlu1 %2196 }
 0x101   :  { %7761 = vst [vmem:[#allocation23_spill] sm:$0xff] %v5542_v51  ;;  %7762 = vst [vmem:[#allocation24_spill] sm:$0xff] %v5544_v52 }
 0x103   :  { %1082 = vmatmul.mubr.bf16.gmra.mrb[88].mxu0 %v4641_v47  ;;  %4450 = vmatmul.mubr.bf16.gmra.mrb[88].mxu1 %v4642_v48 }
 0x104   :  { %1089 = vmatprep.mubr.bf16.mxu0 %v4643_v49  ;;  %4453 = vmatprep.mubr.bf16.mxu1 %v4645_v50 }
 0x10b   :  { %1090 = vmatmul.mubr.bf16.gmra.mrb[92].mxu0 %v4646_v55  ;;  %4454 = vmatmul.mubr.bf16.gmra.mrb[92].mxu1 %v4647_v56 }
 0x126   :  { %v5486_v3 = vpop.f32.mrb[0].mxu0  ;;  %v5488_v4 = vpop.f32.mrb[0].mxu1 }
 0x127   :  { %v909_v5 = vpop.f32.mrb[1].mxu0  ;;  %v1101_v6 = vpop.f32.mrb[1].mxu1 }
 0x128   :  { %v5490_v7 = vpop.f32.mrb[2].mxu0  ;;  %v5492_v8 = vpop.f32.mrb[2].mxu1 }
 0x129   :  { %v912_v9 = vpop.f32.mrb[3].mxu0  ;;  %v1104_v10 = vpop.f32.mrb[3].mxu1 }
 0x12e   :  { %v5498_v13 = vpop.f32.mrb[4].mxu0  ;;  %v5500_v14 = vpop.f32.mrb[4].mxu1 }
 0x12f   :  { %v917_v15 = vpop.f32.mrb[5].mxu0  ;;  %v1109_v16 = vpop.f32.mrb[5].mxu1 }
 0x130   :  { %v5502_v17 = vpop.f32.mrb[6].mxu0  ;;  %v5504_v18 = vpop.f32.mrb[6].mxu1 }
 0x131   :  { %v920_v19 = vpop.f32.mrb[7].mxu0  ;;  %v1112_v20 = vpop.f32.mrb[7].mxu1 }
 0x132   :  { %v5554_v15 = vpop.permute.xlu0 %2198  ;;  %v5556_v16 = vpop.permute.xlu1 %2200 }
 0x133   :  { %7763 = vst [vmem:[#allocation25_spill] sm:$0xff] %v5554_v15  ;;  %7764 = vst [vmem:[#allocation26_spill] sm:$0xff] %v5556_v16 }
 0x136   :  { %v5510_v23 = vpop.f32.mrb[8].mxu0  ;;  %v5512_v24 = vpop.f32.mrb[8].mxu1 }
 0x137   :  { %v925_v25 = vpop.f32.mrb[9].mxu0  ;;  %v1117_v26 = vpop.f32.mrb[9].mxu1 }
 0x138   :  { %v5514_v27 = vpop.f32.mrb[10].mxu0  ;;  %v5516_v28 = vpop.f32.mrb[10].mxu1 }
 0x139   :  { %v928_v29 = vpop.f32.mrb[11].mxu0  ;;  %v1120_v30 = vpop.f32.mrb[11].mxu1 }
 0x13e   :  { %v5522_v33 = vpop.f32.mrb[12].mxu0  ;;  %v5524_v34 = vpop.f32.mrb[12].mxu1 }
 0x13f   :  { %v933_v35 = vpop.f32.mrb[13].mxu0  ;;  %v1125_v36 = vpop.f32.mrb[13].mxu1 }
 0x140   :  { %v5526_v37 = vpop.f32.mrb[14].mxu0  ;;  %v5528_v38 = vpop.f32.mrb[14].mxu1 }
 0x141   :  { %v936_v39 = vpop.f32.mrb[15].mxu0  ;;  %v1128_v40 = vpop.f32.mrb[15].mxu1 }
 0x142   :  { %v5566_v39 = vpop.permute.xlu0 %2202  ;;  %v5568_v40 = vpop.permute.xlu1 %2204 }
 0x143   :  { %7765 = vst [vmem:[#allocation27_spill] sm:$0xff] %v5566_v39  ;;  %7766 = vst [vmem:[#allocation28_spill] sm:$0xff] %v5568_v40 }
 0x146   :  { %v5534_v43 = vpop.f32.mrb[16].mxu0  ;;  %v5536_v44 = vpop.f32.mrb[16].mxu1 }
 0x147   :  { %v941_v45 = vpop.f32.mrb[17].mxu0  ;;  %v1133_v46 = vpop.f32.mrb[17].mxu1 }
 0x148   :  { %v5538_v47 = vpop.f32.mrb[18].mxu0  ;;  %v5540_v48 = vpop.f32.mrb[18].mxu1 }
 0x149   :  { %v944_v49 = vpop.f32.mrb[19].mxu0  ;;  %v1136_v50 = vpop.f32.mrb[19].mxu1 }
 0x14e   :  { %v5546_v53 = vpop.f32.mrb[20].mxu0  ;;  %v5548_v54 = vpop.f32.mrb[20].mxu1 }
 0x14f   :  { %v949_v55 = vpop.f32.mrb[21].mxu0  ;;  %v1141_v56 = vpop.f32.mrb[21].mxu1 }
 0x150   :  { %v5550_v5 = vpop.f32.mrb[22].mxu0  ;;  %v5552_v6 = vpop.f32.mrb[22].mxu1 }
 0x151   :  { %v952_v9 = vpop.f32.mrb[23].mxu0  ;;  %v1144_v10 = vpop.f32.mrb[23].mxu1 }
 0x156   :  { %v5558_v19 = vpop.f32.mrb[24].mxu0  ;;  %v5560_v20 = vpop.f32.mrb[24].mxu1 }
 0x157   :  { %v957_v25 = vpop.f32.mrb[25].mxu0  ;;  %v1149_v26 = vpop.f32.mrb[25].mxu1 }
 0x158   :  { %v5562_v29 = vpop.f32.mrb[26].mxu0  ;;  %v5564_v30 = vpop.f32.mrb[26].mxu1  ;;  %v5581_v25 = vld [vmem:[%s7641_s3] ss:$0 sm:$0xff] }
 0x159   :  { %v960_v35 = vpop.f32.mrb[27].mxu0  ;;  %v1152_v36 = vpop.f32.mrb[27].mxu1  ;;  %v916_v26 = vadd.f32 %v5581_v25, %v5498_v13  ;;  %v911_v39 = vadd.f32 %v5581_v25, %v5490_v7 }
 0x15a   :  { %v5585_v35 = vpop.permute.xlu0 %2206  ;;  %v5587_v36 = vpop.permute.xlu1 %2208 }
 0x15b   :  { %7767 = vst [vmem:[#allocation29_spill] sm:$0xff] %v5585_v35  ;;  %7768 = vst [vmem:[#allocation30_spill] sm:$0xff] %v5587_v36 }
 0x15e   :  { %v5570_v45 = vpop.f32.mrb[28].mxu0  ;;  %v5572_v46 = vpop.f32.mrb[28].mxu1 }
 0x15f   :  { %v965_v49 = vpop.f32.mrb[29].mxu0  ;;  %v1157_v50 = vpop.f32.mrb[29].mxu1 }
 0x160   :  { %v5574_v55 = vpop.f32.mrb[30].mxu0  ;;  %v5576_v56 = vpop.f32.mrb[30].mxu1  ;;  %v908_v49 = vadd.f32 %v5581_v25, %v5486_v3 }
 0x161   :  { %v968_v9 = vpop.f32.mrb[31].mxu0  ;;  %v1160_v10 = vpop.f32.mrb[31].mxu1 }
 0x162   :  { %v919_v9 = vadd.f32 %v5581_v25, %v5502_v17  ;;  %v5603_v7 = vpop.permute.xlu1 %2212 }
 0x163   :  { %7770 = vst [vmem:[#allocation32_spill] sm:$0xff] %v5603_v7 }
 0x166   :  { %v5591_v50 = vpop.f32.mrb[32].mxu0  ;;  %v4395_v16 = vpop.f32.mrb[32].mxu1 }
 0x167   :  { %v1205_v10 = vadd.f32 %v4395_v16, %v916_v26  ;;  %v973_v40 = vpop.f32.mrb[33].mxu0  ;;  %v1196_v15 = vpop.f32.mrb[33].mxu1  ;;  %v932_v16 = vadd.f32 %v5581_v25, %v5522_v33 }
 0x168   :  { %v1197_v13 = vadd.f32 %v1196_v15, %v908_v49  ;;  %v5597_v42 = vpop.f32.mrb[34].mxu0  ;;  %v4396_v35 = vpop.f32.mrb[34].mxu1  ;;  %v924_v15 = vadd.f32 %v5581_v25, %v5510_v23 }
 0x169   :  { %v4211_v36 = vmul.f32 -1.442695, %v1205_v10  ;;  %v1208_v52 = vadd.f32 %v4396_v35, %v919_v9  ;;  %v976_v41 = vpop.f32.mrb[35].mxu0  ;;  %v1199_v3 = vpop.f32.mrb[35].mxu1 }
 0x16a   :  { %v4209_v51 = vmul.f32 -1.442695, %v1197_v13  ;;  %v1200_v22 = vadd.f32 %v1199_v3, %v911_v39  ;;  %v5601_v40 = vpop.permute.xlu0 %2210 }
 0x16b   :  { %4648 = vpow2.f32 %v4211_v36  ;;  %v4212_v32 = vmul.f32 -1.442695, %v1208_v52  ;;  %7769 = vst [vmem:[#allocation31_spill] sm:$0xff] %v5601_v40  ;;  %v935_v52 = vadd.f32 %v5581_v25, %v5526_v37 }
 0x16c   :  { %4650 = vpow2.f32 %v4209_v51  ;;  %v4210_v17 = vmul.f32 -1.442695, %v1200_v22 }
 0x16d   :  { %4652 = vpow2.f32 %v4212_v32  ;;  %v927_v32 = vadd.f32 %v5581_v25, %v5514_v27 }
 0x16e   :  { %4654 = vpow2.f32 %v4210_v17  ;;  %v5607_v41 = vpop.f32.mrb[36].mxu0  ;;  %v4399_v26 = vpop.f32.mrb[36].mxu1 }
 0x16f   :  { %v1221_v51 = vadd.f32 %v4399_v26, %v932_v16  ;;  %v981_v22 = vpop.f32.mrb[37].mxu0  ;;  %v1212_v39 = vpop.f32.mrb[37].mxu1  ;;  %v948_v26 = vadd.f32 %v5581_v25, %v5546_v53 }
 0x170   :  { %v1213_v33 = vadd.f32 %v1212_v39, %v924_v15  ;;  %v5613_v35 = vpop.f32.mrb[38].mxu0  ;;  %v4400_v36 = vpop.f32.mrb[38].mxu1 }
 0x171   :  { %v4215_v49 = vmul.f32 -1.442695, %v1221_v51  ;;  %v1224_v9 = vadd.f32 %v4400_v36, %v935_v52  ;;  %v984_v23 = vpop.f32.mrb[39].mxu0  ;;  %v1215_v10 = vpop.f32.mrb[39].mxu1  ;;  %v940_v52 = vadd.f32 %v5581_v25, %v5534_v43  ;;  %v943_v36 = vadd.f32 %v5581_v25, %v5538_v47 }
 0x172   :  { %v4213_v13 = vmul.f32 -1.442695, %v1213_v33  ;;  %v1216_v3 = vadd.f32 %v1215_v10, %v927_v32  ;;  %v5617_v27 = vpop.permute.xlu0 %2214  ;;  %v5619_v15 = vpop.permute.xlu1 %2216  ;;  %v1835_v47 = vlaneseq }
 0x173   :  { %4656 = vpow2.f32 %v4215_v49  ;;  %v4216_v17 = vmul.f32 -1.442695, %v1224_v9  ;;  %7771 = vst [vmem:[#allocation33_spill] sm:$0xff] %v5617_v27  ;;  %7772 = vst [vmem:[#allocation34_spill] sm:$0xff] %v5619_v15 }
 0x174   :  { %4658 = vpow2.f32 %v4213_v13  ;;  %v4214_v37 = vmul.f32 -1.442695, %v1216_v3  ;;  %v951_v13 = vadd.f32 %v5581_v25, %v5550_v5 }
 0x175   :  { %v4649_v16 = vpop.eup %4648  ;;  %4660 = vpow2.f32 %v4216_v17 }
 0x176   :  { %v4651_v22 = vpop.eup %4650  ;;  %v1645_v51 = vadd.f32 1.0, %v4649_v16  ;;  %4662 = vpow2.f32 %v4214_v37  ;;  %v5623_v39 = vpop.f32.mrb[40].mxu0 }
 0x177   :  { %v4403_v32 = vpop.f32.mrb[40].mxu1  ;;  %v4653_v33 = vpop.eup %4652  ;;  %v1643_v49 = vadd.f32 1.0, %v4651_v22 }
 0x178   :  { %v1237_v53 = vadd.f32 %v4403_v32, %v948_v26  ;;  %v989_v9 = vpop.f32.mrb[41].mxu0  ;;  %v1228_v23 = vpop.f32.mrb[41].mxu1  ;;  %4664 = vrcp.f32 %v1645_v51  ;;  %v1646_v3 = vadd.f32 1.0, %v4653_v33 }
 0x179   :  { %v4655_v10 = vpop.eup %4654  ;;  %v1229_v43 = vadd.f32 %v1228_v23, %v940_v52  ;;  %v5629_v17 = vpop.f32.mrb[42].mxu0  ;;  %4666 = vrcp.f32 %v1643_v49  ;;  %v964_v52 = vadd.f32 %v5581_v25, %v5570_v45  ;;  %v959_v45 = vadd.f32 %v5581_v25, %v5562_v29 }
 0x17a   :  { %v4404_v37 = vpop.f32.mrb[42].mxu1  ;;  %v1644_v16 = vadd.f32 1.0, %v4655_v10  ;;  %v4219_v15 = vmul.f32 -1.442695, %v1237_v53  ;;  %v992_v27 = vpop.f32.mrb[43].mxu0  ;;  %4668 = vrcp.f32 %v1646_v3  ;;  %v956_v53 = vadd.f32 %v5581_v25, %v5558_v19 }
 0x17b   :  { %v1231_v7 = vpop.f32.mrb[43].mxu1  ;;  %v4217_v26 = vmul.f32 -1.442695, %v1229_v43  ;;  %v1240_v22 = vadd.f32 %v4404_v37, %v951_v13  ;;  %v5633_v33 = vpop.permute.xlu0 %2218  ;;  %v967_v19 = vadd.f32 %v5581_v25, %v5574_v55 }
 0x17c   :  { %v1232_v32 = vadd.f32 %v1231_v7, %v943_v36  ;;  %4670 = vrcp.f32 %v1644_v16  ;;  %7773 = vst [vmem:[#allocation35_spill] sm:$0xff] %v5633_v33  ;;  %v5635_v49 = vpop.permute.xlu1 %2220  ;;  %v5639_v7 = vand.u32 127, %v1835_v47 }
 0x17d   :  { %4672 = vpow2.f32 %v4219_v15  ;;  %v4220_v9 = vmul.f32 -1.442695, %v1240_v22  ;;  %v4657_v51 = vpop.eup %4656  ;;  %7774 = vst [vmem:[#allocation36_spill] sm:$0xff] %v5635_v49 }
 0x17e   :  { %v4218_v5 = vmul.f32 -1.442695, %v1232_v32  ;;  %4674 = vpow2.f32 %v4217_v26  ;;  %v4659_v27 = vpop.eup %4658  ;;  %v1649_v23 = vadd.f32 1.0, %v4657_v51  ;;  %v5641_v15 = vpop.f32.mrb[44].mxu0  ;;  %vm1837_vm0 = vcmp.ge.s32.totalorder %v5639_v7, 96 }
 0x17f   :  { %4676 = vpow2.f32 %v4220_v9  ;;  %v4407_v36 = vpop.f32.mrb[44].mxu1  ;;  %v4661_v10 = vpop.eup %4660  ;;  %v1647_v13 = vadd.f32 1.0, %v4659_v27  ;;  %v996_v12 = vadd.f32 %v5581_v25, %v5641_v15 }
 0x180   :  { %4678 = vpow2.f32 %v4218_v5  ;;  %v1253_v3 = vadd.f32 %v4407_v36, %v964_v52  ;;  %v997_v43 = vpop.f32.mrb[45].mxu0  ;;  %v1244_v37 = vpop.f32.mrb[45].mxu1  ;;  %v1650_v26 = vadd.f32 1.0, %v4661_v10 }
 0x181   :  { %v4663_v16 = vpop.eup %4662  ;;  %4680 = vrcp.f32 %v1649_v23  ;;  %v1245_v47 = vadd.f32 %v1244_v37, %v956_v53  ;;  %v5647_v22 = vpop.f32.mrb[46].mxu0 }
 0x182   :  { %v4408_v32 = vpop.f32.mrb[46].mxu1  ;;  %4682 = vrcp.f32 %v1647_v13  ;;  %v1648_v9 = vadd.f32 1.0, %v4663_v16  ;;  %v4223_v51 = vmul.f32 -1.442695, %v1253_v3  ;;  %v1000_v49 = vpop.f32.mrb[47].mxu0  ;;  %v999_v15 = vadd.f32 %v5581_v25, %v5647_v22 }
 0x183   :  { %v1247_v29 = vpop.f32.mrb[47].mxu1  ;;  %v4665_v27 = vpop.eup %4664  ;;  %4684 = vrcp.f32 %v1650_v26  ;;  %v4221_v5 = vmul.f32 -1.442695, %v1245_v47  ;;  %v1256_v52 = vadd.f32 %v4408_v32, %v967_v19 }
 0x184   :  { %v1248_v36 = vadd.f32 %v1247_v29, %v959_v45  ;;  %v4667_v43 = vpop.eup %4666  ;;  %4686 = vrcp.f32 %v1648_v9  ;;  %v1840_v55 = vmul.f32 2.0, %v4665_v27  ;;  %v5650_v3 = vpop.permute.xlu0 %2222 }
 0x185   :  { %v4669_v23 = vpop.eup %4668  ;;  %v1838_v53 = vmul.f32 2.0, %v4667_v43  ;;  %4688 = vpow2.f32 %v4223_v51  ;;  %v4224_v10 = vmul.f32 -1.442695, %v1256_v52  ;;  %7775 = vst [vmem:[#allocation37_spill] sm:$0xff] %v5650_v3  ;;  %v5652_v26 = vpop.permute.xlu1 %2224 }
 0x186   :  { %v4222_v37 = vmul.f32 -1.442695, %v1248_v36  ;;  %v4671_v13 = vpop.eup %4670  ;;  %v4275_v16 = vadd.f32 -1.0, %v1840_v55  ;;  %4690 = vpow2.f32 %v4221_v5  ;;  %v1841_v49 = vmul.f32 2.0, %v4669_v23  ;;  %7776 = vst [vmem:[#allocation38_spill] sm:$0xff] %v5652_v26  ;;  %v5654_v32 = vpop.f32.mrb[48].mxu0 }
 0x187   :  { %v4673_v19 = vpop.eup %4672  ;;  %v4273_v45 = vadd.f32 -1.0, %v1838_v53  ;;  %v1839_v47 = vmul.f32 2.0, %v4671_v13  ;;  %4692 = vpow2.f32 %v4224_v10  ;;  %v4411_v9 = vpop.f32.mrb[48].mxu1 }
 0x188   :  { %v4675_v29 = vpop.eup %4674  ;;  %v1653_v33 = vadd.f32 1.0, %v4673_v19  ;;  %v5658_v51 = vsel %vm1837_vm0, %v4275_v16, %v4665_v27  ;;  %v4276_v52 = vadd.f32 -1.0, %v1841_v49  ;;  %4694 = vpow2.f32 %v4222_v37  ;;  %v1005_v5 = vpop.f32.mrb[49].mxu0 }
 0x189   :  { %7777 = vst [vmem:[#allocation39_spill] sm:$0xff] %v5658_v51  ;;  %v1260_v36 = vpop.f32.mrb[49].mxu1  ;;  %v4677_v55 = vpop.eup %4676  ;;  %v1651_v3 = vadd.f32 1.0, %v4675_v29  ;;  %2482 = vrot.lane.b32.xlu0 %v5658_v51, %s5061_s6  ;;  %v4274_v19 = vadd.f32 -1.0, %v1839_v47  ;;  %v972_v29 = vadd.f32 %v5581_v25, %v5591_v50  ;;  %v980_v5 = vadd.f32 %v5581_v25, %v5607_v41 }
 0x18a   :  { %v5660_v26 = vpop.f32.mrb[50].mxu0  ;;  %v4412_v53 = vpop.f32.mrb[50].mxu1  ;;  %4696 = vrcp.f32 %v1653_v33  ;;  %v1654_v40 = vadd.f32 1.0, %v4677_v55  ;;  %v5666_v27 = vsel %vm1837_vm0, %v4276_v52, %v4669_v23  ;;  %v983_v23 = vadd.f32 %v5581_v25, %v5613_v35 }
 0x18b   :  { %v4679_v10 = vpop.eup %4678  ;;  %7778 = vst [vmem:[#allocation40_spill] sm:$0xff] %v5666_v27  ;;  %v1008_v16 = vpop.f32.mrb[51].mxu0  ;;  %4698 = vrcp.f32 %v1651_v3  ;;  %2484 = vrot.lane.b32.xlu1 %v5666_v27, %s5061_s6  ;;  %v5680_v47 = vsel %vm1837_vm0, %v4273_v45, %v4667_v43  ;;  %v1261_v41 = vadd.f32 %v1260_v36, %v972_v29  ;;  %v975_v43 = vadd.f32 %v5581_v25, %v5597_v42 }
 0x18c   :  { %v5668_v37 = vpop.f32.mrb[51].mxu1  ;;  %v4681_v49 = vpop.eup %4680  ;;  %v1652_v21 = vadd.f32 1.0, %v4679_v10  ;;  %4700 = vrcp.f32 %v1654_v40  ;;  %7779 = vst [vmem:[#allocation41_spill] sm:$0xff] %v5680_v47  ;;  %v1269_v16 = vadd.f32 %v4411_v9, %v980_v5  ;;  %v5686_v10 = vsel %vm1837_vm0, %v4274_v19, %v4671_v13 }
 0x18d   :  { %v4683_v33 = vpop.eup %4682  ;;  %v1844_v52 = vmul.f32 2.0, %v4681_v49  ;;  %2478 = vrot.lane.b32.xlu0 %v5680_v47, %s5061_s6  ;;  %7780 = vst [vmem:[#allocation42_spill] sm:$0xff] %v5686_v10  ;;  %v1272_v31 = vadd.f32 %v4412_v53, %v983_v23  ;;  %v5694_v9 = vpop.permute.xlu0 %2226 }
 0x18e   :  { %v4685_v55 = vpop.eup %4684  ;;  %4702 = vrcp.f32 %v1652_v21  ;;  %v1842_v50 = vmul.f32 2.0, %v4683_v33  ;;  %v988_v21 = vadd.f32 %v5581_v25, %v5623_v39  ;;  %7781 = vst [vmem:[#allocation43_spill] sm:$0xff] %v5694_v9  ;;  %v5696_v36 = vpop.permute.xlu1 %2228  ;;  %v991_v39 = vadd.f32 %v5581_v25, %v5629_v17 }
 0x18f   :  { %v4687_v3 = vpop.eup %4686  ;;  %v4279_v35 = vadd.f32 -1.0, %v1844_v52  ;;  %v1845_v40 = vmul.f32 2.0, %v4685_v55  ;;  %2480 = vrot.lane.b32.xlu1 %v5686_v10, %s5061_s6  ;;  %7782 = vst [vmem:[#allocation44_spill] sm:$0xff] %v5696_v36  ;;  %v1011_v42 = vpop.f32.mrb[52].mxu0  ;;  %v4227_v1 = vmul.f32 -1.442695, %v1269_v16 }
 0x190   :  { %v4689_v2 = vpop.eup %4688  ;;  %v1843_v45 = vmul.f32 2.0, %v4687_v3  ;;  %v4277_v29 = vadd.f32 -1.0, %v1842_v50  ;;  %v4415_v23 = vpop.f32.mrb[52].mxu1 }
 0x191   :  { %v4691_v13 = vpop.eup %4690  ;;  %v1657_v19 = vadd.f32 1.0, %v4689_v2  ;;  %v5700_v53 = vsel %vm1837_vm0, %v4279_v35, %v4681_v49  ;;  %v4280_v5 = vadd.f32 -1.0, %v1845_v40  ;;  %v1013_v36 = vpop.f32.mrb[53].mxu0  ;;  %v1285_v22 = vadd.f32 %v4415_v23, %v996_v12 }
 0x192   :  { %7783 = vst [vmem:[#allocation45_spill] sm:$0xff] %v5700_v53  ;;  %v4693_v52 = vpop.eup %4692  ;;  %v1655_v9 = vadd.f32 1.0, %v4691_v13  ;;  %v1276_v11 = vpop.f32.mrb[53].mxu1  ;;  %2490 = vrot.lane.b32.xlu0 %v5700_v53, %s5061_s6  ;;  %v4278_v50 = vadd.f32 -1.0, %v1843_v45  ;;  %v4225_v36 = vmul.f32 -1.442695, %v1261_v41 }
 0x193   :  { %v4695_v2 = vpop.eup %4694  ;;  %4704 = vrcp.f32 %v1657_v19  ;;  %v1658_v49 = vadd.f32 1.0, %v4693_v52  ;;  %v5710_v35 = vsel %vm1837_vm0, %v4280_v5, %v4685_v55  ;;  %v5712_v40 = vpop.f32.mrb[54].mxu0  ;;  %v5720_v55 = vsel %vm1837_vm0, %v4277_v29, %v4683_v33 }
 0x194   :  { %7784 = vst [vmem:[#allocation46_spill] sm:$0xff] %v5710_v35  ;;  %v4416_v17 = vpop.f32.mrb[54].mxu1  ;;  %4706 = vrcp.f32 %v1655_v9  ;;  %v1656_v16 = vadd.f32 1.0, %v4695_v2  ;;  %v1016_v13 = vpop.f32.mrb[55].mxu0  ;;  %2492 = vrot.lane.b32.xlu1 %v5710_v35, %s5061_s6  ;;  %7785 = vst [vmem:[#allocation47_spill] sm:$0xff] %v5720_v55  ;;  %v1264_v5 = vadd.f32 %v5668_v37, %v975_v43  ;;  %v1277_v2 = vadd.f32 %v1276_v11, %v988_v21 }
 0x195   :  { %v1279_v62 = vpop.f32.mrb[55].mxu1  ;;  %v4697_v19 = vpop.eup %4696  ;;  %4708 = vrcp.f32 %v1658_v49  ;;  %v4228_v45 = vmul.f32 -1.442695, %v1272_v31  ;;  %v5727_v13 = vsel %vm1837_vm0, %v4278_v50, %v4687_v3  ;;  %v4231_v43 = vmul.f32 -1.442695, %v1285_v22 }
 0x196   :  { %v4699_v9 = vpop.eup %4698  ;;  %4710 = vrcp.f32 %v1656_v16  ;;  %v1848_v52 = vmul.f32 2.0, %v4697_v19  ;;  %2486 = vrot.lane.b32.xlu0 %v5720_v55, %s5061_s6  ;;  %7786 = vst [vmem:[#allocation48_spill] sm:$0xff] %v5727_v13  ;;  %v4226_v49 = vmul.f32 -1.442695, %v1264_v5  ;;  %v5729_v29 = vpop.permute.xlu0 %2230  ;;  %v4229_v16 = vmul.f32 -1.442695, %v1277_v2 }
 0x197   :  { %v4701_v41 = vpop.eup %4700  ;;  %4712 = vpow2.f32 %v4227_v1  ;;  %v1846_v33 = vmul.f32 2.0, %v4699_v9  ;;  %7787 = vst [vmem:[#allocation49_spill] sm:$0xff] %v5729_v29  ;;  %v5731_v12 = vpop.f32.mrb[56].mxu0  ;;  %v1288_v5 = vadd.f32 %v4416_v17, %v999_v15  ;;  %v1012_v29 = vadd.f32 %v5581_v25, %v1011_v42 }
 0x198   :  { %v4703_v31 = vpop.eup %4702  ;;  %4714 = vpow2.f32 %v4225_v36  ;;  %v4283_v37 = vadd.f32 -1.0, %v1848_v52  ;;  %2488 = vrot.lane.b32.xlu1 %v5727_v13, %s5061_s6  ;;  %v5735_v11 = vpop.permute.xlu1 %2232  ;;  %v1849_v1 = vmul.f32 2.0, %v4701_v41  ;;  %v1280_v52 = vadd.f32 %v1279_v62, %v991_v39 }
 0x199   :  { %7788 = vst [vmem:[#allocation50_spill] sm:$0xff] %v5735_v11  ;;  %4716 = vpow2.f32 %v4228_v45  ;;  %v4281_v3 = vadd.f32 -1.0, %v1846_v33  ;;  %v1847_v21 = vmul.f32 2.0, %v4703_v31  ;;  %v4419_v23 = vpop.f32.mrb[56].mxu1  ;;  %v1021_v50 = vpop.f32.mrb[57].mxu0  ;;  %v1004_v62 = vadd.f32 %v5581_v25, %v5654_v32 }
 0x19a   :  { %4718 = vpow2.f32 %v4226_v49  ;;  %v5739_v36 = vsel %vm1837_vm0, %v4283_v37, %v4697_v19  ;;  %v1292_v22 = vpop.f32.mrb[57].mxu1  ;;  %v5741_v2 = vpop.f32.mrb[58].mxu0  ;;  %v4284_v33 = vadd.f32 -1.0, %v1849_v1  ;;  %v4232_v49 = vmul.f32 -1.442695, %v1288_v5 }
 0x19b   :  { %7789 = vst [vmem:[#allocation51_spill] sm:$0xff] %v5739_v36  ;;  %4720 = vpow2.f32 %v4231_v43  ;;  %v4420_v11 = vpop.f32.mrb[58].mxu1  ;;  %2498 = vrot.lane.b32.xlu0 %v5739_v36, %s5061_s6  ;;  %v1024_v45 = vpop.f32.mrb[59].mxu0  ;;  %v4282_v39 = vadd.f32 -1.0, %v1847_v21  ;;  %v4230_v17 = vmul.f32 -1.442695, %v1280_v52  ;;  %v1301_v15 = vadd.f32 %v4419_v23, %v1012_v29 }
 0x19c   :  { %4722 = vpow2.f32 %v4229_v16  ;;  %v5746_v50 = vpop.f32.mrb[59].mxu1  ;;  %v5752_v42 = vsel %vm1837_vm0, %v4281_v3, %v4699_v9  ;;  %v5756_v43 = vsel %vm1837_vm0, %v4284_v33, %v4701_v41  ;;  %v1015_v5 = vadd.f32 %v5581_v25, %v5712_v40  ;;  %v5764_v9 = vpop.permute.xlu0 %2234 }
 0x19d   :  { %v4705_v19 = vpop.eup %4704  ;;  %7790 = vst [vmem:[#allocation52_spill] sm:$0xff] %v5752_v42  ;;  %7791 = vst [vmem:[#allocation53_spill] sm:$0xff] %v5756_v43  ;;  %4724 = vpow2.f32 %v4232_v49  ;;  %v4235_v21 = vmul.f32 -1.442695, %v1301_v15  ;;  %2500 = vrot.lane.b32.xlu1 %v5756_v43, %s5061_s6  ;;  %v5766_v29 = vpop.permute.xlu1 %2236  ;;  %v1293_v23 = vadd.f32 %v1292_v22, %v1004_v62  ;;  %v5772_v49 = vsel %vm1837_vm0, %v4282_v39, %v4703_v31 }
 0x19e   :  { %v4707_v37 = vpop.eup %4706  ;;  %v1852_v16 = vmul.f32 2.0, %v4705_v19  ;;  %4726 = vpow2.f32 %v4230_v17  ;;  %7792 = vst [vmem:[#allocation54_spill] sm:$0xff] %v5764_v9  ;;  %7793 = vst [vmem:[#allocation55_spill] sm:$0xff] %v5766_v29  ;;  %v1027_v45 = vpop.f32.mrb[60].mxu0  ;;  %v1304_v15 = vadd.f32 %v4420_v11, %v1015_v5  ;;  %v1007_v31 = vadd.f32 %v5581_v25, %v5660_v26 }
 0x19f   :  { %v4709_v1 = vpop.eup %4708  ;;  %v1850_v32 = vmul.f32 2.0, %v4707_v37  ;;  %2494 = vrot.lane.b32.xlu0 %v5752_v42, %s5061_s6  ;;  %v4423_v40 = vpop.f32.mrb[60].mxu1  ;;  %7794 = vst [vmem:[#allocation56_spill] sm:$0xff] %v5772_v49  ;;  %4728 = vpow2.f32 %v4235_v21  ;;  %v1020_v5 = vadd.f32 %v5581_v25, %v5731_v12 }
 0x1a0   :  { %v5768_v41 = vpop.eup %4710  ;;  %v4287_v3 = vadd.f32 -1.0, %v1852_v16  ;;  %v1853_v52 = vmul.f32 2.0, %v4709_v1  ;;  %v1029_v0 = vpop.f32.mrb[61].mxu0 }
 0x1a1   :  { %v4713_v33 = vpop.eup %4712  ;;  %v4285_v17 = vadd.f32 -1.0, %v1850_v32  ;;  %v1308_v61 = vpop.f32.mrb[61].mxu1  ;;  %v1851_v29 = vmul.f32 2.0, %v5768_v41  ;;  %2496 = vrot.lane.b32.xlu1 %v5772_v49, %s5061_s6 }
 0x1a2   :  { %v4715_v9 = vpop.eup %4714  ;;  %v1661_v63 = vadd.f32 1.0, %v4713_v33  ;;  %v5777_v22 = vsel %vm1837_vm0, %v4287_v3, %v4705_v19  ;;  %v4288_v62 = vadd.f32 -1.0, %v1853_v52  ;;  %v1030_v16 = vpop.f32.mrb[62].mxu0  ;;  %v1023_v3 = vadd.f32 %v5581_v25, %v5741_v2 }
 0x1a3   :  { %7795 = vst [vmem:[#allocation57_spill] sm:$0xff] %v5777_v22  ;;  %v4424_v59 = vpop.f32.mrb[62].mxu1  ;;  %v4717_v60 = vpop.eup %4716  ;;  %v1659_v57 = vadd.f32 1.0, %v4715_v9  ;;  %2506 = vrot.lane.b32.xlu0 %v5777_v22, %s5061_s6  ;;  %v4233_v9 = vmul.f32 -1.442695, %v1293_v23 }
 0x1a4   :  { %v1032_v0 = vpop.f32.mrb[63].mxu0  ;;  %v1311_v11 = vpop.f32.mrb[63].mxu1  ;;  %4730 = vrcp.f32 %v1661_v63  ;;  %v1662_v19 = vadd.f32 1.0, %v4717_v60  ;;  %v5789_v32 = vsel %vm1837_vm0, %v4288_v62, %v4709_v1  ;;  %v5795_v60 = vsel %vm1837_vm0, %v4285_v17, %v4707_v37 }
 0x1a5   :  { %v4719_v39 = vpop.eup %4718  ;;  %7796 = vst [vmem:[#allocation58_spill] sm:$0xff] %v5789_v32  ;;  %4732 = vrcp.f32 %v1659_v57  ;;  %7797 = vst [vmem:[#allocation59_spill] sm:$0xff] %v5795_v60  ;;  %v4286_v63 = vadd.f32 -1.0, %v1851_v29  ;;  %v1296_v1 = vadd.f32 %v5746_v50, %v1007_v31  ;;  %v1028_v62 = vadd.f32 %v5581_v25, %v1027_v45  ;;  %2508 = vrot.lane.b32.xlu1 %v5789_v32, %s5061_s6  ;;  %v5803_v57 = vpop.permute.xlu0 %2238 }
 0x1a6   :  { %v4721_v21 = vpop.eup %4720  ;;  %v1660_v26 = vadd.f32 1.0, %v4719_v39  ;;  %4734 = vrcp.f32 %v1662_v19  ;;  %7798 = vst [vmem:[#allocation60_spill] sm:$0xff] %v5803_v57  ;;  %v5805_v2 = vpop.permute.xlu1 %2240  ;;  %v1309_v37 = vadd.f32 %v1308_v61, %v1020_v5  ;;  %v1031_v29 = vadd.f32 %v5581_v25, %v1030_v16 }
 0x1a7   :  { %v4723_v52 = vpop.eup %4722  ;;  %v1665_v33 = vadd.f32 1.0, %v4721_v21  ;;  %2502 = vrot.lane.b32.xlu0 %v5795_v60, %s5061_s6  ;;  %7799 = vst [vmem:[#allocation61_spill] sm:$0xff] %v5805_v2  ;;  %v1312_v17 = vadd.f32 %v1311_v11, %v1023_v3  ;;  %v1035_v0 = vpop.f32.mrb[64].mxu0  ;;  %v4236_v39 = vmul.f32 -1.442695, %v1304_v15  ;;  %v1317_v19 = vadd.f32 %v4423_v40, %v1028_v62 }
 0x1a8   :  { %4736 = vrcp.f32 %v1660_v26  ;;  %v1663_v12 = vadd.f32 1.0, %v4723_v52  ;;  %v4725_v23 = vpop.eup %4724  ;;  %v5808_v50 = vpop.f32.mrb[64].mxu1  ;;  %v5813_v2 = vsel %vm1837_vm0, %v4286_v63, %v5768_v41  ;;  %v1320_v61 = vadd.f32 %v4424_v59, %v1031_v29 }
 0x1a9   :  { %4738 = vrcp.f32 %v1665_v33  ;;  %v4727_v45 = vpop.eup %4726  ;;  %v1666_v31 = vadd.f32 1.0, %v4725_v23  ;;  %v1037_v21 = vpop.f32.mrb[65].mxu0  ;;  %7800 = vst [vmem:[#allocation62_spill] sm:$0xff] %v5813_v2  ;;  %v4234_v3 = vmul.f32 -1.442695, %v1296_v1  ;;  %v1036_v33 = vadd.f32 %v5581_v25, %v1035_v0  ;;  %2504 = vrot.lane.b32.xlu1 %v5813_v2, %s5061_s6 }
 0x1aa   :  { %4740 = vrcp.f32 %v1663_v12  ;;  %v1324_v26 = vpop.f32.mrb[65].mxu1  ;;  %v1664_v52 = vadd.f32 1.0, %v4727_v45  ;;  %v1038_v16 = vpop.f32.mrb[66].mxu0  ;;  %v4239_v62 = vmul.f32 -1.442695, %v1317_v19 }
 0x1ab   :  { %4742 = vpow2.f32 %v4233_v9  ;;  %v5815_v11 = vpop.f32.mrb[66].mxu1  ;;  %v4729_v5 = vpop.eup %4728  ;;  %v1039_v41 = vadd.f32 %v5581_v25, %v1038_v16  ;;  %v4237_v59 = vmul.f32 -1.442695, %v1309_v37  ;;  %v1325_v9 = vadd.f32 %v1324_v26, %v1036_v33 }
 0x1ac   :  { %4744 = vrcp.f32 %v1666_v31  ;;  %v1040_v40 = vpop.f32.mrb[67].mxu0  ;;  %v1327_v15 = vpop.f32.mrb[67].mxu1  ;;  %v1669_v12 = vadd.f32 1.0, %v4729_v5  ;;  %v4240_v23 = vmul.f32 -1.442695, %v1320_v61 }
 0x1ad   :  { %4746 = vrcp.f32 %v1664_v52  ;;  %v1328_v29 = vadd.f32 %v1327_v15, %v1039_v41  ;;  %v4238_v45 = vmul.f32 -1.442695, %v1312_v17  ;;  %v5821_v31 = vpop.permute.xlu0 %2242  ;;  %v5823_v21 = vpop.permute.xlu1 %2244  ;;  %v4241_v15 = vmul.f32 -1.442695, %v1325_v9 }
 0x1ae   :  { %4748 = vpow2.f32 %v4236_v39  ;;  %v4731_v63 = vpop.eup %4730  ;;  %7801 = vst [vmem:[#allocation63_spill] sm:$0xff] %v5821_v31  ;;  %7802 = vst [vmem:[#allocation64_spill] sm:$0xff] %v5823_v21  ;;  %v1043_v19 = vpop.f32.mrb[68].mxu0 }
 0x1af   :  { %4750 = vrcp.f32 %v1669_v12  ;;  %v4733_v1 = vpop.eup %4732  ;;  %v1856_v0 = vmul.f32 2.0, %v4731_v63  ;;  %v5825_v16 = vpop.f32.mrb[68].mxu1  ;;  %v4242_v9 = vmul.f32 -1.442695, %v1328_v29 }
 0x1b0   :  { %4752 = vpow2.f32 %v4234_v3  ;;  %v4735_v52 = vpop.eup %4734  ;;  %v1854_v5 = vmul.f32 2.0, %v4733_v1  ;;  %v1045_v61 = vpop.f32.mrb[69].mxu0 }
 0x1b1   :  { %4754 = vpow2.f32 %v4239_v62  ;;  %v4291_v39 = vadd.f32 -1.0, %v1856_v0  ;;  %v1857_v26 = vmul.f32 2.0, %v4735_v52  ;;  %v5827_v33 = vpop.f32.mrb[69].mxu1  ;;  %v1046_v12 = vpop.f32.mrb[70].mxu0 }
 0x1b2   :  { %v4737_v37 = vpop.eup %4736  ;;  %4756 = vpow2.f32 %v4237_v59  ;;  %v4289_v40 = vadd.f32 -1.0, %v1854_v5  ;;  %v5829_v41 = vpop.f32.mrb[70].mxu1 }
 0x1b3   :  { %v4739_v3 = vpop.eup %4738  ;;  %v1855_v17 = vmul.f32 2.0, %v4737_v37  ;;  %4758 = vpow2.f32 %v4240_v23  ;;  %v5835_v62 = vsel %vm1837_vm0, %v4291_v39, %v4731_v63  ;;  %v4292_v0 = vadd.f32 -1.0, %v1857_v26  ;;  %v1048_v61 = vpop.f32.mrb[71].mxu0 }
 0x1b4   :  { %v5831_v21 = vpop.eup %4740  ;;  %7803 = vst [vmem:[#allocation65_spill] sm:$0xff] %v5835_v62  ;;  %4760 = vpow2.f32 %v4238_v45  ;;  %v1860_v59 = vmul.f32 2.0, %v4739_v3  ;;  %v5837_v31 = vpop.f32.mrb[71].mxu1  ;;  %2514 = vrot.lane.b32.xlu0 %v5835_v62, %s5061_s6  ;;  %v1044_v26 = vadd.f32 %v5581_v25, %v1043_v19  ;;  %v5851_v29 = vsel %vm1837_vm0, %v4289_v40, %v4733_v1 }
 0x1b5   :  { %v4743_v57 = vpop.eup %4742  ;;  %v4290_v5 = vadd.f32 -1.0, %v1855_v17  ;;  %v5843_v2 = vsel %vm1837_vm0, %v4292_v0, %v4735_v52  ;;  %v1858_v63 = vmul.f32 2.0, %v5831_v21  ;;  %4762 = vpow2.f32 %v4241_v15  ;;  %7805 = vst [vmem:[#allocation67_spill] sm:$0xff] %v5851_v29  ;;  %v5853_v61 = vpop.permute.xlu0 %2246 }
 0x1b6   :  { %v4745_v23 = vpop.eup %4744  ;;  %v1667_v58 = vadd.f32 1.0, %v4743_v57  ;;  %7804 = vst [vmem:[#allocation66_spill] sm:$0xff] %v5843_v2  ;;  %v4295_v39 = vadd.f32 -1.0, %v1860_v59  ;;  %2516 = vrot.lane.b32.xlu1 %v5843_v2, %s5061_s6  ;;  %7806 = vst [vmem:[#allocation68_spill] sm:$0xff] %v5853_v61  ;;  %v5855_v52 = vpop.permute.xlu1 %2248 }
 0x1b7   :  { %v4747_v45 = vpop.eup %4746  ;;  %7807 = vst [vmem:[#allocation69_spill] sm:$0xff] %v5855_v52  ;;  %v5859_v15 = vsel %vm1837_vm0, %v4290_v5, %v4737_v37  ;;  %v1861_v2 = vmul.f32 2.0, %v4745_v23  ;;  %v5863_v19 = vpop.f32.mrb[72].mxu1  ;;  %v4293_v40 = vadd.f32 -1.0, %v1858_v63 }
 0x1b8   :  { %v4749_v17 = vpop.eup %4748  ;;  %4764 = vrcp.f32 %v1667_v58  ;;  %v1859_v57 = vmul.f32 2.0, %v4747_v45  ;;  %7808 = vst [vmem:[#allocation70_spill] sm:$0xff] %v5859_v15  ;;  %2510 = vrot.lane.b32.xlu0 %v5851_v29, %s5061_s6  ;;  %v1051_v58 = vpop.f32.mrb[72].mxu0  ;;  %v5867_v61 = vsel %vm1837_vm0, %v4295_v39, %v4739_v3  ;;  %v1333_v29 = vadd.f32 %v5808_v50, %v1044_v26 }
 0x1b9   :  { %v4751_v0 = vpop.eup %4750  ;;  %v1670_v59 = vadd.f32 1.0, %v4749_v17  ;;  %7809 = vst [vmem:[#allocation71_spill] sm:$0xff] %v5867_v61  ;;  %4766 = vpow2.f32 %v4242_v9  ;;  %v1053_v17 = vpop.f32.mrb[73].mxu0  ;;  %v4296_v32 = vadd.f32 -1.0, %v1861_v2  ;;  %v1047_v9 = vadd.f32 %v5581_v25, %v1046_v12 }
 0x1ba   :  { %v4753_v1 = vpop.eup %4752  ;;  %v1864_v52 = vmul.f32 2.0, %v4751_v0  ;;  %v5869_v62 = vpop.f32.mrb[73].mxu1  ;;  %2512 = vrot.lane.b32.xlu1 %v5859_v15, %s5061_s6  ;;  %v4294_v39 = vadd.f32 -1.0, %v1859_v57  ;;  %v5888_v12 = vsel %vm1837_vm0, %v4293_v40, %v5831_v21 }
 0x1bb   :  { %v4755_v37 = vpop.eup %4754  ;;  %4768 = vrcp.f32 %v1670_v59  ;;  %v1668_v5 = vadd.f32 1.0, %v4753_v1  ;;  %v1054_v60 = vpop.f32.mrb[74].mxu0  ;;  %v5881_v2 = vsel %vm1837_vm0, %v4296_v32, %v4745_v23  ;;  %7811 = vst [vmem:[#allocation73_spill] sm:$0xff] %v5888_v12  ;;  %v1052_v32 = vadd.f32 %v5581_v25, %v1051_v58 }
 0x1bc   :  { %v5874_v63 = vpop.f32.mrb[74].mxu1  ;;  %v4757_v49 = vpop.eup %4756  ;;  %v1673_v3 = vadd.f32 1.0, %v4755_v37  ;;  %7810 = vst [vmem:[#allocation72_spill] sm:$0xff] %v5881_v2  ;;  %v4299_v50 = vadd.f32 -1.0, %v1864_v52  ;;  %2522 = vrot.lane.b32.xlu0 %v5867_v61, %s5061_s6  ;;  %v4243_v37 = vmul.f32 -1.442695, %v1333_v29  ;;  %v1055_v23 = vadd.f32 %v5581_v25, %v1054_v60 }
 0x1bd   :  { %v1056_v17 = vpop.f32.mrb[75].mxu0  ;;  %v5877_v22 = vpop.f32.mrb[75].mxu1  ;;  %4770 = vrcp.f32 %v1668_v5  ;;  %v1671_v59 = vadd.f32 1.0, %v4757_v49  ;;  %v1336_v49 = vadd.f32 %v5815_v11, %v1047_v9  ;;  %v5901_v21 = vsel %vm1837_vm0, %v4294_v39, %v4747_v45 }
 0x1be   :  { %v4759_v43 = vpop.eup %4758  ;;  %4772 = vrcp.f32 %v1673_v3  ;;  %2524 = vrot.lane.b32.xlu1 %v5881_v2, %s5061_s6  ;;  %v5895_v52 = vpop.permute.xlu0 %2250  ;;  %7814 = vst [vmem:[#allocation76_spill] sm:$0xff] %v5901_v21  ;;  %v5905_v29 = vsel %vm1837_vm0, %v4299_v50, %v4751_v0  ;;  %v1341_v9 = vadd.f32 %v5827_v33, %v1052_v32  ;;  %v1344_v0 = vadd.f32 %v5837_v31, %v1055_v23 }
 0x1bf   :  { %v4761_v26 = vpop.eup %4760  ;;  %v1674_v1 = vadd.f32 1.0, %v4759_v43  ;;  %4774 = vrcp.f32 %v1671_v59  ;;  %7812 = vst [vmem:[#allocation74_spill] sm:$0xff] %v5895_v52  ;;  %v5897_v43 = vpop.permute.xlu1 %2252  ;;  %7815 = vst [vmem:[#allocation77_spill] sm:$0xff] %v5905_v29  ;;  %v4244_v3 = vmul.f32 -1.442695, %v1336_v49 }
 0x1c0   :  { %v1672_v57 = vadd.f32 1.0, %v4761_v26  ;;  %7813 = vst [vmem:[#allocation75_spill] sm:$0xff] %v5897_v43  ;;  %v4763_v5 = vpop.eup %4762  ;;  %2518 = vrot.lane.b32.xlu0 %v5888_v12, %s5061_s6  ;;  %v1059_v11 = vpop.f32.mrb[76].mxu0  ;;  %v4246_v43 = vmul.f32 -1.442695, %v1344_v0 }
 0x1c1   :  { %4776 = vrcp.f32 %v1674_v1  ;;  %v5909_v58 = vpop.f32.mrb[76].mxu1  ;;  %v1675_v40 = vadd.f32 1.0, %v4763_v5  ;;  %v1061_v17 = vpop.f32.mrb[77].mxu0  ;;  %v1060_v39 = vadd.f32 %v5581_v25, %v1059_v11 }
 0x1c2   :  { %4778 = vrcp.f32 %v1672_v57  ;;  %v4765_v60 = vpop.eup %4764  ;;  %v5912_v59 = vpop.f32.mrb[77].mxu1  ;;  %2520 = vrot.lane.b32.xlu1 %v5901_v21, %s5061_s6  ;;  %v4245_v57 = vmul.f32 -1.442695, %v1341_v9 }
 0x1c3   :  { %4780 = vpow2.f32 %v4243_v37  ;;  %v1862_v45 = vmul.f32 2.0, %v4765_v60  ;;  %v1062_v50 = vpop.f32.mrb[78].mxu0  ;;  %v5918_v26 = vpop.f32.mrb[78].mxu1  ;;  %v1349_v23 = vadd.f32 %v5825_v16, %v1060_v39 }
 0x1c4   :  { %v4767_v1 = vpop.eup %4766  ;;  %4782 = vrcp.f32 %v1675_v40  ;;  %v1063_v37 = vadd.f32 %v5581_v25, %v1062_v50  ;;  %v1064_v33 = vpop.f32.mrb[79].mxu0  ;;  %2530 = vrot.lane.b32.xlu0 %v5905_v29, %s5061_s6 }
 0x1c5   :  { %v5921_v49 = vpop.f32.mrb[79].mxu1  ;;  %v4769_v32 = vpop.eup %4768  ;;  %v1676_v5 = vadd.f32 1.0, %v4767_v1  ;;  %v4297_v17 = vadd.f32 -1.0, %v1862_v45  ;;  %4784 = vpow2.f32 %v4244_v3  ;;  %v4247_v16 = vmul.f32 -1.442695, %v1349_v23 }
 0x1c6   :  { %v1865_v31 = vmul.f32 2.0, %v4769_v32  ;;  %4786 = vpow2.f32 %v4245_v57  ;;  %v1352_v11 = vadd.f32 %v5829_v41, %v1063_v37  ;;  %v5931_v3 = vpop.permute.xlu0 %2254  ;;  %v1067_v41 = vpop.f32.mrb[80].mxu0 }
 0x1c7   :  { %v4771_v40 = vpop.eup %4770  ;;  %4788 = vrcp.f32 %v1676_v5  ;;  %v5929_v9 = vsel %vm1837_vm0, %v4297_v17, %v4765_v60  ;;  %7817 = vst [vmem:[#allocation79_spill] sm:$0xff] %v5931_v3  ;;  %v5935_v57 = vpop.permute.xlu1 %2256  ;;  %v5946_v5 = vld [vmem:[%s7641_s3] ss:$0 sm:$0xff]  ;;  %s5062_s3 = smov 96  }
 0x1c8   :  { %v4773_v25 = vpop.eup %4772  ;;  %7816 = vst [vmem:[#allocation78_spill] sm:$0xff] %v5929_v9  ;;  %v1863_v50 = vmul.f32 2.0, %v4771_v40  ;;  %v4300_v45 = vadd.f32 -1.0, %v1865_v31  ;;  %4790 = vpow2.f32 %v4246_v43  ;;  %2526 = vrot.lane.b32.xlu0 %v5929_v9, %s5061_s6  ;;  %v4248_v39 = vmul.f32 -1.442695, %v1352_v11  ;;  %7818 = vst [vmem:[#allocation80_spill] sm:$0xff] %v5935_v57 }
 0x1c9   :  { %v4775_v0 = vpop.eup %4774  ;;  %v1868_v1 = vmul.f32 2.0, %v4773_v25  ;;  %v1068_v17 = vadd.f32 %v5946_v5, %v1067_v41  ;;  %v4443_v31 = vpop.f32.mrb[80].mxu1  ;;  %v1100_v52 = vadd.f32 %v5946_v5, %v5488_v4  ;;  %4792 = vpow2.f32 %v4247_v16 }
 0x1ca   :  { %v4298_v33 = vadd.f32 -1.0, %v1863_v50  ;;  %v5941_v60 = vsel %vm1837_vm0, %v4300_v45, %v4769_v32  ;;  %v1866_v43 = vmul.f32 2.0, %v4775_v0  ;;  %v1069_v23 = vpop.f32.mrb[81].mxu0  ;;  %v5953_v50 = vadd.f32 %v5946_v5, %v5492_v8  ;;  %v1388_v45 = vpop.f32.mrb[81].mxu1 }
 0x1cb   :  { %v5937_v37 = vpop.eup %4776  ;;  %7819 = vst [vmem:[#allocation81_spill] sm:$0xff] %v5941_v60  ;;  %v1108_v32 = vadd.f32 %v5946_v5, %v5500_v14  ;;  %2532 = vrot.lane.b32.xlu1 %v5941_v60, %s5061_s6  ;;  %v1070_v57 = vpop.f32.mrb[82].mxu0  ;;  %v4303_v9 = vadd.f32 -1.0, %v1868_v1  ;;  %4794 = vpow2.f32 %v4248_v39  ;;  %v1111_v8 = vadd.f32 %v5946_v5, %v5504_v18 }
 0x1cc   :  { %v4779_v11 = vpop.eup %4778  ;;  %v4301_v3 = vadd.f32 -1.0, %v1866_v43  ;;  %v4444_v21 = vpop.f32.mrb[82].mxu1  ;;  %v5963_v29 = vadd.f32 %v5946_v5, %v5512_v24  ;;  %v1869_v60 = vmul.f32 2.0, %v5937_v37  ;;  %v5968_v43 = vsel %vm1837_vm0, %v4298_v33, %v4771_v40 }
 0x1cd   :  { %v4781_v41 = vpop.eup %4780  ;;  %v1867_v23 = vmul.f32 2.0, %v4779_v11  ;;  %v1072_v4 = vpop.f32.mrb[83].mxu0  ;;  %7820 = vst [vmem:[#allocation82_spill] sm:$0xff] %v5968_v43  ;;  %v1357_v18 = vadd.f32 %v5869_v62, %v1068_v17  ;;  %v5977_v24 = vadd.f32 %v5946_v5, %v5516_v28  ;;  %v5993_v28 = vsel %vm1837_vm0, %v4303_v9, %v4773_v25 }
 0x1ce   :  { %v1677_v14 = vadd.f32 1.0, %v4781_v41  ;;  %v1391_v16 = vpop.f32.mrb[83].mxu1  ;;  %v4783_v2 = vpop.eup %4782  ;;  %v5972_v1 = vsel %vm1837_vm0, %v4301_v3, %v4775_v0  ;;  %v5981_v41 = vadd.f32 %v5946_v5, %v5524_v34  ;;  %v1071_v42 = vadd.f32 %v5946_v5, %v1070_v57 }
 0x1cf   :  { %7821 = vst [vmem:[#allocation83_spill] sm:$0xff] %v5972_v1  ;;  %v4302_v39 = vadd.f32 -1.0, %v1867_v23  ;;  %v4785_v4 = vpop.eup %4784  ;;  %v1870_v12 = vmul.f32 2.0, %v4783_v2  ;;  %2528 = vrot.lane.b32.xlu1 %v5968_v43, %s5061_s6  ;;  %2534 = vrot.lane.b32.xlu0 %v5972_v1, %s5061_s6  ;;  %v4249_v34 = vmul.f32 -1.442695, %v1357_v18  ;;  %v5995_v0 = vpop.permute.xlu0 %2258  ;;  %v1397_v1 = vadd.f32 %v4443_v31, %v1108_v32 }
 0x1d0   :  { %4796 = vrcp.f32 %v1677_v14  ;;  %v4787_v40 = vpop.eup %4786  ;;  %v1678_v3 = vadd.f32 1.0, %v4785_v4  ;;  %7822 = vst [vmem:[#allocation84_spill] sm:$0xff] %v5995_v0  ;;  %v5997_v33 = vpop.permute.xlu1 %2260  ;;  %v4304_v14 = vadd.f32 -1.0, %v1869_v60  ;;  %v1127_v18 = vadd.f32 %v5946_v5, %v5528_v38 }
 0x1d1   :  { %v5989_v62 = vsel %vm1837_vm0, %v4302_v39, %v4779_v11  ;;  %7823 = vst [vmem:[#allocation85_spill] sm:$0xff] %v5997_v33  ;;  %v4789_v17 = vpop.eup %4788  ;;  %v1679_v23 = vadd.f32 1.0, %v4787_v40  ;;  %v4305_v43 = vadd.f32 -1.0, %v1870_v12  ;;  %v1075_v15 = vpop.f32.mrb[84].mxu0  ;;  %v1389_v39 = vadd.f32 %v1388_v45, %v1100_v52 }
 0x1d2   :  { %v4447_v4 = vpop.f32.mrb[84].mxu1  ;;  %v4791_v61 = vpop.eup %4790  ;;  %4798 = vrcp.f32 %v1678_v3  ;;  %v1871_v11 = vmul.f32 2.0, %v4789_v17  ;;  %v4259_v12 = vmul.f32 -1.442695, %v1397_v1  ;;  %v1400_v3 = vadd.f32 %v4444_v21, %v1111_v8 }
 0x1d3   :  { %v1077_v25 = vpop.f32.mrb[85].mxu0  ;;  %v1404_v9 = vpop.f32.mrb[85].mxu1  ;;  %4800 = vrcp.f32 %v1679_v23  ;;  %v1680_v33 = vadd.f32 1.0, %v4791_v61  ;;  %2536 = vrot.lane.b32.xlu1 %v5989_v62, %s5061_s6  ;;  %2538 = vrot.lane.b32.xlu0 %v5993_v28, %s5061_s6  ;;  %v6008_v52 = vsel %vm1837_vm0, %v4305_v43, %v4783_v2  ;;  %v4257_v32 = vmul.f32 -1.442695, %v1389_v39 }
 0x1d4   :  { %v1078_v60 = vpop.f32.mrb[86].mxu0  ;;  %v4448_v31 = vpop.f32.mrb[86].mxu1  ;;  %v4306_v57 = vadd.f32 -1.0, %v1871_v11  ;;  %4802 = vpow2.f32 %v4249_v34  ;;  %v1360_v61 = vadd.f32 %v5877_v22, %v1071_v42  ;;  %v1392_v23 = vadd.f32 %v1391_v16, %v5953_v50 }
 0x1d5   :  { %v1407_v45 = vpop.f32.mrb[87].mxu1  ;;  %v1080_v38 = vpop.f32.mrb[87].mxu0  ;;  %4804 = vrcp.f32 %v1680_v33  ;;  %v6015_v1 = vsel %vm1837_vm0, %v4304_v14, %v5937_v37  ;;  %v1076_v43 = vadd.f32 %v5946_v5, %v1075_v15  ;;  %v4260_v22 = vmul.f32 -1.442695, %v1400_v3 }
 0x1d6   :  { %v4793_v40 = vpop.eup %4792  ;;  %4806 = vpow2.f32 %v4259_v12  ;;  %v6020_v34 = vsel %vm1837_vm0, %v4306_v57, %v4789_v17  ;;  %v4250_v42 = vmul.f32 -1.442695, %v1360_v61  ;;  %v4258_v21 = vmul.f32 -1.442695, %v1392_v23  ;;  %v6027_v50 = vpop.permute.xlu0 %2262 }
 0x1d7   :  { %v4795_v25 = vpop.eup %4794  ;;  %v1681_v2 = vadd.f32 1.0, %v4793_v40  ;;  %4808 = vpow2.f32 %v4257_v32  ;;  %2540 = vrot.lane.b32.xlu1 %v6015_v1, %s5061_s6  ;;  %2542 = vrot.lane.b32.xlu0 %v6008_v52, %s5061_s6  ;;  %v1365_v37 = vadd.f32 %v5863_v19, %v1076_v43  ;;  %7824 = vst [vmem:[#allocation86_spill] sm:$0xff] %v6027_v50  ;;  %v6029_v15 = vpop.permute.xlu1 %2264  ;;  %v1413_v16 = vadd.f32 %v4447_v4, %v5981_v41 }
 0x1d8   :  { %v1682_v33 = vadd.f32 1.0, %v4795_v25  ;;  %7825 = vst [vmem:[#allocation87_spill] sm:$0xff] %v6029_v15  ;;  %v1405_v17 = vadd.f32 %v1404_v9, %v5963_v29  ;;  %v1079_v14 = vadd.f32 %v5946_v5, %v1078_v60  ;;  %v1083_v11 = vpop.f32.mrb[88].mxu0  ;;  %v4451_v39 = vpop.f32.mrb[88].mxu1  ;;  %v1416_v32 = vadd.f32 %v4448_v31, %v1127_v18 }
 0x1d9   :  { %4810 = vrcp.f32 %v1681_v2  ;;  %v4251_v57 = vmul.f32 -1.442695, %v1365_v37  ;;  %v1085_v38 = vpop.f32.mrb[89].mxu0  ;;  %v6034_v19 = vpop.f32.mrb[89].mxu1  ;;  %v4263_v40 = vmul.f32 -1.442695, %v1413_v16  ;;  %v1408_v18 = vadd.f32 %v1407_v45, %v5977_v24 }
 0x1da   :  { %v4797_v8 = vpop.eup %4796  ;;  %4812 = vrcp.f32 %v1682_v33  ;;  %v4261_v61 = vmul.f32 -1.442695, %v1405_v17  ;;  %v1368_v41 = vadd.f32 %v5874_v63, %v1079_v14  ;;  %v6039_v29 = vpop.f32.mrb[90].mxu0  ;;  %v1084_v43 = vadd.f32 %v5946_v5, %v1083_v11 }
 0x1db   :  { %v1872_v12 = vmul.f32 2.0, %v4797_v8  ;;  %4814 = vpow2.f32 %v4250_v42  ;;  %2544 = vrot.lane.b32.xlu1 %v6020_v34, %s5061_s6  ;;  %v6041_v4 = vpop.f32.mrb[90].mxu1  ;;  %v1088_v3 = vpop.f32.mrb[91].mxu0  ;;  %v1140_v63 = vadd.f32 %v5946_v5, %v5548_v54  ;;  %v4264_v37 = vmul.f32 -1.442695, %v1416_v32 }
 0x1dc   :  { %4816 = vpow2.f32 %v4260_v22  ;;  %v4799_v9 = vpop.eup %4798  ;;  %v6044_v31 = vpop.f32.mrb[91].mxu1  ;;  %v4252_v2 = vmul.f32 -1.442695, %v1368_v41  ;;  %v1373_v54 = vadd.f32 %v5912_v59, %v1084_v43  ;;  %v4262_v32 = vmul.f32 -1.442695, %v1408_v18 }
 0x1dd   :  { %v4307_v60 = vadd.f32 -1.0, %v1872_v12  ;;  %4818 = vpow2.f32 %v4258_v21  ;;  %v4801_v23 = vpop.eup %4800  ;;  %v1873_v25 = vmul.f32 2.0, %v4799_v9  ;;  %v6055_v16 = vpop.permute.xlu0 %2266 }
 0x1de   :  { %4820 = vpow2.f32 %v4251_v57  ;;  %v4803_v33 = vpop.eup %4802  ;;  %v1874_v22 = vmul.f32 2.0, %v4801_v23  ;;  %7826 = vst [vmem:[#allocation88_spill] sm:$0xff] %v6055_v16  ;;  %v6064_v41 = vpop.f32.mrb[92].mxu1 }
 0x1df   :  { %v6051_v42 = vsel %vm1837_vm0, %v4307_v60, %v4797_v8  ;;  %4822 = vpow2.f32 %v4263_v40  ;;  %v4805_v24 = vpop.eup %4804  ;;  %v4308_v45 = vadd.f32 -1.0, %v1873_v25  ;;  %v1683_v21 = vadd.f32 1.0, %v4803_v33  ;;  %v6058_v8 = vpop.permute.xlu1 %2268 }
 0x1e0   :  { %4824 = vpow2.f32 %v4261_v61  ;;  %2546 = vrot.lane.b32.xlu0 %v6051_v42, %s5061_s6  ;;  %v4807_v17 = vpop.eup %4806  ;;  %v4309_v14 = vadd.f32 -1.0, %v1874_v22  ;;  %v1875_v11 = vmul.f32 2.0, %v4805_v24  ;;  %7827 = vst [vmem:[#allocation89_spill] sm:$0xff] %v6058_v8  ;;  %v1429_v40 = vadd.f32 %v4451_v39, %v1140_v63  ;;  %v1091_v61 = vpop.f32.mrb[92].mxu0 }
 0x1e1   :  { %4826 = vpow2.f32 %v4252_v2  ;;  %v4809_v12 = vpop.eup %4808  ;;  %v6062_v57 = vsel %vm1837_vm0, %v4308_v45, %v4799_v9  ;;  %v1693_v38 = vadd.f32 1.0, %v4807_v17  ;;  %v1093_v2 = vpop.f32.mrb[93].mxu0  ;;  %v1132_v39 = vadd.f32 %v5946_v5, %v5536_v44 }
 0x1e2   :  { %v6068_v3 = vsel %vm1837_vm0, %v4309_v14, %v4801_v23  ;;  %v4310_v25 = vadd.f32 -1.0, %v1875_v11  ;;  %4828 = vrcp.f32 %v1683_v21  ;;  %v1691_v59 = vadd.f32 1.0, %v4809_v12  ;;  %2548 = vrot.lane.b32.xlu1 %v6062_v57, %s5061_s6  ;;  %v6072_v9 = vpop.f32.mrb[93].mxu1  ;;  %v6078_v23 = vpop.f32.mrb[94].mxu0 }
 0x1e3   :  { %v4811_v60 = vpop.eup %4810  ;;  %4830 = vrcp.f32 %v1693_v38  ;;  %v6080_v33 = vpop.f32.mrb[94].mxu1  ;;  %v1135_v22 = vadd.f32 %v5946_v5, %v5540_v48  ;;  %v1143_v11 = vadd.f32 %v5946_v5, %v5552_v6 }
 0x1e4   :  { %v4813_v43 = vpop.eup %4812  ;;  %v1876_v18 = vmul.f32 2.0, %v4811_v60  ;;  %2550 = vrot.lane.b32.xlu0 %v6068_v3, %s5061_s6  ;;  %v6086_v45 = vsel %vm1837_vm0, %v4310_v25, %v4805_v24  ;;  %4832 = vrcp.f32 %v1691_v59  ;;  %v6088_v44 = vpop.f32.mrb[95].mxu1  ;;  %v1421_v24 = vadd.f32 %v6034_v19, %v1132_v39 }
 0x1e5   :  { %v4815_v63 = vpop.eup %4814  ;;  %v1877_v21 = vmul.f32 2.0, %v4813_v43  ;;  %v1096_v17 = vpop.f32.mrb[95].mxu0  ;;  %4834 = vpow2.f32 %v4264_v37  ;;  %v1087_v37 = vadd.f32 %v5946_v5, %v6039_v29  ;;  %v4267_v29 = vmul.f32 -1.442695, %v1429_v40 }
 0x1e6   :  { %v4817_v14 = vpop.eup %4816  ;;  %v4311_v12 = vadd.f32 -1.0, %v1876_v18  ;;  %v1684_v38 = vadd.f32 1.0, %v4815_v63  ;;  %v6092_v2 = vpop.permute.xlu0 %2270  ;;  %4836 = vpow2.f32 %v4262_v32  ;;  %2552 = vrot.lane.b32.xlu1 %v6086_v45, %s5061_s6  ;;  %v1156_v32 = vadd.f32 %v5946_v5, %v5572_v46 }
 0x1e7   :  { %7828 = vst [vmem:[#allocation90_spill] sm:$0xff] %v6092_v2  ;;  %v4819_v15 = vpop.eup %4818  ;;  %v4312_v48 = vadd.f32 -1.0, %v1877_v21  ;;  %v1694_v8 = vadd.f32 1.0, %v4817_v14  ;;  %v6103_v18 = vpop.permute.xlu1 %2272  ;;  %v4253_v21 = vmul.f32 -1.442695, %v1373_v54  ;;  %v1432_v46 = vadd.f32 %v6041_v4, %v1143_v11 }
 0x1e8   :  { %v4821_v25 = vpop.eup %4820  ;;  %v6099_v59 = vsel %vm1837_vm0, %v4311_v12, %v4811_v60  ;;  %4838 = vrcp.f32 %v1684_v38  ;;  %v1692_v6 = vadd.f32 1.0, %v4819_v15  ;;  %7829 = vst [vmem:[#allocation91_spill] sm:$0xff] %v6103_v18  ;;  %v1376_v12 = vadd.f32 %v5921_v49, %v1087_v37 }
 0x1e9   :  { %v4823_v63 = vpop.eup %4822  ;;  %v6109_v19 = vsel %vm1837_vm0, %v4312_v48, %v4813_v43  ;;  %4840 = vrcp.f32 %v1694_v8  ;;  %v1685_v39 = vadd.f32 1.0, %v4821_v25  ;;  %2554 = vrot.lane.b32.xlu0 %v6099_v59, %s5061_s6  ;;  %v1424_v43 = vadd.f32 %v6044_v31, %v1135_v22 }
 0x1ea   :  { %7830 = vst [vmem:[#allocation92_spill] sm:$0xff] %v6109_v19  ;;  %v4825_v60 = vpop.eup %4824  ;;  %4842 = vrcp.f32 %v1692_v6  ;;  %v1697_v15 = vadd.f32 1.0, %v4823_v63  ;;  %2556 = vrot.lane.b32.xlu1 %v6109_v19, %s5061_s6  ;;  %v1092_v38 = vadd.f32 %v5946_v5, %v1091_v61  ;;  %v6119_v48 = vpop.permute.xlu0 %2274  ;;  %v1148_v40 = vadd.f32 %v5946_v5, %v5560_v20 }
 0x1eb   :  { %v4827_v17 = vpop.eup %4826  ;;  %4844 = vrcp.f32 %v1685_v39  ;;  %v1695_v14 = vadd.f32 1.0, %v4825_v60  ;;  %7831 = vst [vmem:[#allocation93_spill] sm:$0xff] %v6119_v48  ;;  %v4265_v49 = vmul.f32 -1.442695, %v1421_v24  ;;  %v4254_v4 = vmul.f32 -1.442695, %v1376_v12  ;;  %v6129_v31 = vpop.permute.xlu1 %2276 }
 0x1ec   :  { %4846 = vrcp.f32 %v1697_v15  ;;  %v1686_v8 = vadd.f32 1.0, %v4827_v17  ;;  %v6121_v54 = vpop.eup %4828  ;;  %v6126_v11 = vadd.f32 %v5909_v58, %v1092_v38  ;;  %v1445_v6 = vadd.f32 %v6064_v41, %v1156_v32  ;;  %7832 = vst [vmem:[#allocation94_spill] sm:$0xff] %v6129_v31 }
 0x1ed   :  { %4848 = vrcp.f32 %v1695_v14  ;;  %v4831_v25 = vpop.eup %4830  ;;  %v1437_v37 = vadd.f32 %v6072_v9, %v1148_v40  ;;  %v1878_v20 = vmul.f32 2.0, %v6121_v54  ;;  %v4268_v15 = vmul.f32 -1.442695, %v1432_v46 }
 0x1ee   :  { %4850 = vrcp.f32 %v1686_v8  ;;  %v4833_v61 = vpop.eup %4832  ;;  %v1888_v22 = vmul.f32 2.0, %v4831_v25  ;;  %v1151_v41 = vadd.f32 %v5946_v5, %v5564_v30  ;;  %v6137_v14 = vpop.permute.xlu0 %2278  ;;  %v4271_v40 = vmul.f32 -1.442695, %v1445_v6 }
 0x1ef   :  { %4852 = vpow2.f32 %v4253_v21  ;;  %v4835_v63 = vpop.eup %4834  ;;  %v1886_v24 = vmul.f32 2.0, %v4833_v61  ;;  %v4266_v21 = vmul.f32 -1.442695, %v1424_v43  ;;  %7833 = vst [vmem:[#allocation95_spill] sm:$0xff] %v6137_v14  ;;  %v4313_v38 = vadd.f32 -1.0, %v1878_v20  ;;  %v6147_v43 = vpop.permute.xlu1 %2280 }
 0x1f0   :  { %4854 = vpow2.f32 %v4267_v29  ;;  %v4837_v39 = vpop.eup %4836  ;;  %v1698_v60 = vadd.f32 1.0, %v4835_v63  ;;  %v4323_v58 = vadd.f32 -1.0, %v1888_v22  ;;  %v1159_v29 = vadd.f32 %v5946_v5, %v5576_v56  ;;  %7834 = vst [vmem:[#allocation96_spill] sm:$0xff] %v6147_v43 }
 0x1f1   :  { %4856 = vpow2.f32 %v4265_v49  ;;  %v1696_v32 = vadd.f32 1.0, %v4837_v39  ;;  %v4321_v12 = vadd.f32 -1.0, %v1886_v24  ;;  %v4269_v22 = vmul.f32 -1.442695, %v1437_v37 }
 0x1f2   :  { %v6133_v17 = vpop.eup %4838  ;;  %4858 = vpow2.f32 %v4254_v4  ;;  %v6143_v46 = vsel %vm1837_vm0, %v4323_v58, %v4831_v25  ;;  %v1095_v20 = vadd.f32 %v5946_v5, %v6078_v23  ;;  %v1448_v6 = vadd.f32 %v6080_v33, %v1159_v29  ;;  %v6169_v5 = vpop.permute.xlu0 %2282 }
 0x1f3   :  { %v4841_v9 = vpop.eup %4840  ;;  %4860 = vrcp.f32 %v1698_v60  ;;  %2578 = vrot.lane.b32.xlu0 %v6143_v46, %s5061_s6  ;;  %v1879_v56 = vmul.f32 2.0, %v6133_v17  ;;  %v6157_v39 = vsel %vm1837_vm0, %v4321_v12, %v4833_v61  ;;  %v1440_v60 = vadd.f32 %v6088_v44, %v1151_v41  ;;  %7835 = vst [vmem:[#allocation97_spill] sm:$0xff] %v6169_v5 }
 0x1f4   :  { %v4843_v8 = vpop.eup %4842  ;;  %4862 = vrcp.f32 %v1696_v32  ;;  %v1889_v30 = vmul.f32 2.0, %v4841_v9  ;;  %v1384_v32 = vadd.f32 %v5918_v26, %v1095_v20  ;;  %v4272_v33 = vmul.f32 -1.442695, %v1448_v6  ;;  %v6178_v26 = vpop.permute.xlu1 %2284 }
 0x1f5   :  { %v6149_v49 = vpop.eup %4844  ;;  %4864 = vpow2.f32 %v4268_v15  ;;  %v1887_v4 = vmul.f32 2.0, %v4843_v8  ;;  %v6176_v61 = vsel %vm1837_vm0, %v4313_v38, %v6121_v54  ;;  %v4314_v41 = vadd.f32 -1.0, %v1879_v56  ;;  %7837 = vst [vmem:[#allocation99_spill] sm:$0xff] %v6178_v26 }
 0x1f6   :  { %v4847_v63 = vpop.eup %4846  ;;  %4866 = vpow2.f32 %v4266_v21  ;;  %v4324_v25 = vadd.f32 -1.0, %v1889_v30  ;;  %7836 = vst [vmem:[#allocation98_spill] sm:$0xff] %v6176_v61  ;;  %v4255_v20 = vmul.f32 -1.442695, %v6126_v11  ;;  %v4270_v38 = vmul.f32 -1.442695, %v1440_v60 }
 0x1f7   :  { %v4849_v24 = vpop.eup %4848  ;;  %v4322_v15 = vadd.f32 -1.0, %v1887_v4  ;;  %2574 = vrot.lane.b32.xlu0 %v6157_v39, %s5061_s6  ;;  %4868 = vpow2.f32 %v4271_v40  ;;  %v1892_v30 = vmul.f32 2.0, %v4847_v63  ;;  %v6192_v6 = vsel %vm1837_vm0, %v4314_v41, %v6133_v17 }
 0x1f8   :  { %v6160_v58 = vpop.eup %4850  ;;  %v6164_v37 = vsel %vm1837_vm0, %v4324_v25, %v4841_v9  ;;  %4870 = vpow2.f32 %v4269_v22  ;;  %v1890_v12 = vmul.f32 2.0, %v4849_v24  ;;  %7839 = vst [vmem:[#allocation101_spill] sm:$0xff] %v6192_v6 }
 0x1f9   :  { %v4853_v23 = vpop.eup %4852  ;;  %2580 = vrot.lane.b32.xlu1 %v6164_v37, %s5061_s6  ;;  %v6182_v25 = vsel %vm1837_vm0, %v4322_v15, %v4843_v8  ;;  %4872 = vpow2.f32 %v4272_v33  ;;  %v4327_v56 = vadd.f32 -1.0, %v1892_v30  ;;  %v1880_v33 = vmul.f32 2.0, %v6149_v49 }
 0x1fa   :  { %v4855_v44 = vpop.eup %4854  ;;  %v1687_v9 = vadd.f32 1.0, %v4853_v23  ;;  %7838 = vst [vmem:[#allocation100_spill] sm:$0xff] %v6182_v25  ;;  %v4325_v23 = vadd.f32 -1.0, %v1890_v12 }
 0x1fb   :  { %v4857_v21 = vpop.eup %4856  ;;  %v1701_v29 = vadd.f32 1.0, %v4855_v44  ;;  %2558 = vrot.lane.b32.xlu0 %v6176_v61, %s5061_s6  ;;  %v6194_v11 = vpop.permute.xlu0 %2482  ;;  %v6198_v60 = vsel %vm1837_vm0, %v4327_v56, %v4847_v63  ;;  %v4256_v63 = vmul.f32 -1.442695, %v1384_v32  ;;  %v1881_v56 = vmul.f32 2.0, %v6160_v58 }
 0x1fc   :  { %v4859_v40 = vpop.eup %4858  ;;  %v1699_v4 = vadd.f32 1.0, %v4857_v21  ;;  %7840 = vst [vmem:[#allocation102_spill] sm:$0xff] %v6198_v60 }
 0x1fd   :  { %v4861_v54 = vpop.eup %4860  ;;  %4874 = vrcp.f32 %v1701_v29  ;;  %2576 = vrot.lane.b32.xlu1 %v6182_v25, %s5061_s6  ;;  %v1688_v21 = vadd.f32 1.0, %v4859_v40  ;;  %v6203_v17 = vpop.permute.xlu1 %2484  ;;  %v6211_v40 = vsel %vm1837_vm0, %v4325_v23, %v4849_v24 }
 0x1fe   :  { %v4863_v22 = vpop.eup %4862  ;;  %4876 = vrcp.f32 %v1699_v4  ;;  %v1893_v8 = vmul.f32 2.0, %v4861_v54  ;;  %7841 = vst [vmem:[#allocation103_spill] sm:$0xff] %v6211_v40 }
 0x1ff   :  { %v4865_v15 = vpop.eup %4864  ;;  %4878 = vrcp.f32 %v1687_v9  ;;  %v1891_v30 = vmul.f32 2.0, %v4863_v22  ;;  %2586 = vrot.lane.b32.xlu0 %v6198_v60, %s5061_s6  ;;  %v6207_v12 = vpop.permute.xlu0 %2478 }
 0x200   :  { %v4867_v44 = vpop.eup %4866  ;;  %v1702_v29 = vadd.f32 1.0, %v4865_v15  ;;  %4880 = vpow2.f32 %v4255_v20  ;;  %v4328_v9 = vadd.f32 -1.0, %v1893_v8  ;;  %v4315_v20 = vadd.f32 -1.0, %v1880_v33 }
 0x201   :  { %v1700_v41 = vadd.f32 1.0, %v4867_v44  ;;  %4882 = vpow2.f32 %v4270_v38  ;;  %2560 = vrot.lane.b32.xlu1 %v6192_v6, %s5061_s6  ;;  %v4869_v4 = vpop.eup %4868  ;;  %v4326_v38 = vadd.f32 -1.0, %v1891_v30  ;;  %v6220_v32 = vpop.permute.xlu1 %2480 }
 0x202   :  { %4884 = vrcp.f32 %v1702_v29  ;;  %v4871_v15 = vpop.eup %4870  ;;  %v6216_v8 = vsel %vm1837_vm0, %v4328_v9, %v4861_v54  ;;  %v1705_v44 = vadd.f32 1.0, %v4869_v4  ;;  %v4316_v54 = vadd.f32 -1.0, %v1881_v56 }
 0x203   :  { %4886 = vrcp.f32 %v1700_v41  ;;  %7842 = vst [vmem:[#allocation104_spill] sm:$0xff] %v6216_v8  ;;  %2582 = vrot.lane.b32.xlu0 %v6211_v40, %s5061_s6  ;;  %v4873_v24 = vpop.eup %4872  ;;  %v6233_v30 = vsel %vm1837_vm0, %v4326_v38, %v4863_v22  ;;  %v1703_v5 = vadd.f32 1.0, %v4871_v15 }
 0x204   :  { %4888 = vrcp.f32 %v1688_v21  ;;  %v6224_v23 = vpop.permute.xlu0 %2490  ;;  %v6229_v21 = vsel %vm1837_vm0, %v4315_v20, %v6149_v49  ;;  %7844 = vst [vmem:[#allocation106_spill] sm:$0xff] %v6233_v30  ;;  %v6246_v22 = vsel %vm1837_vm0, %v4316_v54, %v6160_v58  ;;  %v1706_v43 = vadd.f32 1.0, %v4873_v24 }
 0x205   :  { %2588 = vrot.lane.b32.xlu1 %v6216_v8, %s5061_s6  ;;  %4890 = vpow2.f32 %v4256_v63  ;;  %7843 = vst [vmem:[#allocation105_spill] sm:$0xff] %v6229_v21  ;;  %7845 = vst [vmem:[#allocation107_spill] sm:$0xff] %v6246_v22 }
 0x206   :  { %v6237_v9 = vpop.permute.xlu1 %2492  ;;  %4892 = vrcp.f32 %v1705_v44 }
 0x207   :  { %v4875_v33 = vpop.eup %4874  ;;  %2562 = vrot.lane.b32.xlu0 %v6229_v21, %s5061_s6  ;;  %4894 = vrcp.f32 %v1703_v5 }
 0x208   :  { %v4877_v29 = vpop.eup %4876  ;;  %v1896_v41 = vmul.f32 2.0, %v4875_v33  ;;  %v6241_v20 = vpop.permute.xlu0 %2486  ;;  %4896 = vrcp.f32 %v1706_v43 }
 0x209   :  { %v4879_v26 = vpop.eup %4878  ;;  %v1894_v4 = vmul.f32 2.0, %v4877_v29  ;;  %2584 = vrot.lane.b32.xlu1 %v6233_v30, %s5061_s6 }
 0x20a   :  { %v4881_v63 = vpop.eup %4880  ;;  %v4331_v49 = vadd.f32 -1.0, %v1896_v41  ;;  %v1882_v31 = vmul.f32 2.0, %v4879_v26  ;;  %v6256_v15 = vpop.permute.xlu1 %2488 }
 0x20b   :  { %v4883_v56 = vpop.eup %4882  ;;  %v4329_v14 = vadd.f32 -1.0, %v1894_v4  ;;  %v1689_v54 = vadd.f32 1.0, %v4881_v63 }
 0x20c   :  { %v4885_v38 = vpop.eup %4884  ;;  %v6250_v18 = vsel %vm1837_vm0, %v4331_v49, %v4875_v33  ;;  %v1704_v4 = vadd.f32 1.0, %v4883_v56  ;;  %v4317_v49 = vadd.f32 -1.0, %v1882_v31 }
 0x20d   :  { %7846 = vst [vmem:[#allocation108_spill] sm:$0xff] %v6250_v18  ;;  %v4887_v2 = vpop.eup %4886  ;;  %v1897_v41 = vmul.f32 2.0, %v4885_v38  ;;  %2564 = vrot.lane.b32.xlu1 %v6246_v22, %s5061_s6  ;;  %2594 = vrot.lane.b32.xlu0 %v6250_v18, %s5061_s6  ;;  %v6260_v33 = vsel %vm1837_vm0, %v4329_v14, %v4877_v29  ;;  %v6262_v48 = vpop.permute.xlu0 %2498  ;;  %4898 = vrcp.f32 %v1689_v54  ;;  %v2670_v54 = vmul.f32 %v6207_v12, %v5680_v47 }
 0x20e   :  { %v4889_v58 = vpop.eup %4888  ;;  %v1895_v44 = vmul.f32 2.0, %v4887_v2  ;;  %7847 = vst [vmem:[#allocation109_spill] sm:$0xff] %v6260_v33  ;;  %4900 = vrcp.f32 %v1704_v4  ;;  %v6276_v31 = vsel %vm1837_vm0, %v4317_v49, %v4879_v26  ;;  %v2671_v12 = vmul.f32 %v6220_v32, %v5686_v10 }
 0x20f   :  { %v4332_v24 = vadd.f32 -1.0, %v1897_v41  ;;  %v4891_v50 = vpop.eup %4890  ;;  %v1883_v5 = vmul.f32 2.0, %v4889_v58  ;;  %v6272_v43 = vpop.permute.xlu1 %2500  ;;  %7849 = vst [vmem:[#allocation111_spill] sm:$0xff] %v6276_v31  ;;  %v2680_v7 = vmul.f32 %v6262_v48, %v5739_v36 }
 0x210   :  { %v4330_v16 = vadd.f32 -1.0, %v1895_v44  ;;  %v1690_v14 = vadd.f32 1.0, %v4891_v50  ;;  %v4893_v29 = vpop.eup %4892  ;;  %v2672_v50 = vmul.f32 %v6194_v11, %v5658_v51  ;;  %v2673_v11 = vmul.f32 %v6203_v17, %v5666_v27 }
 0x211   :  { %v6266_v0 = vsel %vm1837_vm0, %v4332_v24, %v4885_v38  ;;  %2590 = vrot.lane.b32.xlu0 %v6260_v33, %s5061_s6  ;;  %v4318_v56 = vadd.f32 -1.0, %v1883_v5  ;;  %v2495_v38 = vpop.permute.xlu0 %2494  ;;  %v1900_v41 = vmul.f32 2.0, %v4893_v29  ;;  %v4895_v26 = vpop.eup %4894 }
 0x212   :  { %7848 = vst [vmem:[#allocation110_spill] sm:$0xff] %v6266_v0  ;;  %2596 = vrot.lane.b32.xlu1 %v6266_v0, %s5061_s6  ;;  %v6280_v63 = vsel %vm1837_vm0, %v4330_v16, %v4887_v2  ;;  %4902 = vrcp.f32 %v1690_v14  ;;  %v4897_v2 = vpop.eup %4896  ;;  %v1898_v24 = vmul.f32 2.0, %v4895_v26 }
 0x213   :  { %7850 = vst [vmem:[#allocation112_spill] sm:$0xff] %v6280_v63  ;;  %v6290_v44 = vsel %vm1837_vm0, %v4318_v56, %v4889_v58  ;;  %v2497_v16 = vpop.permute.xlu1 %2496  ;;  %v4335_v4 = vadd.f32 -1.0, %v1900_v41  ;;  %v1901_v14 = vmul.f32 2.0, %v4897_v2 }
 0x214   :  { %7851 = vst [vmem:[#allocation113_spill] sm:$0xff] %v6290_v44 }
 0x215   :  { %2566 = vrot.lane.b32.xlu0 %v6276_v31, %s5061_s6  ;;  %v2507_v49 = vpop.permute.xlu0 %2506  ;;  %v4336_v17 = vadd.f32 -1.0, %v1901_v14 }
 0x216   :  { %2592 = vrot.lane.b32.xlu1 %v6280_v63, %s5061_s6 }
 0x217   :  { %v4899_v5 = vpop.eup %4898  ;;  %v2509_v56 = vpop.permute.xlu1 %2508 }
 0x218   :  { %v4901_v58 = vpop.eup %4900  ;;  %v1884_v41 = vmul.f32 2.0, %v4899_v5 }
 0x219   :  { %2802 = vrot.lane.b32.xlu0 %v2672_v50, %s5061_s6  ;;  %v4333_v50 = vadd.f32 -1.0, %v1898_v24  ;;  %v1899_v47 = vmul.f32 2.0, %v4901_v58 }
 0x21a   :  { %2568 = vrot.lane.b32.xlu1 %v6290_v44, %s5061_s6  ;;  %v6303_v44 = vsel %vm1837_vm0, %v4335_v4, %v4893_v29  ;;  %v6316_v4 = vsel %vm1837_vm0, %v4336_v17, %v4897_v2  ;;  %v2676_v2 = vmul.f32 %v6224_v23, %v5700_v53  ;;  %v2677_v17 = vmul.f32 %v6237_v9, %v5710_v35  ;;  %v7859_v9 = vld [vmem:[#allocation53_spill] sm:$0xff] }
 0x21b   :  { %7852 = vst [vmem:[#allocation114_spill] sm:$0xff] %v6303_v44  ;;  %v6312_v24 = vsel %vm1837_vm0, %v4333_v50, %v4895_v26  ;;  %v4334_v29 = vadd.f32 -1.0, %v1899_v47  ;;  %7854 = vst [vmem:[#allocation116_spill] sm:$0xff] %v6316_v4  ;;  %v2505_v32 = vpop.permute.xlu1 %2504 }
 0x21c   :  { %v4903_v27 = vpop.eup %4902  ;;  %7853 = vst [vmem:[#allocation115_spill] sm:$0xff] %v6312_v24 }
 0x21d   :  { %2798 = vrot.lane.b32.xlu0 %v2670_v54, %s5061_s6  ;;  %v2503_v54 = vpop.permute.xlu0 %2502  ;;  %v1885_v14 = vmul.f32 2.0, %v4903_v27  ;;  %v6328_v47 = vsel %vm1837_vm0, %v4334_v29, %v4901_v58  ;;  %v2674_v58 = vmul.f32 %v6241_v20, %v5720_v55  ;;  %v7858_v20 = vld [vmem:[#allocation52_spill] sm:$0xff] }
 0x21e   :  { %2804 = vrot.lane.b32.xlu1 %v2673_v11, %s5061_s6  ;;  %v4319_v11 = vadd.f32 -1.0, %v1884_v41  ;;  %7856 = vst [vmem:[#allocation118_spill] sm:$0xff] %v6328_v47  ;;  %v2678_v29 = vmul.f32 %v2495_v38, %v7858_v20  ;;  %v7862_v38 = vld [vmem:[#allocation59_spill] sm:$0xff]  ;;  %v7863_v20 = vld [vmem:[#allocation58_spill] sm:$0xff] }
 0x21f   :  { %v4320_v26 = vadd.f32 -1.0, %v1885_v14 }
 0x221   :  { %2602 = vrot.lane.b32.xlu0 %v6303_v44, %s5061_s6  ;;  %v6324_v44 = vsel %vm1837_vm0, %v4319_v11, %v4899_v5  ;;  %v6338_v5 = vsel %vm1837_vm0, %v4320_v26, %v4903_v27  ;;  %v2675_v27 = vmul.f32 %v6256_v15, %v5727_v13  ;;  %v2681_v26 = vmul.f32 %v6272_v43, %v7859_v9  ;;  %v7864_v43 = vld [vmem:[#allocation65_spill] sm:$0xff] }
 0x222   :  { %2800 = vrot.lane.b32.xlu1 %v2671_v12, %s5061_s6  ;;  %7855 = vst [vmem:[#allocation117_spill] sm:$0xff] %v6324_v44  ;;  %7857 = vst [vmem:[#allocation119_spill] sm:$0xff] %v6338_v5  ;;  %v2685_v13 = vmul.f32 %v2509_v56, %v7863_v20 }
 0x225   :  { %2598 = vrot.lane.b32.xlu0 %v6312_v24, %s5061_s6 }
 0x226   :  { %2604 = vrot.lane.b32.xlu1 %v6316_v4, %s5061_s6  ;;  %v2515_v12 = vpop.permute.xlu0 %2514 }
 0x228   :  { %v2517_v50 = vpop.permute.xlu1 %2516 }
 0x229   :  { %2570 = vrot.lane.b32.xlu0 %v6324_v44, %s5061_s6 }
 0x22a   :  { %2600 = vrot.lane.b32.xlu1 %v6328_v47, %s5061_s6  ;;  %v2511_v41 = vpop.permute.xlu0 %2510 }
 0x22c   :  { %v2513_v11 = vpop.permute.xlu1 %2512 }
 0x22d   :  { %2810 = vrot.lane.b32.xlu0 %v2676_v2, %s5061_s6 }
 0x22e   :  { %2572 = vrot.lane.b32.xlu1 %v6338_v5, %s5061_s6  ;;  %v2523_v23 = vpop.permute.xlu0 %2522 }
 0x230   :  { %v2525_v14 = vpop.permute.xlu1 %2524 }
 0x231   :  { %2806 = vrot.lane.b32.xlu0 %v2674_v58, %s5061_s6  ;;  %v7860_v58 = vld [vmem:[#allocation57_spill] sm:$0xff] }
 0x232   :  { %2812 = vrot.lane.b32.xlu1 %v2677_v17, %s5061_s6  ;;  %v2519_v2 = vpop.permute.xlu0 %2518  ;;  %v2684_v48 = vmul.f32 %v2507_v49, %v7860_v58  ;;  %v7861_v17 = vld [vmem:[#allocation56_spill] sm:$0xff]  ;;  %v7865_v49 = vld [vmem:[#allocation62_spill] sm:$0xff] }
 0x233   :  { %v2679_v36 = vmul.f32 %v2497_v16, %v7861_v17  ;;  %v2683_v58 = vmul.f32 %v2505_v32, %v7865_v49  ;;  %v7867_v17 = vld [vmem:[#allocation66_spill] sm:$0xff]  ;;  %v7870_v32 = vld [vmem:[#allocation73_spill] sm:$0xff] }
 0x234   :  { %v2521_v15 = vpop.permute.xlu1 %2520 }
 0x235   :  { %2818 = vrot.lane.b32.xlu0 %v2680_v7, %s5061_s6 }
 0x236   :  { %2808 = vrot.lane.b32.xlu1 %v2675_v27, %s5061_s6  ;;  %v2531_v7 = vpop.permute.xlu0 %2530  ;;  %v2682_v27 = vmul.f32 %v2503_v54, %v7862_v38  ;;  %v2689_v54 = vmul.f32 %v2517_v50, %v7867_v17  ;;  %v7873_v17 = vld [vmem:[#allocation76_spill] sm:$0xff] }
 0x239   :  { %2814 = vrot.lane.b32.xlu0 %v2678_v29, %s5061_s6  ;;  %v2688_v29 = vmul.f32 %v2515_v12, %v7864_v43 }
 0x23a   :  { %2820 = vrot.lane.b32.xlu1 %v2681_v26, %s5061_s6  ;;  %v2527_v16 = vpop.permute.xlu0 %2526 }
 0x23d   :  { %2826 = vrot.lane.b32.xlu0 %v2684_v48, %s5061_s6  ;;  %v2533_v26 = vpop.permute.xlu1 %2532  ;;  %v7866_v48 = vld [vmem:[#allocation67_spill] sm:$0xff] }
 0x23e   :  { %2816 = vrot.lane.b32.xlu1 %v2679_v36, %s5061_s6  ;;  %v2686_v36 = vmul.f32 %v2511_v41, %v7866_v48  ;;  %v7871_v41 = vld [vmem:[#allocation72_spill] sm:$0xff] }
 0x23f   :  { %v2693_v48 = vmul.f32 %v2525_v14, %v7871_v41 }
 0x241   :  { %2822 = vrot.lane.b32.xlu0 %v2682_v27, %s5061_s6  ;;  %v2529_v38 = vpop.permute.xlu1 %2528  ;;  %v2535_v56 = vpop.permute.xlu0 %2534  ;;  %v7869_v27 = vld [vmem:[#allocation70_spill] sm:$0xff] }
 0x242   :  { %2828 = vrot.lane.b32.xlu1 %v2685_v13, %s5061_s6  ;;  %v7868_v13 = vld [vmem:[#allocation71_spill] sm:$0xff]  ;;  %v2687_v43 = vmul.f32 %v2513_v11, %v7869_v27 }
 0x243   :  { %v2692_v12 = vmul.f32 %v2523_v23, %v7868_v13  ;;  %v2691_v23 = vmul.f32 %v2521_v15, %v7873_v17 }
 0x245   :  { %2834 = vrot.lane.b32.xlu0 %v2688_v29, %s5061_s6  ;;  %v2537_v29 = vpop.permute.xlu1 %2536  ;;  %v2539_v50 = vpop.permute.xlu0 %2538 }
 0x246   :  { %2824 = vrot.lane.b32.xlu1 %v2683_v58, %s5061_s6  ;;  %v2690_v58 = vmul.f32 %v2519_v2, %v7870_v32 }
 0x249   :  { %2830 = vrot.lane.b32.xlu0 %v2686_v36, %s5061_s6  ;;  %v7872_v36 = vld [vmem:[#allocation77_spill] sm:$0xff]  ;;  %v2541_v13 = vpop.permute.xlu1 %2540  ;;  %v2543_v11 = vpop.permute.xlu0 %2542 }
 0x24a   :  { %2836 = vrot.lane.b32.xlu1 %v2689_v54, %s5061_s6  ;;  %v2696_v54 = vmul.f32 %v2531_v7, %v7872_v36  ;;  %v7877_v36 = vld [vmem:[#allocation82_spill] sm:$0xff] }
 0x24b   :  { %v2695_v15 = vmul.f32 %v2529_v38, %v7877_v36  ;;  %v2701_v38 = vmul.f32 %v2541_v13, %v6015_v1 }
 0x24d   :  { %2842 = vrot.lane.b32.xlu0 %v2692_v12, %s5061_s6  ;;  %v7875_v12 = vld [vmem:[#allocation81_spill] sm:$0xff]  ;;  %v2545_v7 = vpop.permute.xlu1 %2544 }
 0x24e   :  { %2832 = vrot.lane.b32.xlu1 %v2687_v43, %s5061_s6  ;;  %v7874_v43 = vld [vmem:[#allocation78_spill] sm:$0xff]  ;;  %v2697_v32 = vmul.f32 %v2533_v26, %v7875_v12  ;;  %v2699_v26 = vmul.f32 %v2537_v29, %v5989_v62  ;;  %v2703_v29 = vmul.f32 %v2545_v7, %v6020_v34 }
 0x24f   :  { %v2694_v2 = vmul.f32 %v2527_v16, %v7874_v43 }
 0x251   :  { %2838 = vrot.lane.b32.xlu0 %v2690_v58, %s5061_s6 }
 0x252   :  { %2844 = vrot.lane.b32.xlu1 %v2693_v48, %s5061_s6  ;;  %v2547_v14 = vpop.permute.xlu0 %2546  ;;  %v7876_v48 = vld [vmem:[#allocation83_spill] sm:$0xff] }
 0x253   :  { %v2698_v58 = vmul.f32 %v2535_v56, %v7876_v48  ;;  %v2702_v56 = vmul.f32 %v2543_v11, %v6008_v52 }
 0x254   :  { %v2549_v16 = vpop.permute.xlu1 %2548 }
 0x255   :  { %2850 = vrot.lane.b32.xlu0 %v2696_v54, %s5061_s6  ;;  %v2705_v13 = vmul.f32 %v2549_v16, %v6062_v57 }
 0x256   :  { %2840 = vrot.lane.b32.xlu1 %v2691_v23, %s5061_s6  ;;  %v2551_v54 = vpop.permute.xlu0 %2550  ;;  %v2700_v23 = vmul.f32 %v2539_v50, %v5993_v28  ;;  %v2704_v50 = vmul.f32 %v2547_v14, %v6051_v42 }
 0x257   :  { %v2706_v11 = vmul.f32 %v2551_v54, %v6068_v3 }
 0x259   :  { %2846 = vrot.lane.b32.xlu0 %v2694_v2, %s5061_s6  ;;  %v2553_v2 = vpop.permute.xlu1 %2552 }
 0x25a   :  { %2852 = vrot.lane.b32.xlu1 %v2697_v32, %s5061_s6  ;;  %v2707_v7 = vmul.f32 %v2553_v2, %v6086_v45 }
 0x25b   :  { %v2555_v32 = vpop.permute.xlu0 %2554 }
 0x25c   :  { %v2708_v14 = vmul.f32 %v2555_v32, %v6099_v59 }
 0x25d   :  { %2854 = vrot.lane.b32.xlu0 %v2698_v58, %s5061_s6 }
 0x25e   :  { %2848 = vrot.lane.b32.xlu1 %v2695_v15, %s5061_s6  ;;  %v2557_v15 = vpop.permute.xlu1 %2556 }
 0x25f   :  { %v2709_v16 = vmul.f32 %v2557_v15, %v6109_v19 }
 0x261   :  { %2858 = vrot.lane.b32.xlu0 %v2700_v23, %s5061_s6 }
 0x262   :  { %2856 = vrot.lane.b32.xlu1 %v2699_v26, %s5061_s6 }
 0x265   :  { %2862 = vrot.lane.b32.xlu0 %v2702_v56, %s5061_s6  ;;  %v2579_v58 = vpop.permute.xlu0 %2578 }
 0x266   :  { %2860 = vrot.lane.b32.xlu1 %v2701_v38, %s5061_s6  ;;  %v2720_v54 = vmul.f32 %v2579_v58, %v6143_v46 }
 0x269   :  { %2866 = vrot.lane.b32.xlu0 %v2704_v50, %s5061_s6  ;;  %v2575_v23 = vpop.permute.xlu0 %2574 }
 0x26a   :  { %2864 = vrot.lane.b32.xlu1 %v2703_v29, %s5061_s6  ;;  %v2718_v32 = vmul.f32 %v2575_v23, %v6157_v39 }
 0x26b   :  { %v2581_v26 = vpop.permute.xlu1 %2580 }
 0x26c   :  { %v2721_v2 = vmul.f32 %v2581_v26, %v6164_v37 }
 0x26d   :  { %2870 = vrot.lane.b32.xlu0 %v2706_v11, %s5061_s6  ;;  %v2559_v56 = vpop.permute.xlu0 %2558 }
 0x26e   :  { %2868 = vrot.lane.b32.xlu1 %v2705_v13, %s5061_s6  ;;  %v2710_v58 = vmul.f32 %v2559_v56, %v6176_v61 }
 0x26f   :  { %v2577_v38 = vpop.permute.xlu1 %2576 }
 0x270   :  { %v2719_v15 = vmul.f32 %v2577_v38, %v6182_v25 }
 0x271   :  { %2874 = vrot.lane.b32.xlu0 %v2708_v14, %s5061_s6  ;;  %v2587_v50 = vpop.permute.xlu0 %2586 }
 0x272   :  { %2872 = vrot.lane.b32.xlu1 %v2707_v7, %s5061_s6 }
 0x273   :  { %v2561_v29 = vpop.permute.xlu1 %2560 }
 0x274   :  { %v2711_v26 = vmul.f32 %v2561_v29, %v6192_v6 }
 0x275   :  { %2898 = vrot.lane.b32.xlu0 %v2720_v54, %s5061_s6  ;;  %v2583_v11 = vpop.permute.xlu0 %2582  ;;  %v2724_v54 = vmul.f32 %v2587_v50, %v6198_v60 }
 0x276   :  { %2876 = vrot.lane.b32.xlu1 %v2709_v16, %s5061_s6 }
 0x277   :  { %v2589_v13 = vpop.permute.xlu1 %2588 }
 0x279   :  { %2894 = vrot.lane.b32.xlu0 %v2718_v32, %s5061_s6  ;;  %v2563_v14 = vpop.permute.xlu0 %2562  ;;  %v2722_v32 = vmul.f32 %v2583_v11, %v6211_v40 }
 0x27a   :  { %2900 = vrot.lane.b32.xlu1 %v2721_v2, %s5061_s6  ;;  %v2725_v2 = vmul.f32 %v2589_v13, %v6216_v8  ;;  %v2712_v50 = vmul.f32 %v2563_v14, %v6229_v21  ;;  %v7915_v21 = vld [vmem:[#allocation28_spill] sm:$0xff] }
 0x27b   :  { %v2585_v7 = vpop.permute.xlu1 %2584 }
 0x27d   :  { %2878 = vrot.lane.b32.xlu0 %v2710_v58, %s5061_s6 }
 0x27e   :  { %2896 = vrot.lane.b32.xlu1 %v2719_v15, %s5061_s6  ;;  %v2723_v15 = vmul.f32 %v2585_v7, %v6233_v30 }
 0x27f   :  { %v2565_v23 = vpop.permute.xlu1 %2564  ;;  %v2595_v16 = vpop.permute.xlu0 %2594 }
 0x280   :  { %v2728_v11 = vmul.f32 %v2595_v16, %v6250_v18  ;;  %v2713_v13 = vmul.f32 %v2565_v23, %v6246_v22 }
 0x281   :  { %2906 = vrot.lane.b32.xlu0 %v2724_v54, %s5061_s6 }
 0x282   :  { %2880 = vrot.lane.b32.xlu1 %v2711_v26, %s5061_s6 }
 0x283   :  { %v2591_v56 = vpop.permute.xlu0 %2590 }
 0x284   :  { %v2597_v38 = vpop.permute.xlu1 %2596  ;;  %v2726_v14 = vmul.f32 %v2591_v56, %v6260_v33  ;;  %v7880_v33 = vld [vmem:[#allocation41_spill] sm:$0xff] }
 0x285   :  { %2902 = vrot.lane.b32.xlu0 %v2722_v32, %s5061_s6  ;;  %v2729_v7 = vmul.f32 %v2597_v38, %v6266_v0 }
 0x286   :  { %2908 = vrot.lane.b32.xlu1 %v2725_v2, %s5061_s6 }
 0x287   :  { %v2567_v58 = vpop.permute.xlu0 %2566 }
 0x288   :  { %v2593_v29 = vpop.permute.xlu1 %2592  ;;  %v2714_v16 = vmul.f32 %v2567_v58, %v6276_v31  ;;  %v7882_v58 = vld [vmem:[#allocation40_spill] sm:$0xff] }
 0x289   :  { %2882 = vrot.lane.b32.xlu0 %v2712_v50, %s5061_s6  ;;  %v2727_v23 = vmul.f32 %v2593_v29, %v6280_v63  ;;  %v7883_v29 = vld [vmem:[#allocation8_spill] sm:$0xff] }
 0x28a   :  { %2904 = vrot.lane.b32.xlu1 %v2723_v15, %s5061_s6  ;;  %v2353_v63 = vmul.f32 %v7883_v29, %v7882_v58  ;;  %v7895_v58 = vld [vmem:[#allocation16_spill] sm:$0xff] }
 0x28b   :  { %v2803_v54 = vpop.permute.xlu0 %2802 }
 0x28c   :  { %v2569_v26 = vpop.permute.xlu1 %2568 }
 0x28d   :  { %2914 = vrot.lane.b32.xlu0 %v2728_v11, %s5061_s6  ;;  %v7878_v11 = vld [vmem:[#allocation6_spill] sm:$0xff] }
 0x28e   :  { %2884 = vrot.lane.b32.xlu1 %v2713_v13, %s5061_s6  ;;  %v2352_v18 = vmul.f32 %v7878_v11, %v5658_v51  ;;  %v7879_v13 = vld [vmem:[#allocation113_spill] sm:$0xff] }
 0x28f   :  { %v2799_v32 = vpop.permute.xlu0 %2798  ;;  %v2715_v0 = vmul.f32 %v2569_v26, %v7879_v13  ;;  %v7885_v26 = vld [vmem:[#allocation114_spill] sm:$0xff] }
 0x290   :  { %v2805_v2 = vpop.permute.xlu1 %2804  ;;  %v2992_v56 = vadd.f32 %v2803_v54, %v2352_v18  ;;  %v7884_v18 = vld [vmem:[#allocation7_spill] sm:$0xff] }
 0x291   :  { %2910 = vrot.lane.b32.xlu0 %v2726_v14, %s5061_s6  ;;  %v2993_v51 = vadd.f32 %v2805_v2, %v2353_v63  ;;  %v2351_v54 = vmul.f32 %v7884_v18, %v5686_v10  ;;  %v7886_v18 = vld [vmem:[#allocation11_spill] sm:$0xff] }
 0x292   :  { %2916 = vrot.lane.b32.xlu1 %v2729_v7, %s5061_s6  ;;  %v7881_v7 = vld [vmem:[#allocation5_spill] sm:$0xff]  ;;  %4904 = vtanh.f32 %v2992_v56 }
 0x293   :  { %v2603_v50 = vpop.permute.xlu0 %2602  ;;  %v2350_v22 = vmul.f32 %v7881_v7, %v7880_v33 }
 0x294   :  { %v2801_v15 = vpop.permute.xlu1 %2800  ;;  %v2732_v7 = vmul.f32 %v2603_v50, %v7885_v26 }
 0x295   :  { %2886 = vrot.lane.b32.xlu0 %v2714_v16, %s5061_s6  ;;  %v2990_v11 = vadd.f32 %v2799_v32, %v2350_v22  ;;  %v2991_v13 = vadd.f32 %v2801_v15, %v2351_v54  ;;  %v2356_v54 = vmul.f32 %v7886_v18, %v5700_v53  ;;  %v7890_v18 = vld [vmem:[#allocation10_spill] sm:$0xff] }
 0x296   :  { %2912 = vrot.lane.b32.xlu1 %v2727_v23, %s5061_s6 }
 0x297   :  { %v2599_v38 = vpop.permute.xlu0 %2598  ;;  %4906 = vtanh.f32 %v2990_v11 }
 0x298   :  { %v2605_v14 = vpop.permute.xlu1 %2604  ;;  %4908 = vtanh.f32 %v2993_v51 }
 0x299   :  { %3827 = vrot.lane.b32.xlu0 %v2992_v56, %s5062_s3  ;;  %v2733_v63 = vmul.f32 %v2605_v14, %v6316_v4  ;;  %4910 = vtanh.f32 %v2991_v13  ;;  %v2361_v4 = vmul.f32 %v7895_v58, %v7859_v9  ;;  %v7900_v9 = vld [vmem:[#allocation59_spill] sm:$0xff] }
 0x29a   :  { %2888 = vrot.lane.b32.xlu1 %v2715_v0, %s5061_s6  ;;  %v2730_v0 = vmul.f32 %v2599_v38, %v6312_v24  ;;  %v7909_v24 = vld [vmem:[#allocation24_spill] sm:$0xff] }
 0x29b   :  { %v2571_v16 = vpop.permute.xlu0 %2570 }
 0x29c   :  { %v2601_v23 = vpop.permute.xlu1 %2600  ;;  %v2716_v2 = vmul.f32 %v2571_v16, %v6324_v44  ;;  %v7908_v44 = vld [vmem:[#allocation66_spill] sm:$0xff] }
 0x29d   :  { %3823 = vrot.lane.b32.xlu0 %v2990_v11, %s5062_s3  ;;  %v2731_v15 = vmul.f32 %v2601_v23, %v6328_v47  ;;  %v7888_v23 = vld [vmem:[#allocation12_spill] sm:$0xff] }
 0x29e   :  { %3829 = vrot.lane.b32.xlu1 %v2993_v51, %s5062_s3  ;;  %v2357_v10 = vmul.f32 %v7888_v23, %v5710_v35 }
 0x29f   :  { %v2811_v33 = vpop.permute.xlu0 %2810 }
 0x2a0   :  { %v2573_v31 = vpop.permute.xlu1 %2572  ;;  %v2996_v38 = vadd.f32 %v2811_v33, %v2356_v54 }
 0x2a1   :  { %2922 = vrot.lane.b32.xlu0 %v2732_v7, %s5061_s6  ;;  %v2717_v7 = vmul.f32 %v2573_v31, %v6338_v5  ;;  %v7889_v31 = vld [vmem:[#allocation48_spill] sm:$0xff] }
 0x2a2   :  { %3825 = vrot.lane.b32.xlu1 %v2991_v13, %s5062_s3  ;;  %v2355_v54 = vmul.f32 %v7890_v18, %v7889_v31  ;;  %4912 = vtanh.f32 %v2996_v38  ;;  %v7894_v31 = vld [vmem:[#allocation13_spill] sm:$0xff]  ;;  %v7902_v5 = vld [vmem:[#allocation20_spill] sm:$0xff] }
 0x2a3   :  { %v2807_v22 = vpop.permute.xlu0 %2806  ;;  %v2365_v47 = vmul.f32 %v7902_v5, %v7863_v20  ;;  %v7906_v20 = vld [vmem:[#allocation67_spill] sm:$0xff] }
 0x2a4   :  { %v2813_v32 = vpop.permute.xlu1 %2812 }
 0x2a5   :  { %2918 = vrot.lane.b32.xlu0 %v2730_v0, %s5061_s6 }
 0x2a6   :  { %2924 = vrot.lane.b32.xlu1 %v2733_v63, %s5061_s6  ;;  %v7887_v63 = vld [vmem:[#allocation9_spill] sm:$0xff] }
 0x2a7   :  { %v2819_v50 = vpop.permute.xlu0 %2818  ;;  %v2354_v16 = vmul.f32 %v7887_v63, %v5720_v55  ;;  %v4905_v55 = vpop.eup %4904 }
 0x2a8   :  { %v2809_v29 = vpop.permute.xlu1 %2808 }
 0x2a9   :  { %2890 = vrot.lane.b32.xlu0 %v2716_v2, %s5061_s6  ;;  %v2994_v56 = vadd.f32 %v2807_v22, %v2354_v16  ;;  %v2995_v53 = vadd.f32 %v2809_v29, %v2355_v54  ;;  %v7893_v54 = vld [vmem:[#allocation52_spill] sm:$0xff] }
 0x2aa   :  { %2920 = vrot.lane.b32.xlu1 %v2731_v15, %s5061_s6  ;;  %v2997_v15 = vadd.f32 %v2813_v32, %v2357_v10  ;;  %v4907_v10 = vpop.eup %4906  ;;  %v7891_v32 = vld [vmem:[#allocation51_spill] sm:$0xff]  ;;  %v2358_v35 = vmul.f32 %v7894_v31, %v7893_v54 }
 0x2ab   :  { %v2815_v14 = vpop.permute.xlu0 %2814  ;;  %v4909_v22 = vpop.eup %4908  ;;  %4914 = vtanh.f32 %v2994_v56 }
 0x2ac   :  { %v2821_v0 = vpop.permute.xlu1 %2820  ;;  %4916 = vtanh.f32 %v2997_v15 }
 0x2ad   :  { %3835 = vrot.lane.b32.xlu0 %v2996_v38, %s5062_s3  ;;  %v2998_v38 = vadd.f32 %v2815_v14, %v2358_v35  ;;  %4918 = vtanh.f32 %v2995_v53 }
 0x2ae   :  { %2892 = vrot.lane.b32.xlu1 %v2717_v7, %s5061_s6  ;;  %v7892_v7 = vld [vmem:[#allocation15_spill] sm:$0xff] }
 0x2af   :  { %v2827_v2 = vpop.permute.xlu0 %2826  ;;  %v2360_v16 = vmul.f32 %v7892_v7, %v7891_v32  ;;  %v7896_v7 = vld [vmem:[#allocation56_spill] sm:$0xff]  ;;  %v7901_v32 = vld [vmem:[#allocation17_spill] sm:$0xff] }
 0x2b0   :  { %v2817_v33 = vpop.permute.xlu1 %2816  ;;  %v2362_v26 = vmul.f32 %v7901_v32, %v7900_v9  ;;  %v7907_v9 = vld [vmem:[#allocation21_spill] sm:$0xff] }
 0x2b1   :  { %3831 = vrot.lane.b32.xlu0 %v2994_v56, %s5062_s3  ;;  %v3000_v13 = vadd.f32 %v2819_v50, %v2360_v16  ;;  %v3001_v50 = vadd.f32 %v2821_v0, %v2361_v4  ;;  %v7897_v16 = vld [vmem:[#allocation14_spill] sm:$0xff] }
 0x2b2   :  { %3837 = vrot.lane.b32.xlu1 %v2997_v15, %s5062_s3  ;;  %v2359_v31 = vmul.f32 %v7897_v16, %v7896_v7  ;;  %v7898_v15 = vld [vmem:[#allocation57_spill] sm:$0xff]  ;;  %v7899_v16 = vld [vmem:[#allocation19_spill] sm:$0xff] }
 0x2b3   :  { %v2823_v63 = vpop.permute.xlu0 %2822  ;;  %v2364_v7 = vmul.f32 %v7899_v16, %v7898_v15  ;;  %4920 = vtanh.f32 %v3000_v13  ;;  %v2366_v15 = vmul.f32 %v7907_v9, %v7906_v20  ;;  %v7910_v9 = vld [vmem:[#allocation22_spill] sm:$0xff]  ;;  %v7913_v20 = vld [vmem:[#allocation73_spill] sm:$0xff] }
 0x2b4   :  { %v2829_v23 = vpop.permute.xlu1 %2828  ;;  %v2999_v56 = vadd.f32 %v2817_v33, %v2359_v31  ;;  %4922 = vtanh.f32 %v2998_v38 }
 0x2b5   :  { %3186 = vrot.lane.b32.xlu0 %v4905_v55, %s5061_s6  ;;  %v4911_v55 = vpop.eup %4910  ;;  %4924 = vtanh.f32 %v3001_v50 }
 0x2b6   :  { %3833 = vrot.lane.b32.xlu1 %v2995_v53, %s5062_s3  ;;  %v4913_v58 = vpop.eup %4912  ;;  %v3004_v53 = vadd.f32 %v2827_v2, %v2364_v7  ;;  %v3005_v2 = vadd.f32 %v2829_v23, %v2365_v47  ;;  %4926 = vtanh.f32 %v2999_v56 }
 0x2b7   :  { %v6491_v51 = vpop.permute.xlu0 %2834  ;;  %v4915_v4 = vpop.eup %4914 }
 0x2b8   :  { %v2825_v11 = vpop.permute.xlu1 %2824  ;;  %v4917_v0 = vpop.eup %4916  ;;  %4928 = vtanh.f32 %v3004_v53 }
 0x2b9   :  { %3182 = vrot.lane.b32.xlu0 %v4907_v10, %s5061_s6 }
 0x2ba   :  { %3188 = vrot.lane.b32.xlu1 %v4909_v22, %s5061_s6 }
 0x2bb   :  { %v6497_v29 = vpop.permute.xlu0 %2830 }
 0x2bc   :  { %v6499_v18 = vpop.permute.xlu1 %2836 }
 0x2bd   :  { %3843 = vrot.lane.b32.xlu0 %v3000_v13, %s5062_s3  ;;  %v3002_v13 = vadd.f32 %v2823_v63, %v2362_v26 }
 0x2be   :  { %3184 = vrot.lane.b32.xlu1 %v4911_v55, %s5061_s6 }
 0x2bf   :  { %v6507_v10 = vpop.permute.xlu0 %2842  ;;  %4930 = vtanh.f32 %v3002_v13 }
 0x2c0   :  { %v6509_v22 = vpop.permute.xlu1 %2832  ;;  %4932 = vtanh.f32 %v3005_v2 }
 0x2c1   :  { %3839 = vrot.lane.b32.xlu0 %v2998_v38, %s5062_s3 }
 0x2c2   :  { %3845 = vrot.lane.b32.xlu1 %v3001_v50, %s5062_s3  ;;  %v7904_v50 = vld [vmem:[#allocation65_spill] sm:$0xff] }
 0x2c3   :  { %v6515_v54 = vpop.permute.xlu0 %2838 }
 0x2c4   :  { %v6517_v55 = vpop.permute.xlu1 %2844 }
 0x2c5   :  { %3194 = vrot.lane.b32.xlu0 %v4913_v58, %s5061_s6  ;;  %v4919_v58 = vpop.eup %4918 }
 0x2c6   :  { %3841 = vrot.lane.b32.xlu1 %v2999_v56, %s5062_s3  ;;  %v4921_v5 = vpop.eup %4920 }
 0x2c7   :  { %v6521_v35 = vpop.permute.xlu0 %2850  ;;  %v4923_v26 = vpop.eup %4922 }
 0x2c8   :  { %v6523_v14 = vpop.permute.xlu1 %2840  ;;  %v4925_v23 = vpop.eup %4924 }
 0x2c9   :  { %3190 = vrot.lane.b32.xlu0 %v4915_v4, %s5061_s6 }
 0x2ca   :  { %3196 = vrot.lane.b32.xlu1 %v4917_v0, %s5061_s6  ;;  %v7903_v0 = vld [vmem:[#allocation18_spill] sm:$0xff] }
 0x2cb   :  { %v6529_v33 = vpop.permute.xlu0 %2846  ;;  %v2363_v32 = vmul.f32 %v7903_v0, %v7865_v49  ;;  %v7905_v0 = vld [vmem:[#allocation23_spill] sm:$0xff] }
 0x2cc   :  { %v6531_v31 = vpop.permute.xlu1 %2852  ;;  %v2368_v49 = vmul.f32 %v7905_v0, %v7904_v50  ;;  %v2369_v0 = vmul.f32 %v7909_v24, %v7908_v44  ;;  %v7914_v50 = vld [vmem:[#allocation25_spill] sm:$0xff] }
 0x2cd   :  { %3851 = vrot.lane.b32.xlu0 %v3004_v53, %s5062_s3  ;;  %v3003_v38 = vadd.f32 %v2825_v11, %v2363_v32  ;;  %v3006_v53 = vadd.f32 %v6497_v29, %v2366_v15  ;;  %v2370_v30 = vmul.f32 %v7914_v50, %v7913_v20  ;;  %v7916_v50 = vld [vmem:[#allocation26_spill] sm:$0xff]  ;;  %v7920_v20 = vld [vmem:[#allocation29_spill] sm:$0xff] }
 0x2ce   :  { %3192 = vrot.lane.b32.xlu1 %v4919_v58, %s5061_s6  ;;  %v3008_v11 = vadd.f32 %v6491_v51, %v2368_v49  ;;  %v3009_v51 = vadd.f32 %v6499_v18, %v2369_v0 }
 0x2cf   :  { %v6539_v4 = vpop.permute.xlu0 %2854  ;;  %4934 = vtanh.f32 %v3003_v38 }
 0x2d0   :  { %v6541_v7 = vpop.permute.xlu1 %2848  ;;  %4936 = vtanh.f32 %v3008_v11 }
 0x2d1   :  { %3847 = vrot.lane.b32.xlu0 %v3002_v13, %s5062_s3  ;;  %4938 = vtanh.f32 %v3006_v53 }
 0x2d2   :  { %3853 = vrot.lane.b32.xlu1 %v3005_v2, %s5062_s3  ;;  %4940 = vtanh.f32 %v3009_v51 }
 0x2d3   :  { %v6547_v16 = vpop.permute.xlu0 %2858 }
 0x2d4   :  { %v6549_v58 = vpop.permute.xlu1 %2856 }
 0x2d5   :  { %3202 = vrot.lane.b32.xlu0 %v4921_v5, %s5061_s6  ;;  %v4927_v5 = vpop.eup %4926 }
 0x2d6   :  { %3849 = vrot.lane.b32.xlu1 %v3003_v38, %s5062_s3  ;;  %v4929_v13 = vpop.eup %4928 }
 0x2d7   :  { %v6553_v47 = vpop.permute.xlu0 %2862  ;;  %v4931_v15 = vpop.eup %4930 }
 0x2d8   :  { %v6555_v63 = vpop.permute.xlu1 %2860  ;;  %v4933_v0 = vpop.eup %4932 }
 0x2d9   :  { %3198 = vrot.lane.b32.xlu0 %v4923_v26, %s5061_s6  ;;  %v4935_v44 = vpop.eup %4934 }
 0x2da   :  { %3204 = vrot.lane.b32.xlu1 %v4925_v23, %s5061_s6  ;;  %v2367_v23 = vmul.f32 %v7910_v9, %v7869_v27  ;;  %v7911_v9 = vld [vmem:[#allocation71_spill] sm:$0xff] }
 0x2db   :  { %v6562_v56 = vpop.permute.xlu0 %2866  ;;  %v7912_v27 = vld [vmem:[#allocation27_spill] sm:$0xff] }
 0x2dc   :  { %v6564_v32 = vpop.permute.xlu1 %2864  ;;  %v3007_v2 = vadd.f32 %v6509_v22, %v2367_v23  ;;  %v2372_v38 = vmul.f32 %v7912_v27, %v7911_v9  ;;  %v2373_v27 = vmul.f32 %v7915_v21, %v7871_v41  ;;  %v2374_v9 = vmul.f32 %v7920_v20, %v7874_v43  ;;  %v7922_v20 = vld [vmem:[#allocation30_spill] sm:$0xff] }
 0x2dd   :  { %3859 = vrot.lane.b32.xlu0 %v3008_v11, %s5062_s3  ;;  %v3010_v11 = vadd.f32 %v6515_v54, %v2370_v30 }
 0x2de   :  { %3200 = vrot.lane.b32.xlu1 %v4927_v5, %s5061_s6  ;;  %v3012_v22 = vadd.f32 %v6507_v10, %v2372_v38  ;;  %v2371_v38 = vmul.f32 %v7916_v50, %v7873_v17  ;;  %4942 = vtanh.f32 %v3007_v2  ;;  %v7918_v50 = vld [vmem:[#allocation77_spill] sm:$0xff]  ;;  %v7919_v17 = vld [vmem:[#allocation31_spill] sm:$0xff] }
 0x2df   :  { %v6573_v49 = vpop.permute.xlu0 %2870 }
 0x2e0   :  { %v6576_v26 = vpop.permute.xlu1 %2868  ;;  %4944 = vtanh.f32 %v3012_v22 }
 0x2e1   :  { %3855 = vrot.lane.b32.xlu0 %v3006_v53, %s5062_s3  ;;  %v3011_v53 = vadd.f32 %v6523_v14, %v2371_v38  ;;  %4946 = vtanh.f32 %v3010_v11 }
 0x2e2   :  { %3861 = vrot.lane.b32.xlu1 %v3009_v51, %s5062_s3 }
 0x2e3   :  { %v6582_v24 = vpop.permute.xlu0 %2874 }
 0x2e4   :  { %v6585_v29 = vpop.permute.xlu1 %2872 }
 0x2e5   :  { %3210 = vrot.lane.b32.xlu0 %v4929_v13, %s5061_s6 }
 0x2e6   :  { %3857 = vrot.lane.b32.xlu1 %v3007_v2, %s5062_s3  ;;  %v2376_v2 = vmul.f32 %v7919_v17, %v7918_v50 }
 0x2e7   :  { %v6589_v18 = vpop.permute.xlu0 %2898 }
 0x2e8   :  { %v6591_v5 = vpop.permute.xlu1 %2876  ;;  %v3016_v14 = vadd.f32 %v6521_v35, %v2376_v2  ;;  %v2375_v2 = vmul.f32 %v7922_v20, %v7877_v36  ;;  %v7923_v20 = vld [vmem:[#allocation33_spill] sm:$0xff] }
 0x2e9   :  { %3206 = vrot.lane.b32.xlu0 %v4931_v15, %s5061_s6  ;;  %v3013_v15 = vadd.f32 %v6517_v55, %v2373_v27 }
 0x2ea   :  { %3212 = vrot.lane.b32.xlu1 %v4933_v0, %s5061_s6 }
 0x2eb   :  { %v6598_v23 = vpop.permute.xlu0 %2894  ;;  %4948 = vtanh.f32 %v3013_v15 }
 0x2ec   :  { %v6600_v13 = vpop.permute.xlu1 %2900  ;;  %4950 = vtanh.f32 %v3011_v53 }
 0x2ed   :  { %3867 = vrot.lane.b32.xlu0 %v3012_v22, %s5062_s3  ;;  %v3014_v22 = vadd.f32 %v6529_v33, %v2374_v9  ;;  %4952 = vtanh.f32 %v3016_v14 }
 0x2ee   :  { %3208 = vrot.lane.b32.xlu1 %v4935_v44, %s5061_s6  ;;  %v4937_v44 = vpop.eup %4936 }
 0x2ef   :  { %v6609_v10 = vpop.permute.xlu0 %2878  ;;  %v4939_v55 = vpop.eup %4938  ;;  %4954 = vtanh.f32 %v3014_v22 }
 0x2f0   :  { %v6612_v0 = vpop.permute.xlu1 %2896  ;;  %v4941_v27 = vpop.eup %4940 }
 0x2f1   :  { %3863 = vrot.lane.b32.xlu0 %v3010_v11, %s5062_s3  ;;  %v4943_v41 = vpop.eup %4942 }
 0x2f2   :  { %3869 = vrot.lane.b32.xlu1 %v3013_v15, %s5062_s3  ;;  %v3015_v15 = vadd.f32 %v6541_v7, %v2375_v2 }
 0x2f3   :  { %v6618_v21 = vpop.permute.xlu0 %2906 }
 0x2f4   :  { %v6621_v30 = vpop.permute.xlu1 %2880 }
 0x2f5   :  { %3218 = vrot.lane.b32.xlu0 %v4937_v44, %s5061_s6 }
 0x2f6   :  { %3865 = vrot.lane.b32.xlu1 %v3011_v53, %s5062_s3  ;;  %v2378_v53 = vmul.f32 %v7923_v20, %v7876_v48 }
 0x2f7   :  { %v6625_v54 = vpop.permute.xlu0 %2902 }
 0x2f8   :  { %v6627_v51 = vpop.permute.xlu1 %2908  ;;  %v3018_v7 = vadd.f32 %v6539_v4, %v2378_v53 }
 0x2f9   :  { %7917 = vst [vmem:[#allocation78_spill] sm:$0xff] %v6627_v51  ;;  %3214 = vrot.lane.b32.xlu0 %v4939_v55, %s5061_s6  ;;  %v7921_v51 = vld [vmem:[#allocation32_spill] sm:$0xff] }
 0x2fa   :  { %3220 = vrot.lane.b32.xlu1 %v4941_v27, %s5061_s6  ;;  %v2377_v17 = vmul.f32 %v7921_v51, %v7875_v12  ;;  %v7924_v12 = vld [vmem:[#allocation35_spill] sm:$0xff] }
 0x2fb   :  { %v6634_v38 = vpop.permute.xlu0 %2882  ;;  %v2380_v20 = vmul.f32 %v7924_v12, %v5993_v28 }
 0x2fc   :  { %v6636_v44 = vpop.permute.xlu1 %2904  ;;  %v3017_v55 = vadd.f32 %v6531_v31, %v2377_v17 }
 0x2fd   :  { %3875 = vrot.lane.b32.xlu0 %v3016_v14, %s5062_s3  ;;  %v7925_v14 = vld [vmem:[#allocation34_spill] sm:$0xff]  ;;  %v3020_v4 = vadd.f32 %v6547_v16, %v2380_v20 }
 0x2fe   :  { %3216 = vrot.lane.b32.xlu1 %v4943_v41, %s5061_s6  ;;  %v4945_v41 = vpop.eup %4944  ;;  %4956 = vtanh.f32 %v3017_v55 }
 0x2ff   :  { %v6645_v35 = vpop.permute.xlu0 %2914  ;;  %v4947_v9 = vpop.eup %4946  ;;  %4958 = vtanh.f32 %v3015_v15 }
 0x300   :  { %v6648_v27 = vpop.permute.xlu1 %2884  ;;  %v4949_v17 = vpop.eup %4948  ;;  %4960 = vtanh.f32 %v3018_v7 }
 0x301   :  { %3871 = vrot.lane.b32.xlu0 %v3014_v22, %s5062_s3  ;;  %v4951_v36 = vpop.eup %4950  ;;  %4962 = vtanh.f32 %v3020_v4 }
 0x302   :  { %3877 = vrot.lane.b32.xlu1 %v3017_v55, %s5062_s3 }
 0x303   :  { %v6654_v11 = vpop.permute.xlu0 %2910 }
 0x304   :  { %v6657_v33 = vpop.permute.xlu1 %2916 }
 0x305   :  { %3226 = vrot.lane.b32.xlu0 %v4945_v41, %s5061_s6 }
 0x306   :  { %3873 = vrot.lane.b32.xlu1 %v3015_v15, %s5062_s3 }
 0x307   :  { %v6661_v31 = vpop.permute.xlu0 %2886 }
 0x308   :  { %v6663_v51 = vpop.permute.xlu1 %2912 }
 0x309   :  { %3222 = vrot.lane.b32.xlu0 %v4947_v9, %s5061_s6  ;;  %v2379_v9 = vmul.f32 %v7925_v14, %v5989_v62  ;;  %v7927_v14 = vld [vmem:[#allocation37_spill] sm:$0xff] }
 0x30a   :  { %3228 = vrot.lane.b32.xlu1 %v4949_v17, %s5061_s6 }
 0x30b   :  { %v3828_v2 = vpop.permute.xlu0 %3827  ;;  %v3019_v53 = vadd.f32 %v6549_v58, %v2379_v9  ;;  %v4953_v58 = vpop.eup %4952 }
 0x30c   :  { %v6670_v41 = vpop.permute.xlu1 %2888  ;;  %4017 = vst.msk [vmem:[%s7643_s5 + $0x10] sm:$0xff] %vm3694_vm1, %v3828_v2  ;;  %v4955_v2 = vpop.eup %4954 }
 0x30d   :  { %3879 = vrot.lane.b32.xlu0 %v3018_v7, %s5062_s3  ;;  %v4957_v20 = vpop.eup %4956  ;;  %4964 = vtanh.f32 %v3019_v53 }
 0x30e   :  { %3224 = vrot.lane.b32.xlu1 %v4951_v36, %s5061_s6  ;;  %v7926_v36 = vld [vmem:[#allocation36_spill] sm:$0xff] }
 0x30f   :  { %v3824_v17 = vpop.permute.xlu0 %3823  ;;  %v2381_v12 = vmul.f32 %v7926_v36, %v6015_v1  ;;  %v4959_v36 = vpop.eup %4958 }
 0x310   :  { %v3830_v48 = vpop.permute.xlu1 %3829  ;;  %4015 = vst.msk [vmem:[%s7643_s5] sm:$0xff] %vm3694_vm1, %v3824_v17 }
 0x311   :  { %4018 = vst.msk [vmem:[%s7643_s5 + $0x18] sm:$0xff] %vm3694_vm1, %v3830_v48  ;;  %3883 = vrot.lane.b32.xlu0 %v3020_v4, %s5062_s3  ;;  %v3021_v22 = vadd.f32 %v6555_v63, %v2381_v12  ;;  %v2382_v63 = vmul.f32 %v7927_v14, %v6008_v52  ;;  %v7928_v12 = vld [vmem:[#allocation38_spill] sm:$0xff]  ;;  %v4961_v4 = vpop.eup %4960 }
 0x312   :  { %3881 = vrot.lane.b32.xlu1 %v3019_v53, %s5062_s3 }
 0x313   :  { %v6696_v16 = vpop.permute.xlu0 %2922  ;;  %v3022_v9 = vadd.f32 %v6553_v47, %v2382_v63  ;;  %4966 = vtanh.f32 %v3021_v22 }
 0x314   :  { %v3826_v55 = vpop.permute.xlu1 %3825 }
 0x315   :  { %4016 = vst.msk [vmem:[%s7643_s5 + $0x8] sm:$0xff] %vm3694_vm1, %v3826_v55  ;;  %3234 = vrot.lane.b32.xlu0 %v4953_v58, %s5061_s6  ;;  %v2383_v58 = vmul.f32 %v7928_v12, %v6020_v34  ;;  %4968 = vtanh.f32 %v3022_v9 }
 0x316   :  { %3885 = vrot.lane.b32.xlu1 %v3021_v22, %s5062_s3  ;;  %v7929_v22 = vld [vmem:[#allocation43_spill] sm:$0xff] }
 0x317   :  { %v6705_v48 = vpop.permute.xlu0 %2918  ;;  %v2384_v14 = vmul.f32 %v7929_v22, %v6051_v42 }
 0x318   :  { %v6707_v15 = vpop.permute.xlu1 %2924 }
 0x319   :  { %3230 = vrot.lane.b32.xlu0 %v4955_v2, %s5061_s6  ;;  %v3023_v2 = vadd.f32 %v6564_v32, %v2383_v58 }
 0x31a   :  { %3236 = vrot.lane.b32.xlu1 %v4957_v20, %s5061_s6  ;;  %v4963_v20 = vpop.eup %4962 }
 0x31b   :  { %v6714_v7 = vpop.permute.xlu0 %2890  ;;  %v4965_v32 = vpop.eup %4964  ;;  %4970 = vtanh.f32 %v3023_v2 }
 0x31c   :  { %v6716_v17 = vpop.permute.xlu1 %2920 }
 0x31d   :  { %3887 = vrot.lane.b32.xlu0 %v3022_v9, %s5062_s3  ;;  %v3024_v9 = vadd.f32 %v6562_v56, %v2384_v14  ;;  %v4967_v58 = vpop.eup %4966 }
 0x31e   :  { %3232 = vrot.lane.b32.xlu1 %v4959_v36, %s5061_s6 }
 0x31f   :  { %v3836_v55 = vpop.permute.xlu0 %3835  ;;  %4972 = vtanh.f32 %v3024_v9 }
 0x320   :  { %v6723_v53 = vpop.permute.xlu1 %2892  ;;  %4021 = vst.msk [vmem:[%s7643_s5 + $0x30] sm:$0xff] %vm3694_vm1, %v3836_v55  ;;  %v7930_v55 = vld [vmem:[#allocation44_spill] sm:$0xff] }
 0x321   :  { %3238 = vrot.lane.b32.xlu0 %v4961_v4, %s5061_s6  ;;  %v2385_v4 = vmul.f32 %v7930_v55, %v6062_v57 }
 0x322   :  { %3889 = vrot.lane.b32.xlu1 %v3023_v2, %s5062_s3 }
 0x323   :  { %v3832_v47 = vpop.permute.xlu0 %3831  ;;  %v3025_v56 = vadd.f32 %v6576_v26, %v2385_v4 }
 0x324   :  { %v3838_v63 = vpop.permute.xlu1 %3837  ;;  %4019 = vst.msk [vmem:[%s7643_s5 + $0x20] sm:$0xff] %vm3694_vm1, %v3832_v47  ;;  %v4969_v47 = vpop.eup %4968 }
 0x325   :  { %4022 = vst.msk [vmem:[%s7643_s5 + $0x38] sm:$0xff] %vm3694_vm1, %v3838_v63  ;;  %3242 = vrot.lane.b32.xlu0 %v4963_v20, %s5061_s6  ;;  %v7931_v20 = vld [vmem:[#allocation49_spill] sm:$0xff]  ;;  %4974 = vtanh.f32 %v3025_v56  ;;  %v4971_v26 = vpop.eup %4970 }
 0x326   :  { %3240 = vrot.lane.b32.xlu1 %v4965_v32, %s5061_s6  ;;  %v2386_v22 = vmul.f32 %v7931_v20, %v6068_v3 }
 0x327   :  { %v6744_v36 = vpop.permute.xlu0 %3186 }
 0x328   :  { %v3834_v12 = vpop.permute.xlu1 %3833  ;;  %v3026_v63 = vadd.f32 %v6573_v49, %v2386_v22 }
 0x329   :  { %4020 = vst.msk [vmem:[%s7643_s5 + $0x28] sm:$0xff] %vm3694_vm1, %v3834_v12  ;;  %3891 = vrot.lane.b32.xlu0 %v3024_v9, %s5062_s3  ;;  %v7932_v12 = vld [vmem:[#allocation50_spill] sm:$0xff]  ;;  %v4973_v4 = vpop.eup %4972 }
 0x32a   :  { %3244 = vrot.lane.b32.xlu1 %v4967_v58, %s5061_s6  ;;  %v2387_v58 = vmul.f32 %v7932_v12, %v6086_v45  ;;  %4976 = vtanh.f32 %v3026_v63 }
 0x32b   :  { %v6755_v2 = vpop.permute.xlu0 %3182 }
 0x32c   :  { %v6759_v14 = vpop.permute.xlu1 %3188  ;;  %v3027_v49 = vadd.f32 %v6585_v29, %v2387_v58 }
 0x32d   :  { %3246 = vrot.lane.b32.xlu0 %v4969_v47, %s5061_s6  ;;  %v7933_v47 = vld [vmem:[#allocation54_spill] sm:$0xff] }
 0x32e   :  { %3893 = vrot.lane.b32.xlu1 %v3025_v56, %s5062_s3  ;;  %v2388_v20 = vmul.f32 %v7933_v47, %v6099_v59  ;;  %4978 = vtanh.f32 %v3027_v49 }
 0x32f   :  { %v3844_v32 = vpop.permute.xlu0 %3843 }
 0x330   :  { %v6764_v9 = vpop.permute.xlu1 %3184  ;;  %4025 = vst.msk [vmem:[%s7643_s5 + $0x50] sm:$0xff] %vm3694_vm1, %v3844_v32  ;;  %v3028_v29 = vadd.f32 %v6582_v24, %v2388_v20  ;;  %v4975_v32 = vpop.eup %4974 }
 0x331   :  { %3895 = vrot.lane.b32.xlu0 %v3026_v63, %s5062_s3 }
 0x332   :  { %3248 = vrot.lane.b32.xlu1 %v4971_v26, %s5061_s6  ;;  %v7934_v26 = vld [vmem:[#allocation55_spill] sm:$0xff]  ;;  %4980 = vtanh.f32 %v3028_v29 }
 0x333   :  { %v3840_v55 = vpop.permute.xlu0 %3839  ;;  %v2389_v12 = vmul.f32 %v7934_v26, %v6109_v19 }
 0x334   :  { %v3846_v56 = vpop.permute.xlu1 %3845  ;;  %4023 = vst.msk [vmem:[%s7643_s5 + $0x40] sm:$0xff] %vm3694_vm1, %v3840_v55 }
 0x335   :  { %4026 = vst.msk [vmem:[%s7643_s5 + $0x58] sm:$0xff] %vm3694_vm1, %v3846_v56  ;;  %3250 = vrot.lane.b32.xlu0 %v4973_v4, %s5061_s6  ;;  %v3029_v24 = vadd.f32 %v6591_v5, %v2389_v12  ;;  %v7935_v4 = vld [vmem:[#allocation84_spill] sm:$0xff]  ;;  %v7937_v12 = vld [vmem:[#allocation85_spill] sm:$0xff] }
 0x336   :  { %3897 = vrot.lane.b32.xlu1 %v3027_v49, %s5062_s3  ;;  %v4977_v49 = vpop.eup %4976  ;;  %v2400_v56 = vmul.f32 %v7935_v4, %v6143_v46 }
 0x337   :  { %v6788_v22 = vpop.permute.xlu0 %3194  ;;  %4982 = vtanh.f32 %v3029_v24 }
 0x338   :  { %v3842_v63 = vpop.permute.xlu1 %3841  ;;  %v3040_v47 = vadd.f32 %v6589_v18, %v2400_v56  ;;  %v4979_v5 = vpop.eup %4978 }
 0x339   :  { %4024 = vst.msk [vmem:[%s7643_s5 + $0x48] sm:$0xff] %vm3694_vm1, %v3842_v63  ;;  %3899 = vrot.lane.b32.xlu0 %v3028_v29, %s5062_s3 }
 0x33a   :  { %3252 = vrot.lane.b32.xlu1 %v4975_v32, %s5061_s6  ;;  %v7936_v32 = vld [vmem:[#allocation79_spill] sm:$0xff]  ;;  %4984 = vtanh.f32 %v3040_v47 }
 0x33b   :  { %v6798_v58 = vpop.permute.xlu0 %3190  ;;  %v2398_v26 = vmul.f32 %v7936_v32, %v6157_v39 }
 0x33c   :  { %v6801_v55 = vpop.permute.xlu1 %3196 }
 0x33d   :  { %3254 = vrot.lane.b32.xlu0 %v4977_v49, %s5061_s6  ;;  %v2401_v49 = vmul.f32 %v7937_v12, %v6164_v37  ;;  %v3038_v18 = vadd.f32 %v6598_v23, %v2398_v26  ;;  %v7939_v23 = vld [vmem:[#allocation80_spill] sm:$0xff] }
 0x33e   :  { %3901 = vrot.lane.b32.xlu1 %v3029_v24, %s5062_s3  ;;  %v2399_v29 = vmul.f32 %v7939_v23, %v6182_v25 }
 0x33f   :  { %v3852_v20 = vpop.permute.xlu0 %3851  ;;  %v3041_v56 = vadd.f32 %v6600_v13, %v2401_v49  ;;  %4986 = vtanh.f32 %v3038_v18 }
 0x340   :  { %v6808_v63 = vpop.permute.xlu1 %3192  ;;  %4029 = vst.msk [vmem:[%s7643_s5 + $0x70] sm:$0xff] %vm3694_vm1, %v3852_v20  ;;  %v7938_v20 = vld [vmem:[#allocation60_spill] sm:$0xff]  ;;  %v3039_v26 = vadd.f32 %v6612_v0, %v2399_v29 }
 0x341   :  { %3923 = vrot.lane.b32.xlu0 %v3040_v47, %s5062_s3  ;;  %v2390_v32 = vmul.f32 %v7938_v20, %v6176_v61  ;;  %v7941_v0 = vld [vmem:[#allocation88_spill] sm:$0xff]  ;;  %v7948_v47 = vld [vmem:[#allocation87_spill] sm:$0xff]  ;;  %4988 = vtanh.f32 %v3041_v56 }
 0x342   :  { %3256 = vrot.lane.b32.xlu1 %v4979_v5, %s5061_s6  ;;  %v7960_v61 = vld [vmem:[#allocation91_spill] sm:$0xff] }
 0x343   :  { %v3848_v4 = vpop.permute.xlu0 %3847  ;;  %v3030_v13 = vadd.f32 %v6609_v10, %v2390_v32  ;;  %v4981_v10 = vpop.eup %4980  ;;  %v2404_v32 = vmul.f32 %v7941_v0, %v6198_v60 }
 0x344   :  { %v3854_v19 = vpop.permute.xlu1 %3853  ;;  %4027 = vst.msk [vmem:[%s7643_s5 + $0x60] sm:$0xff] %vm3694_vm1, %v3848_v4 }
 0x345   :  { %4030 = vst.msk [vmem:[%s7643_s5 + $0x78] sm:$0xff] %vm3694_vm1, %v3854_v19  ;;  %3919 = vrot.lane.b32.xlu0 %v3038_v18, %s5062_s3  ;;  %v7940_v19 = vld [vmem:[#allocation61_spill] sm:$0xff]  ;;  %v6858_v23 = vadd.f32 %v6618_v21, %v2404_v32  ;;  %4990 = vtanh.f32 %v3030_v13  ;;  %v7950_v18 = vld [vmem:[#allocation64_spill] sm:$0xff] }
 0x346   :  { %3925 = vrot.lane.b32.xlu1 %v3041_v56, %s5062_s3  ;;  %v2391_v49 = vmul.f32 %v7940_v19, %v6192_v6  ;;  %v7942_v19 = vld [vmem:[#allocation86_spill] sm:$0xff]  ;;  %4992 = vtanh.f32 %v3039_v26 }
 0x347   :  { %v6837_v5 = vpop.permute.xlu0 %3202  ;;  %v7944_v6 = vld [vmem:[#allocation78_spill] sm:$0xff] }
 0x348   :  { %v3850_v12 = vpop.permute.xlu1 %3849  ;;  %v3031_v4 = vadd.f32 %v6621_v30, %v2391_v49  ;;  %v4983_v30 = vpop.eup %4982  ;;  %v2402_v49 = vmul.f32 %v7942_v19, %v6211_v40  ;;  %v7946_v19 = vld [vmem:[#allocation63_spill] sm:$0xff] }
 0x349   :  { %4028 = vst.msk [vmem:[%s7643_s5 + $0x68] sm:$0xff] %vm3694_vm1, %v3850_v12  ;;  %3903 = vrot.lane.b32.xlu0 %v3030_v13, %s5062_s3 }
 0x34a   :  { %3921 = vrot.lane.b32.xlu1 %v3039_v26, %s5062_s3  ;;  %v3042_v21 = vadd.f32 %v6625_v54, %v2402_v49  ;;  %v7947_v54 = vld [vmem:[#allocation106_spill] sm:$0xff]  ;;  %4994 = vtanh.f32 %v3031_v4 }
 0x34b   :  { %v6848_v24 = vpop.permute.xlu0 %3198  ;;  %4996 = vtanh.f32 %v6858_v23 }
 0x34c   :  { %v6851_v20 = vpop.permute.xlu1 %3204  ;;  %4998 = vtanh.f32 %v3042_v21 }
 0x34d   :  { %3258 = vrot.lane.b32.xlu0 %v4981_v10, %s5061_s6  ;;  %v7943_v10 = vld [vmem:[#allocation89_spill] sm:$0xff] }
 0x34e   :  { %3905 = vrot.lane.b32.xlu1 %v3031_v4, %s5062_s3  ;;  %v2405_v0 = vmul.f32 %v7943_v10, %v6216_v8  ;;  %v7959_v8 = vld [vmem:[#allocation112_spill] sm:$0xff] }
 0x34f   :  { %v3860_v29 = vpop.permute.xlu0 %3859 }
 0x350   :  { %v6860_v12 = vpop.permute.xlu1 %3200  ;;  %4033 = vst.msk [vmem:[%s7643_s5 + $0x90] sm:$0xff] %vm3694_vm1, %v3860_v29  ;;  %v3045_v60 = vadd.f32 %v7944_v6, %v2405_v0  ;;  %v7945_v29 = vld [vmem:[#allocation105_spill] sm:$0xff] }
 0x351   :  { %3931 = vrot.lane.b32.xlu0 %v6858_v23, %s5062_s3  ;;  %v2392_v40 = vmul.f32 %v7946_v19, %v7945_v29 }
 0x352   :  { %3260 = vrot.lane.b32.xlu1 %v4983_v30, %s5061_s6  ;;  %v2403_v30 = vmul.f32 %v7948_v47, %v7947_v54  ;;  %v7954_v54 = vld [vmem:[#allocation90_spill] sm:$0xff]  ;;  %5000 = vtanh.f32 %v3045_v60 }
 0x353   :  { %v3856_v32 = vpop.permute.xlu0 %3855  ;;  %v3032_v6 = vadd.f32 %v6634_v38, %v2392_v40  ;;  %v4985_v38 = vpop.eup %4984 }
 0x354   :  { %v3862_v25 = vpop.permute.xlu1 %3861  ;;  %4031 = vst.msk [vmem:[%s7643_s5 + $0x80] sm:$0xff] %vm3694_vm1, %v3856_v32  ;;  %v3043_v10 = vadd.f32 %v6636_v44, %v2403_v30  ;;  %v4987_v13 = vpop.eup %4986 }
 0x355   :  { %4034 = vst.msk [vmem:[%s7643_s5 + $0x98] sm:$0xff] %vm3694_vm1, %v3862_v25  ;;  %3927 = vrot.lane.b32.xlu0 %v3042_v21, %s5062_s3  ;;  %v7949_v25 = vld [vmem:[#allocation107_spill] sm:$0xff]  ;;  %v4989_v26 = vpop.eup %4988  ;;  %5002 = vtanh.f32 %v3032_v6  ;;  %v7962_v21 = vld [vmem:[#allocation69_spill] sm:$0xff] }
 0x356   :  { %3933 = vrot.lane.b32.xlu1 %v3045_v60, %s5062_s3  ;;  %v2393_v32 = vmul.f32 %v7950_v18, %v7949_v25  ;;  %v4991_v30 = vpop.eup %4990  ;;  %v7951_v18 = vld [vmem:[#allocation108_spill] sm:$0xff]  ;;  %5004 = vtanh.f32 %v3043_v10 }
 0x357   :  { %v6890_v49 = vpop.permute.xlu0 %3210  ;;  %v4993_v4 = vpop.eup %4992 }
 0x358   :  { %v3858_v0 = vpop.permute.xlu1 %3857  ;;  %v3033_v44 = vadd.f32 %v6648_v27, %v2393_v32  ;;  %v7952_v32 = vld [vmem:[#allocation93_spill] sm:$0xff]  ;;  %v4995_v25 = vpop.eup %4994 }
 0x359   :  { %4032 = vst.msk [vmem:[%s7643_s5 + $0x88] sm:$0xff] %vm3694_vm1, %v3858_v0  ;;  %3907 = vrot.lane.b32.xlu0 %v3032_v6, %s5062_s3 }
 0x35a   :  { %3929 = vrot.lane.b32.xlu1 %v3043_v10, %s5062_s3  ;;  %5006 = vtanh.f32 %v3033_v44 }
 0x35b   :  { %v6901_v40 = vpop.permute.xlu0 %3206 }
 0x35c   :  { %v6904_v56 = vpop.permute.xlu1 %3212 }
 0x35d   :  { %3282 = vrot.lane.b32.xlu0 %v4985_v38, %s5061_s6  ;;  %v2408_v38 = vmul.f32 %v7952_v32, %v7951_v18  ;;  %v7958_v18 = vld [vmem:[#allocation68_spill] sm:$0xff] }
 0x35e   :  { %3909 = vrot.lane.b32.xlu1 %v3033_v44, %s5062_s3 }
 0x35f   :  { %v3868_v19 = vpop.permute.xlu0 %3867 }
 0x360   :  { %v6908_v47 = vpop.permute.xlu1 %3208  ;;  %4037 = vst.msk [vmem:[%s7643_s5 + $0xb0] sm:$0xff] %vm3694_vm1, %v3868_v19  ;;  %v3048_v19 = vadd.f32 %v6645_v35, %v2408_v38 }
 0x361   :  { %3278 = vrot.lane.b32.xlu0 %v4987_v13, %s5061_s6 }
 0x362   :  { %3284 = vrot.lane.b32.xlu1 %v4989_v26, %s5061_s6  ;;  %5008 = vtanh.f32 %v3048_v19 }
 0x363   :  { %v3864_v27 = vpop.permute.xlu0 %3863 }
 0x364   :  { %v3870_v0 = vpop.permute.xlu1 %3869  ;;  %4035 = vst.msk [vmem:[%s7643_s5 + $0xa0] sm:$0xff] %vm3694_vm1, %v3864_v27  ;;  %v7953_v27 = vld [vmem:[#allocation109_spill] sm:$0xff] }
 0x365   :  { %4038 = vst.msk [vmem:[%s7643_s5 + $0xb8] sm:$0xff] %vm3694_vm1, %v3870_v0  ;;  %3262 = vrot.lane.b32.xlu0 %v4991_v30, %s5061_s6  ;;  %v2406_v29 = vmul.f32 %v7954_v54, %v7953_v27  ;;  %v7955_v0 = vld [vmem:[#allocation110_spill] sm:$0xff]  ;;  %v7957_v27 = vld [vmem:[#allocation111_spill] sm:$0xff] }
 0x366   :  { %3280 = vrot.lane.b32.xlu1 %v4993_v4, %s5061_s6  ;;  %v7956_v30 = vld [vmem:[#allocation94_spill] sm:$0xff] }
 0x367   :  { %v6929_v13 = vpop.permute.xlu0 %3218  ;;  %v2409_v32 = vmul.f32 %v7956_v30, %v7955_v0  ;;  %v3046_v35 = vadd.f32 %v6654_v11, %v2406_v29  ;;  %v2407_v30 = vmul.f32 %v7960_v61, %v7959_v8  ;;  %v7961_v61 = vld [vmem:[#allocation113_spill] sm:$0xff] }
 0x368   :  { %v3866_v26 = vpop.permute.xlu1 %3865 }
 0x369   :  { %4036 = vst.msk [vmem:[%s7643_s5 + $0xa8] sm:$0xff] %vm3694_vm1, %v3866_v26  ;;  %3939 = vrot.lane.b32.xlu0 %v3048_v19, %s5062_s3  ;;  %v3049_v54 = vadd.f32 %v6657_v33, %v2409_v32  ;;  %v2394_v26 = vmul.f32 %v7958_v18, %v7957_v27  ;;  %v3047_v29 = vadd.f32 %v6663_v51, %v2407_v30  ;;  %v7968_v19 = vld [vmem:[#allocation96_spill] sm:$0xff]  ;;  %5010 = vtanh.f32 %v3046_v35 }
 0x36a   :  { %3264 = vrot.lane.b32.xlu1 %v4995_v25, %s5061_s6  ;;  %v2395_v25 = vmul.f32 %v7962_v21, %v7961_v61  ;;  %v7963_v21 = vld [vmem:[#allocation115_spill] sm:$0xff]  ;;  %v7966_v61 = vld [vmem:[#allocation74_spill] sm:$0xff] }
 0x36b   :  { %v6943_v4 = vpop.permute.xlu0 %3214  ;;  %v3034_v11 = vadd.f32 %v6661_v31, %v2394_v26  ;;  %v4997_v31 = vpop.eup %4996  ;;  %5012 = vtanh.f32 %v3049_v54 }
 0x36c   :  { %v6946_v38 = vpop.permute.xlu1 %3220  ;;  %v3035_v51 = vadd.f32 %v6670_v41, %v2395_v25  ;;  %v4999_v10 = vpop.eup %4998  ;;  %v7964_v25 = vld [vmem:[#allocation95_spill] sm:$0xff] }
 0x36d   :  { %3935 = vrot.lane.b32.xlu0 %v3046_v35, %s5062_s3  ;;  %v5001_v32 = vpop.eup %5000  ;;  %5014 = vtanh.f32 %v3034_v11  ;;  %v7969_v35 = vld [vmem:[#allocation119_spill] sm:$0xff] }
 0x36e   :  { %3941 = vrot.lane.b32.xlu1 %v3049_v54, %s5062_s3  ;;  %v5003_v30 = vpop.eup %5002  ;;  %v7970_v54 = vld [vmem:[#allocation75_spill] sm:$0xff]  ;;  %5016 = vtanh.f32 %v3047_v29 }
 0x36f   :  { %v3876_v23 = vpop.permute.xlu0 %3875  ;;  %v5005_v44 = vpop.eup %5004  ;;  %5018 = vtanh.f32 %v3035_v51 }
 0x370   :  { %v6956_v33 = vpop.permute.xlu1 %3216  ;;  %4041 = vst.msk [vmem:[%s7643_s5 + $0xd0] sm:$0xff] %vm3694_vm1, %v3876_v23 }
 0x371   :  { %3911 = vrot.lane.b32.xlu0 %v3034_v11, %s5062_s3 }
 0x372   :  { %3937 = vrot.lane.b32.xlu1 %v3047_v29, %s5062_s3  ;;  %v7971_v29 = vld [vmem:[#allocation114_spill] sm:$0xff] }
 0x373   :  { %v3872_v60 = vpop.permute.xlu0 %3871 }
 0x374   :  { %v3878_v18 = vpop.permute.xlu1 %3877  ;;  %4039 = vst.msk [vmem:[%s7643_s5 + $0xc0] sm:$0xff] %vm3694_vm1, %v3872_v60  ;;  %v2410_v60 = vmul.f32 %v7964_v25, %v7963_v21 }
 0x375   :  { %4042 = vst.msk [vmem:[%s7643_s5 + $0xd8] sm:$0xff] %vm3694_vm1, %v3878_v18  ;;  %3290 = vrot.lane.b32.xlu0 %v4997_v31, %s5061_s6 }
 0x376   :  { %3913 = vrot.lane.b32.xlu1 %v3035_v51, %s5062_s3  ;;  %v3050_v31 = vadd.f32 %v6705_v48, %v2410_v60 }
 0x377   :  { %v6977_v6 = vpop.permute.xlu0 %3226 }
 0x378   :  { %v3874_v41 = vpop.permute.xlu1 %3873 }
 0x379   :  { %4040 = vst.msk [vmem:[%s7643_s5 + $0xc8] sm:$0xff] %vm3694_vm1, %v3874_v41  ;;  %3286 = vrot.lane.b32.xlu0 %v4999_v10, %s5061_s6  ;;  %v5007_v41 = vpop.eup %5006 }
 0x37a   :  { %3292 = vrot.lane.b32.xlu1 %v5001_v32, %s5061_s6  ;;  %v7965_v32 = vld [vmem:[#allocation117_spill] sm:$0xff] }
 0x37b   :  { %v6985_v26 = vpop.permute.xlu0 %3222  ;;  %v2396_v8 = vmul.f32 %v7966_v61, %v7965_v32 }
 0x37c   :  { %v6987_v23 = vpop.permute.xlu1 %3228 }
 0x37d   :  { %3266 = vrot.lane.b32.xlu0 %v5003_v30, %s5061_s6  ;;  %v7967_v30 = vld [vmem:[#allocation118_spill] sm:$0xff]  ;;  %v3036_v48 = vadd.f32 %v6714_v7, %v2396_v8  ;;  %v2397_v8 = vmul.f32 %v7970_v54, %v7969_v35 }
 0x37e   :  { %3288 = vrot.lane.b32.xlu1 %v5005_v44, %s5061_s6  ;;  %v2411_v25 = vmul.f32 %v7968_v19, %v7967_v30 }
 0x37f   :  { %v3880_v18 = vpop.permute.xlu0 %3879  ;;  %v3037_v61 = vadd.f32 %v6723_v53, %v2397_v8 }
 0x380   :  { %v6994_v10 = vpop.permute.xlu1 %3224  ;;  %4043 = vst.msk [vmem:[%s7643_s5 + $0xe0] sm:$0xff] %vm3694_vm1, %v3880_v18  ;;  %v3051_v60 = vadd.f32 %v6716_v17, %v2411_v25  ;;  %v5009_v17 = vpop.eup %5008 }
 0x381   :  { %3943 = vrot.lane.b32.xlu0 %v3050_v31, %s5062_s3 }
 0x382   :  { %3268 = vrot.lane.b32.xlu1 %v5007_v41, %s5061_s6  ;;  %v7972_v41 = vld [vmem:[#allocation97_spill] sm:$0xff] }
 0x383   :  { %v3884_v44 = vpop.permute.xlu0 %3883  ;;  %v2412_v19 = vmul.f32 %v7972_v41, %v7971_v29  ;;  %v7974_v41 = vld [vmem:[#allocation99_spill] sm:$0xff] }
 0x384   :  { %v3882_v21 = vpop.permute.xlu1 %3881  ;;  %4045 = vst.msk [vmem:[%s7643_s5 + $0xf0] sm:$0xff] %vm3694_vm1, %v3884_v44 }
 0x385   :  { %4044 = vst.msk [vmem:[%s7643_s5 + $0xe8] sm:$0xff] %vm3694_vm1, %v3882_v21  ;;  %3915 = vrot.lane.b32.xlu0 %v3036_v48, %s5062_s3  ;;  %v5011_v21 = vpop.eup %5010  ;;  %v7037_v44 = vadd.f32 %v6696_v16, %v2412_v19 }
 0x386   :  { %3945 = vrot.lane.b32.xlu1 %v3051_v60, %s5062_s3  ;;  %v5013_v53 = vpop.eup %5012 }
 0x387   :  { %v7020_v7 = vpop.permute.xlu0 %3234  ;;  %v5015_v8 = vpop.eup %5014  ;;  %5020 = vtanh.f32 %v7037_v44 }
 0x388   :  { %v3886_v18 = vpop.permute.xlu1 %3885  ;;  %v5017_v51 = vpop.eup %5016  ;;  %5022 = vtanh.f32 %v3050_v31 }
 0x389   :  { %4046 = vst.msk [vmem:[%s7643_s5 + $0xf8] sm:$0xff] %vm3694_vm1, %v3886_v18  ;;  %3298 = vrot.lane.b32.xlu0 %v5009_v17, %s5061_s6  ;;  %v7973_v18 = vld [vmem:[#allocation116_spill] sm:$0xff] }
 0x38a   :  { %3917 = vrot.lane.b32.xlu1 %v3037_v61, %s5062_s3  ;;  %v2413_v35 = vmul.f32 %v7974_v41, %v7973_v18 }
 0x38b   :  { %v7029_v11 = vpop.permute.xlu0 %3230 }
 0x38c   :  { %v7033_v25 = vpop.permute.xlu1 %3236  ;;  %v7052_v16 = vadd.f32 %v6707_v15, %v2413_v35  ;;  %v7976_v15 = vld [vmem:[#allocation41_spill] sm:$0xff] }
 0x38d   :  { %3294 = vrot.lane.b32.xlu0 %v5011_v21, %s5061_s6  ;;  %v7975_v21 = vld [vmem:[#allocation39_spill] sm:$0xff] }
 0x38e   :  { %3300 = vrot.lane.b32.xlu1 %v5013_v53, %s5061_s6  ;;  %v3376_v19 = vmul.f32 %v6744_v36, %v7975_v21  ;;  %5024 = vtanh.f32 %v7052_v16  ;;  %v3374_v36 = vmul.f32 %v6755_v2, %v7976_v15  ;;  %v7978_v21 = vld [vmem:[#allocation42_spill] sm:$0xff] }
 0x38f   :  { %v3888_v54 = vpop.permute.xlu0 %3887  ;;  %5026 = vtanh.f32 %v3036_v48 }
 0x390   :  { %v7040_v17 = vpop.permute.xlu1 %3232  ;;  %4047 = vst.msk [vmem:[%s7643_s5 + $0x100] sm:$0xff] %vm3694_vm1, %v3888_v54  ;;  %v5019_v54 = vpop.eup %5018  ;;  %5028 = vtanh.f32 %v3051_v60 }
 0x391   :  { %3270 = vrot.lane.b32.xlu0 %v5015_v8, %s5061_s6  ;;  %v7977_v8 = vld [vmem:[#allocation40_spill] sm:$0xff]  ;;  %5030 = vtanh.f32 %v3037_v61 }
 0x392   :  { %3296 = vrot.lane.b32.xlu1 %v5017_v51, %s5061_s6  ;;  %v3377_v51 = vmul.f32 %v6759_v14, %v7977_v8  ;;  %v7979_v8 = vld [vmem:[#allocation45_spill] sm:$0xff] }
 0x393   :  { %v7056_v53 = vpop.permute.xlu0 %3238 }
 0x394   :  { %v3890_v30 = vpop.permute.xlu1 %3889 }
 0x395   :  { %4048 = vst.msk [vmem:[%s7643_s5 + $0x108] sm:$0xff] %vm3694_vm1, %v3890_v30  ;;  %3506 = vrot.lane.b32.xlu0 %v3376_v19, %s5063_s17  ;;  %v5021_v30 = vpop.eup %5020  ;;  %v3375_v19 = vmul.f32 %v6764_v9, %v7978_v21 }
 0x396   :  { %3272 = vrot.lane.b32.xlu1 %v5019_v54, %s5061_s6  ;;  %v5023_v14 = vpop.eup %5022 }
 0x397   :  { %v7067_v35 = vpop.permute.xlu0 %3242 }
 0x398   :  { %v7071_v41 = vpop.permute.xlu1 %3240  ;;  %v5025_v60 = vpop.eup %5024 }
 0x399   :  { %3502 = vrot.lane.b32.xlu0 %v3374_v36, %s5063_s17  ;;  %v5027_v15 = vpop.eup %5026 }
 0x39a   :  { %3508 = vrot.lane.b32.xlu1 %v3377_v51, %s5063_s17  ;;  %v5029_v61 = vpop.eup %5028  ;;  %v3380_v51 = vmul.f32 %v6788_v22, %v7979_v8 }
 0x39b   :  { %v3892_v31 = vpop.permute.xlu0 %3891  ;;  %v5031_v21 = vpop.eup %5030 }
 0x39c   :  { %v7077_v54 = vpop.permute.xlu1 %3244  ;;  %4049 = vst.msk [vmem:[%s7643_s5 + $0x110] sm:$0xff] %vm3694_vm1, %v3892_v31 }
 0x39d   :  { %3306 = vrot.lane.b32.xlu0 %v5021_v30, %s5061_s6 }
 0x39e   :  { %3504 = vrot.lane.b32.xlu1 %v3375_v19, %s5063_s17  ;;  %v7980_v19 = vld [vmem:[#allocation47_spill] sm:$0xff] }
 0x39f   :  { %v7085_v2 = vpop.permute.xlu0 %3246 }
 0x3a0   :  { %v3894_v48 = vpop.permute.xlu1 %3893 }
 0x3a1   :  { %4050 = vst.msk [vmem:[%s7643_s5 + $0x118] sm:$0xff] %vm3694_vm1, %v3894_v48  ;;  %3302 = vrot.lane.b32.xlu0 %v5023_v14, %s5061_s6  ;;  %v3378_v14 = vmul.f32 %v6798_v58, %v7980_v19  ;;  %v7983_v58 = vld [vmem:[#allocation48_spill] sm:$0xff] }
 0x3a2   :  { %3308 = vrot.lane.b32.xlu1 %v5025_v60, %s5061_s6  ;;  %v7981_v60 = vld [vmem:[#allocation46_spill] sm:$0xff] }
 0x3a3   :  { %v3896_v9 = vpop.permute.xlu0 %3895  ;;  %v3381_v22 = vmul.f32 %v6801_v55, %v7981_v60 }
 0x3a4   :  { %v7093_v36 = vpop.permute.xlu1 %3248  ;;  %4051 = vst.msk [vmem:[%s7643_s5 + $0x120] sm:$0xff] %vm3694_vm1, %v3896_v9 }
 0x3a5   :  { %3274 = vrot.lane.b32.xlu0 %v5027_v15, %s5061_s6  ;;  %v7982_v15 = vld [vmem:[#allocation51_spill] sm:$0xff] }
 0x3a6   :  { %3304 = vrot.lane.b32.xlu1 %v5029_v61, %s5061_s6  ;;  %v3384_v61 = vmul.f32 %v6837_v5, %v7982_v15  ;;  %v7985_v5 = vld [vmem:[#allocation53_spill] sm:$0xff] }
 0x3a7   :  { %v7103_v31 = vpop.permute.xlu0 %3250 }
 0x3a8   :  { %v3898_v30 = vpop.permute.xlu1 %3897 }
 0x3a9   :  { %4052 = vst.msk [vmem:[%s7643_s5 + $0x128] sm:$0xff] %vm3694_vm1, %v3898_v30  ;;  %3514 = vrot.lane.b32.xlu0 %v3380_v51, %s5063_s17  ;;  %v3379_v51 = vmul.f32 %v6808_v63, %v7983_v58  ;;  %v7984_v30 = vld [vmem:[#allocation52_spill] sm:$0xff]  ;;  %v7986_v63 = vld [vmem:[#allocation57_spill] sm:$0xff] }
 0x3aa   :  { %3276 = vrot.lane.b32.xlu1 %v5031_v21, %s5061_s6  ;;  %v3382_v21 = vmul.f32 %v6848_v24, %v7984_v30  ;;  %v3388_v60 = vmul.f32 %v6890_v49, %v7986_v63  ;;  %v7987_v24 = vld [vmem:[#allocation56_spill] sm:$0xff] }
 0x3ab   :  { %v3900_v48 = vpop.permute.xlu0 %3899  ;;  %v3383_v15 = vmul.f32 %v6860_v12, %v7987_v24  ;;  %v7989_v12 = vld [vmem:[#allocation58_spill] sm:$0xff] }
 0x3ac   :  { %v7115_v9 = vpop.permute.xlu1 %3252  ;;  %4053 = vst.msk [vmem:[%s7643_s5 + $0x130] sm:$0xff] %vm3694_vm1, %v3900_v48 }
 0x3ad   :  { %3510 = vrot.lane.b32.xlu0 %v3378_v14, %s5063_s17  ;;  %v3385_v14 = vmul.f32 %v6851_v20, %v7985_v5  ;;  %v7988_v20 = vld [vmem:[#allocation59_spill] sm:$0xff] }
 0x3ae   :  { %3516 = vrot.lane.b32.xlu1 %v3381_v22, %s5063_s17  ;;  %v3386_v49 = vmul.f32 %v6901_v40, %v7988_v20  ;;  %v7990_v40 = vld [vmem:[#allocation65_spill] sm:$0xff] }
 0x3af   :  { %v7125_v8 = vpop.permute.xlu0 %3254  ;;  %v3392_v30 = vmul.f32 %v6929_v13, %v7990_v40  ;;  %v7993_v13 = vld [vmem:[#allocation66_spill] sm:$0xff] }
 0x3b0   :  { %v3902_v55 = vpop.permute.xlu1 %3901 }
 0x3b1   :  { %4054 = vst.msk [vmem:[%s7643_s5 + $0x138] sm:$0xff] %vm3694_vm1, %v3902_v55  ;;  %3522 = vrot.lane.b32.xlu0 %v3384_v61, %s5063_s17 }
 0x3b2   :  { %3512 = vrot.lane.b32.xlu1 %v3379_v51, %s5063_s17  ;;  %v3389_v51 = vmul.f32 %v6904_v56, %v7989_v12  ;;  %v7991_v56 = vld [vmem:[#allocation62_spill] sm:$0xff] }
 0x3b3   :  { %v3924_v19 = vpop.permute.xlu0 %3923 }
 0x3b4   :  { %v7139_v48 = vpop.permute.xlu1 %3256  ;;  %4065 = vst.msk [vmem:[%s7643_s5 + $0x190] sm:$0xff] %vm3694_vm1, %v3924_v19  ;;  %v3387_v19 = vmul.f32 %v6908_v47, %v7991_v56  ;;  %v7994_v47 = vld [vmem:[#allocation71_spill] sm:$0xff]  ;;  %v3398_v56 = vmul.f32 %v7029_v11, %v7874_v43  ;;  %v3404_v43 = vmul.f32 %v7067_v35, %v5993_v28  ;;  %v3405_v28 = vmul.f32 %v7077_v54, %v6015_v1 }
 0x3b5   :  { %3518 = vrot.lane.b32.xlu0 %v3382_v21, %s5063_s17  ;;  %v3407_v1 = vmul.f32 %v7093_v36, %v6020_v34  ;;  %v3409_v34 = vmul.f32 %v7115_v9, %v6062_v57 }
 0x3b6   :  { %3524 = vrot.lane.b32.xlu1 %v3385_v14, %s5063_s17  ;;  %v7992_v14 = vld [vmem:[#allocation67_spill] sm:$0xff] }
 0x3b7   :  { %v3920_v22 = vpop.permute.xlu0 %3919  ;;  %v3390_v63 = vmul.f32 %v6943_v4, %v7992_v14  ;;  %v7995_v4 = vld [vmem:[#allocation70_spill] sm:$0xff] }
 0x3b8   :  { %v3926_v61 = vpop.permute.xlu1 %3925  ;;  %4063 = vst.msk [vmem:[%s7643_s5 + $0x180] sm:$0xff] %vm3694_vm1, %v3920_v22  ;;  %v3393_v22 = vmul.f32 %v6946_v38, %v7993_v13  ;;  %v3391_v20 = vmul.f32 %v6956_v33, %v7995_v4  ;;  %v7996_v38 = vld [vmem:[#allocation73_spill] sm:$0xff]  ;;  %v7997_v33 = vld [vmem:[#allocation72_spill] sm:$0xff] }
 0x3b9   :  { %4066 = vst.msk [vmem:[%s7643_s5 + $0x198] sm:$0xff] %vm3694_vm1, %v3926_v61  ;;  %3530 = vrot.lane.b32.xlu0 %v3388_v60, %s5063_s17  ;;  %v3397_v12 = vmul.f32 %v6987_v23, %v7997_v33  ;;  %v7998_v23 = vld [vmem:[#allocation76_spill] sm:$0xff]  ;;  %v8006_v33 = vld [vmem:[#allocation101_spill] sm:$0xff] }
 0x3ba   :  { %3520 = vrot.lane.b32.xlu1 %v3383_v15, %s5063_s17  ;;  %v3396_v15 = vmul.f32 %v6977_v6, %v7994_v47  ;;  %v3394_v6 = vmul.f32 %v6985_v26, %v7996_v38  ;;  %v3400_v26 = vmul.f32 %v7020_v7, %v7918_v50  ;;  %v3395_v40 = vmul.f32 %v6994_v10, %v7998_v23  ;;  %v8000_v10 = vld [vmem:[#allocation83_spill] sm:$0xff] }
 0x3bb   :  { %v3904_v58 = vpop.permute.xlu0 %3903  ;;  %v3402_v14 = vmul.f32 %v7056_v53, %v8000_v10 }
 0x3bc   :  { %v3922_v55 = vpop.permute.xlu1 %3921  ;;  %4055 = vst.msk [vmem:[%s7643_s5 + $0x140] sm:$0xff] %vm3694_vm1, %v3904_v58 }
 0x3bd   :  { %4064 = vst.msk [vmem:[%s7643_s5 + $0x188] sm:$0xff] %vm3694_vm1, %v3922_v55  ;;  %3526 = vrot.lane.b32.xlu0 %v3386_v49, %s5063_s17 }
 0x3be   :  { %3532 = vrot.lane.b32.xlu1 %v3389_v51, %s5063_s17 }
 0x3bf   :  { %v7177_v21 = vpop.permute.xlu0 %3258 }
 0x3c0   :  { %v3906_v5 = vpop.permute.xlu1 %3905  ;;  %v3412_v36 = vmul.f32 %v7177_v21, %v6099_v59 }
 0x3c1   :  { %4056 = vst.msk [vmem:[%s7643_s5 + $0x148] sm:$0xff] %vm3694_vm1, %v3906_v5  ;;  %3538 = vrot.lane.b32.xlu0 %v3392_v30, %s5063_s17  ;;  %v7999_v5 = vld [vmem:[#allocation81_spill] sm:$0xff] }
 0x3c2   :  { %3528 = vrot.lane.b32.xlu1 %v3387_v19, %s5063_s17  ;;  %v3401_v50 = vmul.f32 %v7033_v25, %v7999_v5  ;;  %v3403_v25 = vmul.f32 %v7071_v41, %v5989_v62  ;;  %v3408_v62 = vmul.f32 %v7103_v31, %v6051_v42  ;;  %v3410_v42 = vmul.f32 %v7125_v8, %v6068_v3 }
 0x3c3   :  { %v3932_v60 = vpop.permute.xlu0 %3931  ;;  %v3411_v3 = vmul.f32 %v7139_v48, %v6086_v45 }
 0x3c4   :  { %v7191_v24 = vpop.permute.xlu1 %3260  ;;  %4069 = vst.msk [vmem:[%s7643_s5 + $0x1b0] sm:$0xff] %vm3694_vm1, %v3932_v60  ;;  %v8001_v60 = vld [vmem:[#allocation82_spill] sm:$0xff] }
 0x3c5   :  { %3534 = vrot.lane.b32.xlu0 %v3390_v63, %s5063_s17  ;;  %v3399_v13 = vmul.f32 %v7040_v17, %v8001_v60  ;;  %v3406_v17 = vmul.f32 %v7085_v2, %v6008_v52 }
 0x3c6   :  { %3540 = vrot.lane.b32.xlu1 %v3393_v22, %s5063_s17 }
 0x3c7   :  { %v3928_v61 = vpop.permute.xlu0 %3927 }
 0x3c8   :  { %v3934_v49 = vpop.permute.xlu1 %3933  ;;  %4067 = vst.msk [vmem:[%s7643_s5 + $0x1a0] sm:$0xff] %vm3694_vm1, %v3928_v61 }
 0x3c9   :  { %4070 = vst.msk [vmem:[%s7643_s5 + $0x1b8] sm:$0xff] %vm3694_vm1, %v3934_v49  ;;  %3546 = vrot.lane.b32.xlu0 %v3396_v15, %s5063_s17  ;;  %v8002_v15 = vld [vmem:[#allocation92_spill] sm:$0xff] }
 0x3ca   :  { %3536 = vrot.lane.b32.xlu1 %v3391_v20, %s5063_s17  ;;  %v3413_v61 = vmul.f32 %v7191_v24, %v8002_v15  ;;  %v8004_v49 = vld [vmem:[#allocation100_spill] sm:$0xff] }
 0x3cb   :  { %v3908_v58 = vpop.permute.xlu0 %3907 }
 0x3cc   :  { %v3930_v51 = vpop.permute.xlu1 %3929  ;;  %4057 = vst.msk [vmem:[%s7643_s5 + $0x150] sm:$0xff] %vm3694_vm1, %v3908_v58 }
 0x3cd   :  { %4068 = vst.msk [vmem:[%s7643_s5 + $0x1a8] sm:$0xff] %vm3694_vm1, %v3930_v51  ;;  %3542 = vrot.lane.b32.xlu0 %v3394_v6, %s5063_s17 }
 0x3ce   :  { %3548 = vrot.lane.b32.xlu1 %v3397_v12, %s5063_s17 }
 0x3cf   :  { %v3283_v55 = vpop.permute.xlu0 %3282 }
 0x3d0   :  { %v3910_v30 = vpop.permute.xlu1 %3909  ;;  %v3424_v57 = vmul.f32 %v3283_v55, %v6143_v46  ;;  %v8003_v46 = vld [vmem:[#allocation98_spill] sm:$0xff] }
 0x3d1   :  { %4058 = vst.msk [vmem:[%s7643_s5 + $0x158] sm:$0xff] %vm3694_vm1, %v3910_v30  ;;  %3554 = vrot.lane.b32.xlu0 %v3400_v26, %s5063_s17  ;;  %v8007_v26 = vld [vmem:[#allocation103_spill] sm:$0xff] }
 0x3d2   :  { %3544 = vrot.lane.b32.xlu1 %v3395_v40, %s5063_s17  ;;  %v8008_v40 = vld [vmem:[#allocation104_spill] sm:$0xff] }
 0x3d3   :  { %v3279_v19 = vpop.permute.xlu0 %3278 }
 0x3d4   :  { %v3285_v7 = vpop.permute.xlu1 %3284  ;;  %v3422_v59 = vmul.f32 %v3279_v19, %v6157_v39  ;;  %v8005_v39 = vld [vmem:[#allocation102_spill] sm:$0xff]  ;;  %v8009_v19 = vld [vmem:[#allocation105_spill] sm:$0xff] }
 0x3d5   :  { %3550 = vrot.lane.b32.xlu0 %v3398_v56, %s5063_s17  ;;  %v3425_v45 = vmul.f32 %v3285_v7, %v6164_v37  ;;  %v8010_v7 = vld [vmem:[#allocation106_spill] sm:$0xff] }
 0x3d6   :  { %3556 = vrot.lane.b32.xlu1 %v3401_v50, %s5063_s17 }
 0x3d7   :  { %v3263_v63 = vpop.permute.xlu0 %3262 }
 0x3d8   :  { %v3281_v22 = vpop.permute.xlu1 %3280  ;;  %v3414_v24 = vmul.f32 %v3263_v63, %v8003_v46  ;;  %v8011_v63 = vld [vmem:[#allocation108_spill] sm:$0xff] }
 0x3d9   :  { %3558 = vrot.lane.b32.xlu0 %v3402_v14, %s5063_s17  ;;  %v3423_v38 = vmul.f32 %v3281_v22, %v8004_v49  ;;  %v8012_v22 = vld [vmem:[#allocation107_spill] sm:$0xff] }
 0x3da   :  { %3552 = vrot.lane.b32.xlu1 %v3399_v13, %s5063_s17 }
 0x3db   :  { %v3940_v11 = vpop.permute.xlu0 %3939 }
 0x3dc   :  { %v3265_v47 = vpop.permute.xlu1 %3264  ;;  %4073 = vst.msk [vmem:[%s7643_s5 + $0x1d0] sm:$0xff] %vm3694_vm1, %v3940_v11 }
 0x3dd   :  { %3562 = vrot.lane.b32.xlu0 %v3404_v43, %s5063_s17  ;;  %v3415_v12 = vmul.f32 %v3265_v47, %v8006_v33 }
 0x3de   :  { %3560 = vrot.lane.b32.xlu1 %v3403_v25, %s5063_s17  ;;  %v8013_v25 = vld [vmem:[#allocation109_spill] sm:$0xff] }
 0x3df   :  { %v3936_v53 = vpop.permute.xlu0 %3935 }
 0x3e0   :  { %v3942_v35 = vpop.permute.xlu1 %3941  ;;  %4071 = vst.msk [vmem:[%s7643_s5 + $0x1c0] sm:$0xff] %vm3694_vm1, %v3936_v53 }
 0x3e1   :  { %4074 = vst.msk [vmem:[%s7643_s5 + $0x1d8] sm:$0xff] %vm3694_vm1, %v3942_v35  ;;  %3566 = vrot.lane.b32.xlu0 %v3406_v17, %s5063_s17 }
 0x3e2   :  { %3564 = vrot.lane.b32.xlu1 %v3405_v28, %s5063_s17 }
 0x3e3   :  { %v3912_v52 = vpop.permute.xlu0 %3911 }
 0x3e4   :  { %v3938_v41 = vpop.permute.xlu1 %3937  ;;  %4059 = vst.msk [vmem:[%s7643_s5 + $0x160] sm:$0xff] %vm3694_vm1, %v3912_v52  ;;  %v8014_v52 = vld [vmem:[#allocation112_spill] sm:$0xff] }
 0x3e5   :  { %4072 = vst.msk [vmem:[%s7643_s5 + $0x1c8] sm:$0xff] %vm3694_vm1, %v3938_v41  ;;  %3570 = vrot.lane.b32.xlu0 %v3408_v62, %s5063_s17 }
 0x3e6   :  { %3568 = vrot.lane.b32.xlu1 %v3407_v1, %s5063_s17 }
 0x3e7   :  { %v3291_v54 = vpop.permute.xlu0 %3290 }
 0x3e8   :  { %v3914_v2 = vpop.permute.xlu1 %3913  ;;  %v3428_v37 = vmul.f32 %v3291_v54, %v8005_v39  ;;  %v8015_v54 = vld [vmem:[#allocation113_spill] sm:$0xff] }
 0x3e9   :  { %4060 = vst.msk [vmem:[%s7643_s5 + $0x168] sm:$0xff] %vm3694_vm1, %v3914_v2  ;;  %3574 = vrot.lane.b32.xlu0 %v3410_v42, %s5063_s17 }
 0x3ea   :  { %3572 = vrot.lane.b32.xlu1 %v3409_v34, %s5063_s17 }
 0x3eb   :  { %v3287_v31 = vpop.permute.xlu0 %3286 }
 0x3ec   :  { %v3293_v8 = vpop.permute.xlu1 %3292  ;;  %v3426_v55 = vmul.f32 %v3287_v31, %v8007_v26 }
 0x3ed   :  { %3578 = vrot.lane.b32.xlu0 %v3412_v36, %s5063_s17  ;;  %v3429_v30 = vmul.f32 %v3293_v8, %v8008_v40 }
 0x3ee   :  { %3576 = vrot.lane.b32.xlu1 %v3411_v3, %s5063_s17 }
 0x3ef   :  { %v3267_v9 = vpop.permute.xlu0 %3266 }
 0x3f0   :  { %v3289_v4 = vpop.permute.xlu1 %3288  ;;  %v3416_v5 = vmul.f32 %v3267_v9, %v8009_v19  ;;  %v8017_v9 = vld [vmem:[#allocation118_spill] sm:$0xff] }
 0x3f1   :  { %3602 = vrot.lane.b32.xlu0 %v3424_v57, %s5063_s17  ;;  %v3427_v10 = vmul.f32 %v3289_v4, %v8010_v7  ;;  %v8018_v4 = vld [vmem:[#allocation119_spill] sm:$0xff] }
 0x3f2   :  { %3580 = vrot.lane.b32.xlu1 %v3413_v61, %s5063_s17 }
 0x3f3   :  { %v3944_v21 = vpop.permute.xlu0 %3943 }
 0x3f4   :  { %v3269_v48 = vpop.permute.xlu1 %3268  ;;  %4075 = vst.msk [vmem:[%s7643_s5 + $0x1e0] sm:$0xff] %vm3694_vm1, %v3944_v21 }
 0x3f5   :  { %3598 = vrot.lane.b32.xlu0 %v3422_v59, %s5063_s17  ;;  %v3417_v43 = vmul.f32 %v3269_v48, %v8012_v22 }
 0x3f6   :  { %3604 = vrot.lane.b32.xlu1 %v3425_v45, %s5063_s17 }
 0x3f7   :  { %v3916_v20 = vpop.permute.xlu0 %3915 }
 0x3f8   :  { %v3946_v6 = vpop.permute.xlu1 %3945  ;;  %4061 = vst.msk [vmem:[%s7643_s5 + $0x170] sm:$0xff] %vm3694_vm1, %v3916_v20 }
 0x3f9   :  { %4076 = vst.msk [vmem:[%s7643_s5 + $0x1e8] sm:$0xff] %vm3694_vm1, %v3946_v6  ;;  %3582 = vrot.lane.b32.xlu0 %v3414_v24, %s5063_s17 }
 0x3fa   :  { %3600 = vrot.lane.b32.xlu1 %v3423_v38, %s5063_s17 }
 0x3fb   :  { %v3299_v58 = vpop.permute.xlu0 %3298 }
 0x3fc   :  { %v3918_v51 = vpop.permute.xlu1 %3917  ;;  %v3432_v60 = vmul.f32 %v3299_v58, %v8011_v63 }
 0x3fd   :  { %4062 = vst.msk [vmem:[%s7643_s5 + $0x178] sm:$0xff] %vm3694_vm1, %v3918_v51  ;;  %3610 = vrot.lane.b32.xlu0 %v3428_v37, %s5063_s17 }
 0x3fe   :  { %3584 = vrot.lane.b32.xlu1 %v3415_v12, %s5063_s17 }
 0x3ff   :  { %v3295_v23 = vpop.permute.xlu0 %3294 }
 0x400   :  { %v3301_v56 = vpop.permute.xlu1 %3300  ;;  %v3430_v47 = vmul.f32 %v3295_v23, %v8013_v25 }
 0x401   :  { %3606 = vrot.lane.b32.xlu0 %v3426_v55, %s5063_s17  ;;  %v3433_v53 = vmul.f32 %v3301_v56, %v7955_v0 }
 0x402   :  { %3612 = vrot.lane.b32.xlu1 %v3429_v30, %s5063_s17 }
 0x403   :  { %v3271_v50 = vpop.permute.xlu0 %3270 }
 0x404   :  { %v3297_v14 = vpop.permute.xlu1 %3296  ;;  %v3418_v35 = vmul.f32 %v3271_v50, %v7957_v27  ;;  %v8016_v27 = vld [vmem:[#allocation115_spill] sm:$0xff] }
 0x405   :  { %3586 = vrot.lane.b32.xlu0 %v3416_v5, %s5063_s17  ;;  %v3431_v0 = vmul.f32 %v3297_v14, %v8014_v52 }
 0x406   :  { %3608 = vrot.lane.b32.xlu1 %v3427_v10, %s5063_s17 }
 0x407   :  { %v3507_v13 = vpop.permute.xlu0 %3506 }
 0x408   :  { %v3273_v11 = vpop.permute.xlu1 %3272  ;;  %3697 = vst.msk [vmem:[%s7642_s4 + $0x10] sm:$0xff] %vm3694_vm1, %v3507_v13 }
 0x409   :  { %3618 = vrot.lane.b32.xlu0 %v3432_v60, %s5063_s17  ;;  %v3419_v34 = vmul.f32 %v3273_v11, %v8015_v54 }
 0x40a   :  { %3588 = vrot.lane.b32.xlu1 %v3417_v43, %s5063_s17 }
 0x40b   :  { %v3503_v17 = vpop.permute.xlu0 %3502 }
 0x40c   :  { %v3509_v28 = vpop.permute.xlu1 %3508  ;;  %3695 = vst.msk [vmem:[%s7642_s4] sm:$0xff] %vm3694_vm1, %v3503_v17 }
 0x40d   :  { %3698 = vst.msk [vmem:[%s7642_s4 + $0x18] sm:$0xff] %vm3694_vm1, %v3509_v28  ;;  %3614 = vrot.lane.b32.xlu0 %v3430_v47, %s5063_s17 }
 0x40e   :  { %3620 = vrot.lane.b32.xlu1 %v3433_v53, %s5063_s17 }
 0x40f   :  { %v3307_v62 = vpop.permute.xlu0 %3306 }
 0x410   :  { %v3505_v1 = vpop.permute.xlu1 %3504  ;;  %v3436_v41 = vmul.f32 %v3307_v62, %v7971_v29 }
 0x411   :  { %3696 = vst.msk [vmem:[%s7642_s4 + $0x8] sm:$0xff] %vm3694_vm1, %v3505_v1  ;;  %3590 = vrot.lane.b32.xlu0 %v3418_v35, %s5063_s17 }
 0x412   :  { %3616 = vrot.lane.b32.xlu1 %v3431_v0, %s5063_s17 }
 0x413   :  { %v3303_v42 = vpop.permute.xlu0 %3302 }
 0x414   :  { %v3309_v2 = vpop.permute.xlu1 %3308  ;;  %v3434_v36 = vmul.f32 %v3303_v42, %v8016_v27 }
 0x415   :  { %3626 = vrot.lane.b32.xlu0 %v3436_v41, %s5063_s17  ;;  %v3437_v3 = vmul.f32 %v3309_v2, %v7973_v18 }
 0x416   :  { %3592 = vrot.lane.b32.xlu1 %v3419_v34, %s5063_s17 }
 0x417   :  { %v3275_v31 = vpop.permute.xlu0 %3274 }
 0x418   :  { %v3305_v8 = vpop.permute.xlu1 %3304  ;;  %v3420_v29 = vmul.f32 %v3275_v31, %v7965_v32 }
 0x419   :  { %3622 = vrot.lane.b32.xlu0 %v3434_v36, %s5063_s17  ;;  %v3435_v15 = vmul.f32 %v3305_v8, %v8017_v9 }
 0x41a   :  { %3628 = vrot.lane.b32.xlu1 %v3437_v3, %s5063_s17 }
 0x41b   :  { %v3515_v57 = vpop.permute.xlu0 %3514 }
 0x41c   :  { %v3277_v61 = vpop.permute.xlu1 %3276  ;;  %3701 = vst.msk [vmem:[%s7642_s4 + $0x30] sm:$0xff] %vm3694_vm1, %v3515_v57 }
 0x41d   :  { %3594 = vrot.lane.b32.xlu0 %v3420_v29, %s5063_s17  ;;  %v3421_v59 = vmul.f32 %v3277_v61, %v8018_v4 }
 0x41e   :  { %3624 = vrot.lane.b32.xlu1 %v3435_v15, %s5063_s17 }
 0x41f   :  { %v3511_v18 = vpop.permute.xlu0 %3510 }
 0x420   :  { %v3517_v21 = vpop.permute.xlu1 %3516  ;;  %3699 = vst.msk [vmem:[%s7642_s4 + $0x20] sm:$0xff] %vm3694_vm1, %v3511_v18 }
 0x421   :  { %3702 = vst.msk [vmem:[%s7642_s4 + $0x38] sm:$0xff] %vm3694_vm1, %v3517_v21  ;;  %3947 = vrot.lane.b32.xlu0 %v7037_v44, %s5062_s3 }
 0x422   :  { %3596 = vrot.lane.b32.xlu1 %v3421_v59, %s5063_s17 }
 0x423   :  { %v3523_v32 = vpop.permute.xlu0 %3522 }
 0x424   :  { %v3513_v45 = vpop.permute.xlu1 %3512  ;;  %3705 = vst.msk [vmem:[%s7642_s4 + $0x50] sm:$0xff] %vm3694_vm1, %v3523_v32 }
 0x425   :  { %3700 = vst.msk [vmem:[%s7642_s4 + $0x28] sm:$0xff] %vm3694_vm1, %v3513_v45 }
 0x426   :  { %3949 = vrot.lane.b32.xlu1 %v7052_v16, %s5062_s3 }
 0x427   :  { %v3519_v48 = vpop.permute.xlu0 %3518 }
 0x428   :  { %v3525_v46 = vpop.permute.xlu1 %3524  ;;  %3703 = vst.msk [vmem:[%s7642_s4 + $0x40] sm:$0xff] %vm3694_vm1, %v3519_v48 }
 0x429   :  { %3706 = vst.msk [vmem:[%s7642_s4 + $0x58] sm:$0xff] %vm3694_vm1, %v3525_v46 }
 0x42b   :  { %v3531_v44 = vpop.permute.xlu0 %3530 }
 0x42c   :  { %v3521_v24 = vpop.permute.xlu1 %3520  ;;  %3709 = vst.msk [vmem:[%s7642_s4 + $0x70] sm:$0xff] %vm3694_vm1, %v3531_v44 }
 0x42d   :  { %3704 = vst.msk [vmem:[%s7642_s4 + $0x48] sm:$0xff] %vm3694_vm1, %v3521_v24 }
 0x42f   :  { %v3527_v16 = vpop.permute.xlu0 %3526 }
 0x430   :  { %v3533_v20 = vpop.permute.xlu1 %3532  ;;  %3707 = vst.msk [vmem:[%s7642_s4 + $0x60] sm:$0xff] %vm3694_vm1, %v3527_v16 }
 0x431   :  { %3710 = vst.msk [vmem:[%s7642_s4 + $0x78] sm:$0xff] %vm3694_vm1, %v3533_v20 }
 0x433   :  { %v3539_v49 = vpop.permute.xlu0 %3538 }
 0x434   :  { %v3529_v38 = vpop.permute.xlu1 %3528  ;;  %3713 = vst.msk [vmem:[%s7642_s4 + $0x90] sm:$0xff] %vm3694_vm1, %v3539_v49 }
 0x435   :  { %3708 = vst.msk [vmem:[%s7642_s4 + $0x68] sm:$0xff] %vm3694_vm1, %v3529_v38 }
 0x437   :  { %v3535_v6 = vpop.permute.xlu0 %3534 }
 0x438   :  { %v3541_v39 = vpop.permute.xlu1 %3540  ;;  %3711 = vst.msk [vmem:[%s7642_s4 + $0x80] sm:$0xff] %vm3694_vm1, %v3535_v6 }
 0x439   :  { %3714 = vst.msk [vmem:[%s7642_s4 + $0x98] sm:$0xff] %vm3694_vm1, %v3541_v39 }
 0x43b   :  { %v3547_v37 = vpop.permute.xlu0 %3546 }
 0x43c   :  { %v3537_v58 = vpop.permute.xlu1 %3536  ;;  %3717 = vst.msk [vmem:[%s7642_s4 + $0xb0] sm:$0xff] %vm3694_vm1, %v3547_v37 }
 0x43d   :  { %3712 = vst.msk [vmem:[%s7642_s4 + $0x88] sm:$0xff] %vm3694_vm1, %v3537_v58 }
 0x43f   :  { %v3543_v33 = vpop.permute.xlu0 %3542 }
 0x440   :  { %v3549_v12 = vpop.permute.xlu1 %3548  ;;  %3715 = vst.msk [vmem:[%s7642_s4 + $0xa0] sm:$0xff] %vm3694_vm1, %v3543_v33 }
 0x441   :  { %3718 = vst.msk [vmem:[%s7642_s4 + $0xb8] sm:$0xff] %vm3694_vm1, %v3549_v12 }
 0x443   :  { %v3555_v51 = vpop.permute.xlu0 %3554 }
 0x444   :  { %v3545_v26 = vpop.permute.xlu1 %3544  ;;  %3721 = vst.msk [vmem:[%s7642_s4 + $0xd0] sm:$0xff] %vm3694_vm1, %v3555_v51 }
 0x445   :  { %3716 = vst.msk [vmem:[%s7642_s4 + $0xa8] sm:$0xff] %vm3694_vm1, %v3545_v26 }
 0x447   :  { %v3551_v55 = vpop.permute.xlu0 %3550 }
 0x448   :  { %v3557_v23 = vpop.permute.xlu1 %3556  ;;  %3719 = vst.msk [vmem:[%s7642_s4 + $0xc0] sm:$0xff] %vm3694_vm1, %v3551_v55 }
 0x449   :  { %3722 = vst.msk [vmem:[%s7642_s4 + $0xd8] sm:$0xff] %vm3694_vm1, %v3557_v23 }
 0x44b   :  { %v3559_v40 = vpop.permute.xlu0 %3558 }
 0x44c   :  { %v3553_v30 = vpop.permute.xlu1 %3552  ;;  %3723 = vst.msk [vmem:[%s7642_s4 + $0xe0] sm:$0xff] %vm3694_vm1, %v3559_v40 }
 0x44d   :  { %3720 = vst.msk [vmem:[%s7642_s4 + $0xc8] sm:$0xff] %vm3694_vm1, %v3553_v30 }
 0x44f   :  { %v3563_v56 = vpop.permute.xlu0 %3562 }
 0x450   :  { %v3561_v19 = vpop.permute.xlu1 %3560  ;;  %3725 = vst.msk [vmem:[%s7642_s4 + $0xf0] sm:$0xff] %vm3694_vm1, %v3563_v56 }
 0x451   :  { %3724 = vst.msk [vmem:[%s7642_s4 + $0xe8] sm:$0xff] %vm3694_vm1, %v3561_v19 }
 0x453   :  { %v3567_v5 = vpop.permute.xlu0 %3566 }
 0x454   :  { %v3565_v50 = vpop.permute.xlu1 %3564  ;;  %3727 = vst.msk [vmem:[%s7642_s4 + $0x100] sm:$0xff] %vm3694_vm1, %v3567_v5 }
 0x455   :  { %3726 = vst.msk [vmem:[%s7642_s4 + $0xf8] sm:$0xff] %vm3694_vm1, %v3565_v50 }
 0x457   :  { %v3571_v7 = vpop.permute.xlu0 %3570 }
 0x458   :  { %v3569_v10 = vpop.permute.xlu1 %3568  ;;  %3729 = vst.msk [vmem:[%s7642_s4 + $0x110] sm:$0xff] %vm3694_vm1, %v3571_v7 }
 0x459   :  { %3728 = vst.msk [vmem:[%s7642_s4 + $0x108] sm:$0xff] %vm3694_vm1, %v3569_v10 }
 0x45b   :  { %v3575_v14 = vpop.permute.xlu0 %3574 }
 0x45c   :  { %v3573_v63 = vpop.permute.xlu1 %3572  ;;  %3731 = vst.msk [vmem:[%s7642_s4 + $0x120] sm:$0xff] %vm3694_vm1, %v3575_v14 }
 0x45d   :  { %3730 = vst.msk [vmem:[%s7642_s4 + $0x118] sm:$0xff] %vm3694_vm1, %v3573_v63 }
 0x45f   :  { %v3579_v60 = vpop.permute.xlu0 %3578 }
 0x460   :  { %v3577_v13 = vpop.permute.xlu1 %3576  ;;  %3733 = vst.msk [vmem:[%s7642_s4 + $0x130] sm:$0xff] %vm3694_vm1, %v3579_v60 }
 0x461   :  { %3732 = vst.msk [vmem:[%s7642_s4 + $0x128] sm:$0xff] %vm3694_vm1, %v3577_v13 }
 0x463   :  { %v3603_v22 = vpop.permute.xlu0 %3602 }
 0x464   :  { %v3581_v43 = vpop.permute.xlu1 %3580  ;;  %3745 = vst.msk [vmem:[%s7642_s4 + $0x190] sm:$0xff] %vm3694_vm1, %v3603_v22 }
 0x465   :  { %3734 = vst.msk [vmem:[%s7642_s4 + $0x138] sm:$0xff] %vm3694_vm1, %v3581_v43 }
 0x467   :  { %v3599_v11 = vpop.permute.xlu0 %3598 }
 0x468   :  { %v3605_v25 = vpop.permute.xlu1 %3604  ;;  %3743 = vst.msk [vmem:[%s7642_s4 + $0x180] sm:$0xff] %vm3694_vm1, %v3599_v11 }
 0x469   :  { %3746 = vst.msk [vmem:[%s7642_s4 + $0x198] sm:$0xff] %vm3694_vm1, %v3605_v25 }
 0x46b   :  { %v3583_v47 = vpop.permute.xlu0 %3582 }
 0x46c   :  { %v3601_v17 = vpop.permute.xlu1 %3600  ;;  %3735 = vst.msk [vmem:[%s7642_s4 + $0x140] sm:$0xff] %vm3694_vm1, %v3583_v47 }
 0x46d   :  { %3744 = vst.msk [vmem:[%s7642_s4 + $0x188] sm:$0xff] %vm3694_vm1, %v3601_v17 }
 0x46f   :  { %v3611_v53 = vpop.permute.xlu0 %3610 }
 0x470   :  { %v3585_v28 = vpop.permute.xlu1 %3584  ;;  %3749 = vst.msk [vmem:[%s7642_s4 + $0x1b0] sm:$0xff] %vm3694_vm1, %v3611_v53 }
 0x471   :  { %3736 = vst.msk [vmem:[%s7642_s4 + $0x148] sm:$0xff] %vm3694_vm1, %v3585_v28 }
 0x473   :  { %v3607_v35 = vpop.permute.xlu0 %3606 }
 0x474   :  { %v3613_v62 = vpop.permute.xlu1 %3612  ;;  %3747 = vst.msk [vmem:[%s7642_s4 + $0x1a0] sm:$0xff] %vm3694_vm1, %v3607_v35 }
 0x475   :  { %3750 = vst.msk [vmem:[%s7642_s4 + $0x1b8] sm:$0xff] %vm3694_vm1, %v3613_v62 }
 0x477   :  { %v3587_v52 = vpop.permute.xlu0 %3586 }
 0x478   :  { %v3609_v0 = vpop.permute.xlu1 %3608  ;;  %3737 = vst.msk [vmem:[%s7642_s4 + $0x150] sm:$0xff] %vm3694_vm1, %v3587_v52 }
 0x479   :  { %3748 = vst.msk [vmem:[%s7642_s4 + $0x1a8] sm:$0xff] %vm3694_vm1, %v3609_v0 }
 0x47b   :  { %v3619_v1 = vpop.permute.xlu0 %3618 }
 0x47c   :  { %v3589_v41 = vpop.permute.xlu1 %3588  ;;  %3753 = vst.msk [vmem:[%s7642_s4 + $0x1d0] sm:$0xff] %vm3694_vm1, %v3619_v1 }
 0x47d   :  { %3738 = vst.msk [vmem:[%s7642_s4 + $0x158] sm:$0xff] %vm3694_vm1, %v3589_v41 }
 0x47f   :  { %v3615_v42 = vpop.permute.xlu0 %3614 }
 0x480   :  { %v3621_v54 = vpop.permute.xlu1 %3620  ;;  %3751 = vst.msk [vmem:[%s7642_s4 + $0x1c0] sm:$0xff] %vm3694_vm1, %v3615_v42 }
 0x481   :  { %3754 = vst.msk [vmem:[%s7642_s4 + $0x1d8] sm:$0xff] %vm3694_vm1, %v3621_v54 }
 0x483   :  { %v3591_v34 = vpop.permute.xlu0 %3590 }
 0x484   :  { %v3617_v2 = vpop.permute.xlu1 %3616  ;;  %3739 = vst.msk [vmem:[%s7642_s4 + $0x160] sm:$0xff] %vm3694_vm1, %v3591_v34 }
 0x485   :  { %3752 = vst.msk [vmem:[%s7642_s4 + $0x1c8] sm:$0xff] %vm3694_vm1, %v3617_v2 }
 0x487   :  { %v3627_v27 = vpop.permute.xlu0 %3626 }
 0x488   :  { %v3593_v36 = vpop.permute.xlu1 %3592  ;;  %3757 = vst.msk [vmem:[%s7642_s4 + $0x1f0] sm:$0xff] %vm3694_vm1, %v3627_v27 }
 0x489   :  { %3740 = vst.msk [vmem:[%s7642_s4 + $0x168] sm:$0xff] %vm3694_vm1, %v3593_v36 }
 0x48b   :  { %v3623_v31 = vpop.permute.xlu0 %3622 }
 0x48c   :  { %v3629_v3 = vpop.permute.xlu1 %3628  ;;  %3755 = vst.msk [vmem:[%s7642_s4 + $0x1e0] sm:$0xff] %vm3694_vm1, %v3623_v31 }
 0x48d   :  { %3758 = vst.msk [vmem:[%s7642_s4 + $0x1f8] sm:$0xff] %vm3694_vm1, %v3629_v3 }
 0x48f   :  { %v3595_v8 = vpop.permute.xlu0 %3594 }
 0x490   :  { %v3625_v29 = vpop.permute.xlu1 %3624  ;;  %3741 = vst.msk [vmem:[%s7642_s4 + $0x170] sm:$0xff] %vm3694_vm1, %v3595_v8 }
 0x491   :  { %3756 = vst.msk [vmem:[%s7642_s4 + $0x1e8] sm:$0xff] %vm3694_vm1, %v3625_v29 }
 0x493   :  { %v3948_v57 = vpop.permute.xlu0 %3947 }
 0x494   :  { %v3597_v9 = vpop.permute.xlu1 %3596  ;;  %4077 = vst.msk [vmem:[%s7643_s5 + $0x1f0] sm:$0xff] %vm3694_vm1, %v3948_v57 }
 0x495   :  { %3742 = vst.msk [vmem:[%s7642_s4 + $0x178] sm:$0xff] %vm3694_vm1, %v3597_v9 }
 0x498   :  { %v3950_v15 = vpop.permute.xlu1 %3949 }
 0x499   :  { %4078 = vst.msk [vmem:[%s7643_s5 + $0x1f8] sm:$0xff] %vm3694_vm1, %v3950_v15 }
 0x49a   :  { %4087 = vsyncpa [#allocation3], 1 }

</bundles_post_ra>
